<compile_context>
chip_gen: v7x
topology: tpu7x:2x2x1
jax: 0.10.0
libtpu: 0.0.40
codegen_flags: <defaults>
</compile_context>

<pallas_src>
import numpy as np
import jax
import jax.numpy as jnp
from jax.experimental import pallas as pl
from jax.experimental.pallas import tpu as pltpu


def _phase_table(k, s):
    """Static per-dim polyphase tables.

    Output index o = s*q + r (phase r).  Contributing padded-input indices are
    q + off[r] + j for j in [0, T), with original kernel tap k-1-((s-r)%s)-s*j,
    where T = k // s.
    """
    assert k % s == 0, "ragged polyphase (k % s != 0) not implemented"
    # TODO(synk): support k % s != 0 (per-phase tap counts become ragged).
    T = k // s
    off = [0 if r == 0 else 1 for r in range(s)]
    taps = [[k - 1 - ((s - r) % s) - s * j for j in range(T)] for r in range(s)]
    window = max(off) + T          # number of consecutive depth planes needed
    return T, off, taps, window


def _make_kernel(*, sD, sH, sW, Td, Th, Tw, offD, offH, offW, Hq, Wq, Cin,
                 n_xrefs):
    """Kernel for one (batch, base-depth-plane) grid step: all s^3 phases."""

    def kernel(*refs):
        x_refs = refs[:n_xrefs]                       # WD x (1, 1, Hp, Wp, Cin)
        w_ref, b_ref, o_ref, patch_ref = refs[n_xrefs:]
        bias_row = b_ref[...]                         # (1, Cout) f32, loaded once

        p = 0
        for rd in range(sD):
            for rh in range(sH):
                for rw in range(sW):
                    # ---- build the im2col patch for this phase (VMEM scratch) ----
                    t = 0
                    for jd in range(Td):
                        xr = x_refs[offD[rd] + jd]
                        for jh in range(Th):
                            h0 = offH[rh] + jh
                            for jw in range(Tw):
                                w0 = offW[rw] + jw
                                sl = xr[0, 0, h0:h0 + Hq, w0:w0 + Wq, :]
                                patch_ref[:, t * Cin:(t + 1) * Cin] = (
                                    sl.reshape(Hq * Wq, Cin))
                                t += 1
                    # ---- one MXU matmul with all taps folded into the K dim ----
                    acc = jnp.dot(patch_ref[...], w_ref[p],
                                  preferred_element_type=jnp.float32)
                    # store in compute layout (Hq*Wq, Cout); bias added in f32.
                    o_ref[0, 0, p] = (acc + bias_row).astype(o_ref.dtype)
                    p += 1

    return kernel


def same_pad_conv_transpose3d(x, weight, bias, kernel_size, stride,
                              padding_type='replicate'):
    """Forward of SamePadConvTranspose3d.

    x:      (N, Cin, D, H, W)            (PyTorch NCDHW)
    weight: (Cin, Cout, kD, kH, kW)      (PyTorch ConvTranspose3d layout)
    bias:   (Cout,)
    """
    if isinstance(kernel_size, int):
        kernel_size = (kernel_size,) * 3
    if isinstance(stride, int):
        stride = (stride,) * 3
    assert padding_type == 'replicate'
    # TODO(synk): other F.pad modes ('constant', 'reflect') not implemented.

    kD, kH, kW = kernel_size
    sD, sH, sW = stride
    N, Cin, D, H, W = x.shape
    Cout = weight.shape[1]
    out_dtype = x.dtype

    # Same-pad amounts (ceil on the low side) == F.pad(x, pad_input, mode).
    def pads(k, s):
        p = k - s
        return (p // 2 + p % 2, p // 2)

    pD, pH, pW = pads(kD, sD), pads(kH, sH), pads(kW, sW)

    # NCDHW -> NDHWC, replicate-pad spatial dims, cast to bf16 for the MXU.
    xc = jnp.transpose(x, (0, 2, 3, 4, 1))
    xp = jnp.pad(xc, ((0, 0), pD, pH, pW, (0, 0)), mode='edge').astype(jnp.bfloat16)
    Dp, Hp, Wp = xp.shape[1:4]

    # Output extents of ConvTranspose3d(padding = k-1) on the padded input.
    DO = (Dp - 1) * sD - kD + 2
    HO = (Hp - 1) * sH - kH + 2
    WO = (Wp - 1) * sW - kW + 2
    assert DO % sD == 0 and HO % sH == 0 and WO % sW == 0
    DOq, Hq, Wq = DO // sD, HO // sH, WO // sW        # per-phase extents

    # Static polyphase tables.
    Td, offD, tapsD, WDd = _phase_table(kD, sD)
    Th, offH, tapsH, _ = _phase_table(kH, sH)
    Tw, offW, tapsW, _ = _phase_table(kW, sW)
    P = sD * sH * sW
    T = Td * Th * Tw

    # Per-phase im2col weight matrices (P, T*Cin, Cout); row blocks ordered
    # exactly like the patch columns built inside the kernel.
    w_phases = []
    for rd in range(sD):
        for rh in range(sH):
            for rw in range(sW):
                rows = []
                for jd in range(Td):
                    for jh in range(Th):
                        for jw in range(Tw):
                            rows.append(weight[:, :, tapsD[rd][jd],
                                               tapsH[rh][jh], tapsW[rw][jw]])
                w_phases.append(jnp.concatenate(rows, axis=0))      # (T*Cin, Cout)
    wp = jnp.stack(w_phases, axis=0).astype(jnp.bfloat16)           # (P, T*Cin, Cout)
    b2 = bias.reshape(1, Cout).astype(jnp.float32)

    kernel = _make_kernel(sD=sD, sH=sH, sW=sW, Td=Td, Th=Th, Tw=Tw,
                          offD=offD, offH=offH, offW=offW,
                          Hq=Hq, Wq=Wq, Cin=Cin, n_xrefs=WDd)

    # The padded input is passed WDd times with depth-shifted index_maps so each
    # grid step only holds a WDd-plane halo window in VMEM (haloed depth tiling
    # without materializing shifted copies in HBM).
    x_specs = [
        pl.BlockSpec((1, 1, Hp, Wp, Cin),
                     (lambda n, q, j=j: (n, q + j, 0, 0, 0)))
        for j in range(WDd)
    ]

    out = pl.pallas_call(
        kernel,
        out_shape=jax.ShapeDtypeStruct((N, DOq, P, Hq * Wq, Cout), out_dtype),
        grid_spec=pltpu.PrefetchScalarGridSpec(
            num_scalar_prefetch=0,
            grid=(N, DOq),
            in_specs=x_specs + [
                pl.BlockSpec((P, T * Cin, Cout), lambda n, q: (0, 0, 0)),
                pl.BlockSpec((1, Cout), lambda n, q: (0, 0)),
            ],
            out_specs=pl.BlockSpec((1, 1, P, Hq * Wq, Cout),
                                   lambda n, q: (n, q, 0, 0, 0)),
            scratch_shapes=[pltpu.VMEM((Hq * Wq, T * Cin), jnp.bfloat16)],
        ),
        compiler_params=pltpu.CompilerParams(
            dimension_semantics=("parallel", "parallel"),
            vmem_limit_bytes=48 * 1024 * 1024,
        ),
    )(*([xp] * WDd), wp, b2)

    # (N, DOq, P, Hq*Wq, Cout) -> interleave the s^3 phases -> NCDHW.
    out = out.reshape(N, DOq, sD, sH, sW, Hq, Wq, Cout)
    out = jnp.transpose(out, (0, 1, 2, 5, 3, 6, 4, 7))   # n, qd, rd, qh, rh, qw, rw, c
    out = out.reshape(N, DO, HO, WO, Cout)
    return jnp.transpose(out, (0, 4, 1, 2, 3))


def ref_forward(x, weight, bias, kernel_size, stride):
    """Direct (definition-level) numpy reference of the PyTorch module."""
    x = np.asarray(x, dtype=np.float64)
    weight = np.asarray(weight, dtype=np.float64)
    bias = np.asarray(bias, dtype=np.float64)
    kD, kH, kW = kernel_size
    sD, sH, sW = stride

    def pads(k, s):
        p = k - s
        return (p // 2 + p % 2, p // 2)

    pD, pH, pW = pads(kD, sD), pads(kH, sH), pads(kW, sW)
    xp = np.pad(x, ((0, 0), (0, 0), pD, pH, pW), mode='edge')
    N, Cin, Dp, Hp, Wp = xp.shape
    Cout = weight.shape[1]
    full = np.zeros((N, Cout,
                     (Dp - 1) * sD + kD,
                     (Hp - 1) * sH + kH,
                     (Wp - 1) * sW + kW))
    for i in range(Dp):
        for j in range(Hp):
            for l in range(Wp):
                full[:, :,
                     i * sD:i * sD + kD,
                     j * sH:j * sH + kH,
                     l * sW:l * sW + kW] += np.einsum(
                         'nc,codef->nodef', xp[:, :, i, j, l], weight)
    y = full[:, :,
             kD - 1:full.shape[2] - (kD - 1),
             kH - 1:full.shape[3] - (kH - 1),
             kW - 1:full.shape[4] - (kW - 1)]
    return y + bias.reshape(1, Cout, 1, 1, 1)


if __name__ == "__main__":
    key = jax.random.PRNGKey(0)
    kx, kw_, kb = jax.random.split(key, 3)

    N, Cin, Cout = 2, 4, 8
    D = H = W = 4
    ksize = 4

    x = jax.random.normal(kx, (N, Cin, D, H, W), dtype=jnp.float32)
    weight = 0.1 * jax.random.normal(kw_, (Cin, Cout, ksize, ksize, ksize),
                                     dtype=jnp.float32)
    bias = 0.1 * jax.random.normal(kb, (Cout,), dtype=jnp.float32)

    # stride=2 is the decoder-upsampling config; stride=1 exercises the other
    # configuration the module supports.
    for stride in (2, 1):
        y = same_pad_conv_transpose3d(x, weight, bias, ksize, stride)
        y = jax.block_until_ready(y)
        y_ref = ref_forward(np.asarray(x), np.asarray(weight), np.asarray(bias),
                            (ksize,) * 3, (stride,) * 3)
        assert y.shape == y_ref.shape, (y.shape, y_ref.shape)
        # bf16 inputs / f32 accumulation -> tolerance loosened vs f64 reference.
        np.testing.assert_allclose(np.asarray(y), y_ref, rtol=3e-2, atol=3e-2)

    print("KERNEL_OK")
</pallas_src>

<mosaic_0001>
module attributes {stable_mosaic.version = 11 : i64} {
  func.func @kernel(%arg0: i32, %arg1: i32, %arg2: memref<1x1x6x6x4xbf16, #tpu.memory_space<vmem>>, %arg3: memref<1x1x6x6x4xbf16, #tpu.memory_space<vmem>>, %arg4: memref<1x1x6x6x4xbf16, #tpu.memory_space<vmem>>, %arg5: memref<8x32x8xbf16, #tpu.memory_space<vmem>>, %arg6: memref<1x8xf32, #tpu.memory_space<vmem>>, %arg7: memref<1x1x8x16x8xf32, #tpu.memory_space<vmem>>, %arg8: memref<16x32xbf16, #tpu.memory_space<vmem>>) attributes {dimension_semantics = [#tpu.dimension_semantics<parallel>, #tpu.dimension_semantics<parallel>], iteration_bounds = array<i64: 2, 4>, scalar_prefetch = 0 : i64, scratch_operands = 1 : i64, tpu.core_type = #tpu.core_type<tc>, window_params = [{transform_indices = @transform_0, window_bounds = array<i64: 1, 1, 6, 6, 4>}, {transform_indices = @transform_1, window_bounds = array<i64: 1, 1, 6, 6, 4>}, {transform_indices = @transform_2, window_bounds = array<i64: 1, 1, 6, 6, 4>}, {pipeline_mode = #tpu.pipeline_mode<synchronous>, transform_indices = @transform_3, window_bounds = array<i64: 8, 32, 8>}, {pipeline_mode = #tpu.pipeline_mode<synchronous>, transform_indices = @transform_4, window_bounds = array<i64: 1, 8>}, {transform_indices = @transform_5, window_bounds = array<i64: 1, 1, 8, 16, 8>}]} {
    %c0 = arith.constant 0 : index
    %c0_0 = arith.constant 0 : index
    %0 = vector.load %arg6[%c0, %c0_0] : memref<1x8xf32, #tpu.memory_space<vmem>>, vector<1x8xf32>
    %c0_1 = arith.constant 0 : index
    %c0_2 = arith.constant 0 : index
    %c0_3 = arith.constant 0 : index
    %c0_4 = arith.constant 0 : index
    %c0_5 = arith.constant 0 : index
    %1 = vector.load %arg2[%c0_1, %c0_2, %c0_3, %c0_4, %c0_5] : memref<1x1x6x6x4xbf16, #tpu.memory_space<vmem>>, vector<1x1x4x4x4xbf16>
    %2 = vector.shape_cast %1 : vector<1x1x4x4x4xbf16> to vector<4x4x4xbf16>
    %3 = vector.shape_cast %2 : vector<4x4x4xbf16> to vector<16x4xbf16>
    %c0_6 = arith.constant 0 : index
    %c0_7 = arith.constant 0 : index
    %4 = vector.load %arg8[%c0_6, %c0_7] : memref<16x32xbf16, #tpu.memory_space<vmem>>, vector<16x4xbf16>
    tpu.vector_store %arg8[%c0_6, %c0_7], %3 {strides = array<i32>} : memref<16x32xbf16, #tpu.memory_space<vmem>>, vector<16x4xbf16>,
    %c0_8 = arith.constant 0 : index
    %c0_9 = arith.constant 0 : index
    %c0_10 = arith.constant 0 : index
    %c1 = arith.constant 1 : index
    %c0_11 = arith.constant 0 : index
    %5 = vector.load %arg2[%c0_8, %c0_9, %c0_10, %c1, %c0_11] : memref<1x1x6x6x4xbf16, #tpu.memory_space<vmem>>, vector<1x1x4x4x4xbf16>
    %6 = vector.shape_cast %5 : vector<1x1x4x4x4xbf16> to vector<4x4x4xbf16>
    %7 = vector.shape_cast %6 : vector<4x4x4xbf16> to vector<16x4xbf16>
    %c0_12 = arith.constant 0 : index
    %c4 = arith.constant 4 : index
    %8 = vector.load %arg8[%c0_12, %c4] : memref<16x32xbf16, #tpu.memory_space<vmem>>, vector<16x4xbf16>
    tpu.vector_store %arg8[%c0_12, %c4], %7 {strides = array<i32>} : memref<16x32xbf16, #tpu.memory_space<vmem>>, vector<16x4xbf16>,
    %c0_13 = arith.constant 0 : index
    %c0_14 = arith.constant 0 : index
    %c1_15 = arith.constant 1 : index
    %c0_16 = arith.constant 0 : index
    %c0_17 = arith.constant 0 : index
    %9 = vector.load %arg2[%c0_13, %c0_14, %c1_15, %c0_16, %c0_17] : memref<1x1x6x6x4xbf16, #tpu.memory_space<vmem>>, vector<1x1x4x4x4xbf16>
    %10 = vector.shape_cast %9 : vector<1x1x4x4x4xbf16> to vector<4x4x4xbf16>
    %11 = vector.shape_cast %10 : vector<4x4x4xbf16> to vector<16x4xbf16>
    %c0_18 = arith.constant 0 : index
    %c8 = arith.constant 8 : index
    %12 = vector.load %arg8[%c0_18, %c8] : memref<16x32xbf16, #tpu.memory_space<vmem>>, vector<16x4xbf16>
    tpu.vector_store %arg8[%c0_18, %c8], %11 {strides = array<i32>} : memref<16x32xbf16, #tpu.memory_space<vmem>>, vector<16x4xbf16>,
    %c0_19 = arith.constant 0 : index
    %c0_20 = arith.constant 0 : index
    %c1_21 = arith.constant 1 : index
    %c1_22 = arith.constant 1 : index
    %c0_23 = arith.constant 0 : index
    %13 = vector.load %arg2[%c0_19, %c0_20, %c1_21, %c1_22, %c0_23] : memref<1x1x6x6x4xbf16, #tpu.memory_space<vmem>>, vector<1x1x4x4x4xbf16>
    %14 = vector.shape_cast %13 : vector<1x1x4x4x4xbf16> to vector<4x4x4xbf16>
    %15 = vector.shape_cast %14 : vector<4x4x4xbf16> to vector<16x4xbf16>
    %c0_24 = arith.constant 0 : index
    %c12 = arith.constant 12 : index
    %16 = vector.load %arg8[%c0_24, %c12] : memref<16x32xbf16, #tpu.memory_space<vmem>>, vector<16x4xbf16>
    tpu.vector_store %arg8[%c0_24, %c12], %15 {strides = array<i32>} : memref<16x32xbf16, #tpu.memory_space<vmem>>, vector<16x4xbf16>,
    %c0_25 = arith.constant 0 : index
    %c0_26 = arith.constant 0 : index
    %c0_27 = arith.constant 0 : index
    %c0_28 = arith.constant 0 : index
    %c0_29 = arith.constant 0 : index
    %17 = vector.load %arg3[%c0_25, %c0_26, %c0_27, %c0_28, %c0_29] : memref<1x1x6x6x4xbf16, #tpu.memory_space<vmem>>, vector<1x1x4x4x4xbf16>
    %18 = vector.shape_cast %17 : vector<1x1x4x4x4xbf16> to vector<4x4x4xbf16>
    %19 = vector.shape_cast %18 : vector<4x4x4xbf16> to vector<16x4xbf16>
    %c0_30 = arith.constant 0 : index
    %c16 = arith.constant 16 : index
    %20 = vector.load %arg8[%c0_30, %c16] : memref<16x32xbf16, #tpu.memory_space<vmem>>, vector<16x4xbf16>
    tpu.vector_store %arg8[%c0_30, %c16], %19 {strides = array<i32>} : memref<16x32xbf16, #tpu.memory_space<vmem>>, vector<16x4xbf16>,
    %c0_31 = arith.constant 0 : index
    %c0_32 = arith.constant 0 : index
    %c0_33 = arith.constant 0 : index
    %c1_34 = arith.constant 1 : index
    %c0_35 = arith.constant 0 : index
    %21 = vector.load %arg3[%c0_31, %c0_32, %c0_33, %c1_34, %c0_35] : memref<1x1x6x6x4xbf16, #tpu.memory_space<vmem>>, vector<1x1x4x4x4xbf16>
    %22 = vector.shape_cast %21 : vector<1x1x4x4x4xbf16> to vector<4x4x4xbf16>
    %23 = vector.shape_cast %22 : vector<4x4x4xbf16> to vector<16x4xbf16>
    %c0_36 = arith.constant 0 : index
    %c20 = arith.constant 20 : index
    %24 = vector.load %arg8[%c0_36, %c20] : memref<16x32xbf16, #tpu.memory_space<vmem>>, vector<16x4xbf16>
    tpu.vector_store %arg8[%c0_36, %c20], %23 {strides = array<i32>} : memref<16x32xbf16, #tpu.memory_space<vmem>>, vector<16x4xbf16>,
    %c0_37 = arith.constant 0 : index
    %c0_38 = arith.constant 0 : index
    %c1_39 = arith.constant 1 : index
    %c0_40 = arith.constant 0 : index
    %c0_41 = arith.constant 0 : index
    %25 = vector.load %arg3[%c0_37, %c0_38, %c1_39, %c0_40, %c0_41] : memref<1x1x6x6x4xbf16, #tpu.memory_space<vmem>>, vector<1x1x4x4x4xbf16>
    %26 = vector.shape_cast %25 : vector<1x1x4x4x4xbf16> to vector<4x4x4xbf16>
    %27 = vector.shape_cast %26 : vector<4x4x4xbf16> to vector<16x4xbf16>
    %c0_42 = arith.constant 0 : index
    %c24 = arith.constant 24 : index
    %28 = vector.load %arg8[%c0_42, %c24] : memref<16x32xbf16, #tpu.memory_space<vmem>>, vector<16x4xbf16>
    tpu.vector_store %arg8[%c0_42, %c24], %27 {strides = array<i32>} : memref<16x32xbf16, #tpu.memory_space<vmem>>, vector<16x4xbf16>,
    %c0_43 = arith.constant 0 : index
    %c0_44 = arith.constant 0 : index
    %c1_45 = arith.constant 1 : index
    %c1_46 = arith.constant 1 : index
    %c0_47 = arith.constant 0 : index
    %29 = vector.load %arg3[%c0_43, %c0_44, %c1_45, %c1_46, %c0_47] : memref<1x1x6x6x4xbf16, #tpu.memory_space<vmem>>, vector<1x1x4x4x4xbf16>
    %30 = vector.shape_cast %29 : vector<1x1x4x4x4xbf16> to vector<4x4x4xbf16>
    %31 = vector.shape_cast %30 : vector<4x4x4xbf16> to vector<16x4xbf16>
    %c0_48 = arith.constant 0 : index
    %c28 = arith.constant 28 : index
    %32 = vector.load %arg8[%c0_48, %c28] : memref<16x32xbf16, #tpu.memory_space<vmem>>, vector<16x4xbf16>
    tpu.vector_store %arg8[%c0_48, %c28], %31 {strides = array<i32>} : memref<16x32xbf16, #tpu.memory_space<vmem>>, vector<16x4xbf16>,
    %c0_49 = arith.constant 0 : index
    %c0_50 = arith.constant 0 : index
    %33 = vector.load %arg8[%c0_49, %c0_50] : memref<16x32xbf16, #tpu.memory_space<vmem>>, vector<16x32xbf16>
    %c0_51 = arith.constant 0 : index
    %c0_52 = arith.constant 0 : index
    %c0_53 = arith.constant 0 : index
    %34 = vector.load %arg5[%c0_51, %c0_52, %c0_53] : memref<8x32x8xbf16, #tpu.memory_space<vmem>>, vector<1x32x8xbf16>
    %35 = vector.shape_cast %34 : vector<1x32x8xbf16> to vector<32x8xbf16>
    %cst = arith.constant dense<0.000000e+00> : vector<16x8xf32>
    %36 = tpu.matmul %33, %35, %cst {dimension_numbers = #tpu.dot_dimension_numbers<[1], [0], [0], [1], [0, 0, 1, 1], [], []>} : vector<16x32xbf16>, vector<32x8xbf16>, vector<16x8xf32> -> vector<16x8xf32>
    %37 = vector.broadcast %0 : vector<1x8xf32> to vector<16x8xf32>
    %38 = arith.addf %36, %37 : vector<16x8xf32>
    %c0_54 = arith.constant 0 : index
    %c0_55 = arith.constant 0 : index
    %c0_56 = arith.constant 0 : index
    %c0_57 = arith.constant 0 : index
    %c0_58 = arith.constant 0 : index
    %39 = vector.load %arg7[%c0_54, %c0_55, %c0_56, %c0_57, %c0_58] : memref<1x1x8x16x8xf32, #tpu.memory_space<vmem>>, vector<1x1x1x16x8xf32>
    %40 = vector.shape_cast %39 : vector<1x1x1x16x8xf32> to vector<16x8xf32>
    %41 = vector.shape_cast %38 : vector<16x8xf32> to vector<1x1x1x16x8xf32>
    tpu.vector_store %arg7[%c0_54, %c0_55, %c0_56, %c0_57, %c0_58], %41 {strides = array<i32>} : memref<1x1x8x16x8xf32, #tpu.memory_space<vmem>>, vector<1x1x1x16x8xf32>,
    %c0_59 = arith.constant 0 : index
    %c0_60 = arith.constant 0 : index
    %c0_61 = arith.constant 0 : index
    %c1_62 = arith.constant 1 : index
    %c0_63 = arith.constant 0 : index
    %42 = vector.load %arg2[%c0_59, %c0_60, %c0_61, %c1_62, %c0_63] : memref<1x1x6x6x4xbf16, #tpu.memory_space<vmem>>, vector<1x1x4x4x4xbf16>
    %43 = vector.shape_cast %42 : vector<1x1x4x4x4xbf16> to vector<4x4x4xbf16>
    %44 = vector.shape_cast %43 : vector<4x4x4xbf16> to vector<16x4xbf16>
    %c0_64 = arith.constant 0 : index
    %c0_65 = arith.constant 0 : index
    %45 = vector.load %arg8[%c0_64, %c0_65] : memref<16x32xbf16, #tpu.memory_space<vmem>>, vector<16x4xbf16>
    tpu.vector_store %arg8[%c0_64, %c0_65], %44 {strides = array<i32>} : memref<16x32xbf16, #tpu.memory_space<vmem>>, vector<16x4xbf16>,
    %c0_66 = arith.constant 0 : index
    %c0_67 = arith.constant 0 : index
    %c0_68 = arith.constant 0 : index
    %c2 = arith.constant 2 : index
    %c0_69 = arith.constant 0 : index
    %46 = vector.load %arg2[%c0_66, %c0_67, %c0_68, %c2, %c0_69] : memref<1x1x6x6x4xbf16, #tpu.memory_space<vmem>>, vector<1x1x4x4x4xbf16>
    %47 = vector.shape_cast %46 : vector<1x1x4x4x4xbf16> to vector<4x4x4xbf16>
    %48 = vector.shape_cast %47 : vector<4x4x4xbf16> to vector<16x4xbf16>
    %c0_70 = arith.constant 0 : index
    %c4_71 = arith.constant 4 : index
    %49 = vector.load %arg8[%c0_70, %c4_71] : memref<16x32xbf16, #tpu.memory_space<vmem>>, vector<16x4xbf16>
    tpu.vector_store %arg8[%c0_70, %c4_71], %48 {strides = array<i32>} : memref<16x32xbf16, #tpu.memory_space<vmem>>, vector<16x4xbf16>,
    %c0_72 = arith.constant 0 : index
    %c0_73 = arith.constant 0 : index
    %c1_74 = arith.constant 1 : index
    %c1_75 = arith.constant 1 : index
    %c0_76 = arith.constant 0 : index
    %50 = vector.load %arg2[%c0_72, %c0_73, %c1_74, %c1_75, %c0_76] : memref<1x1x6x6x4xbf16, #tpu.memory_space<vmem>>, vector<1x1x4x4x4xbf16>
    %51 = vector.shape_cast %50 : vector<1x1x4x4x4xbf16> to vector<4x4x4xbf16>
    %52 = vector.shape_cast %51 : vector<4x4x4xbf16> to vector<16x4xbf16>
    %c0_77 = arith.constant 0 : index
    %c8_78 = arith.constant 8 : index
    %53 = vector.load %arg8[%c0_77, %c8_78] : memref<16x32xbf16, #tpu.memory_space<vmem>>, vector<16x4xbf16>
    tpu.vector_store %arg8[%c0_77, %c8_78], %52 {strides = array<i32>} : memref<16x32xbf16, #tpu.memory_space<vmem>>, vector<16x4xbf16>,
    %c0_79 = arith.constant 0 : index
    %c0_80 = arith.constant 0 : index
    %c1_81 = arith.constant 1 : index
    %c2_82 = arith.constant 2 : index
    %c0_83 = arith.constant 0 : index
    %54 = vector.load %arg2[%c0_79, %c0_80, %c1_81, %c2_82, %c0_83] : memref<1x1x6x6x4xbf16, #tpu.memory_space<vmem>>, vector<1x1x4x4x4xbf16>
    %55 = vector.shape_cast %54 : vector<1x1x4x4x4xbf16> to vector<4x4x4xbf16>
    %56 = vector.shape_cast %55 : vector<4x4x4xbf16> to vector<16x4xbf16>
    %c0_84 = arith.constant 0 : index
    %c12_85 = arith.constant 12 : index
    %57 = vector.load %arg8[%c0_84, %c12_85] : memref<16x32xbf16, #tpu.memory_space<vmem>>, vector<16x4xbf16>
    tpu.vector_store %arg8[%c0_84, %c12_85], %56 {strides = array<i32>} : memref<16x32xbf16, #tpu.memory_space<vmem>>, vector<16x4xbf16>,
    %c0_86 = arith.constant 0 : index
    %c0_87 = arith.constant 0 : index
    %c0_88 = arith.constant 0 : index
    %c1_89 = arith.constant 1 : index
    %c0_90 = arith.constant 0 : index
    %58 = vector.load %arg3[%c0_86, %c0_87, %c0_88, %c1_89, %c0_90] : memref<1x1x6x6x4xbf16, #tpu.memory_space<vmem>>, vector<1x1x4x4x4xbf16>
    %59 = vector.shape_cast %58 : vector<1x1x4x4x4xbf16> to vector<4x4x4xbf16>
    %60 = vector.shape_cast %59 : vector<4x4x4xbf16> to vector<16x4xbf16>
    %c0_91 = arith.constant 0 : index
    %c16_92 = arith.constant 16 : index
    %61 = vector.load %arg8[%c0_91, %c16_92] : memref<16x32xbf16, #tpu.memory_space<vmem>>, vector<16x4xbf16>
    tpu.vector_store %arg8[%c0_91, %c16_92], %60 {strides = array<i32>} : memref<16x32xbf16, #tpu.memory_space<vmem>>, vector<16x4xbf16>,
    %c0_93 = arith.constant 0 : index
    %c0_94 = arith.constant 0 : index
    %c0_95 = arith.constant 0 : index
    %c2_96 = arith.constant 2 : index
    %c0_97 = arith.constant 0 : index
    %62 = vector.load %arg3[%c0_93, %c0_94, %c0_95, %c2_96, %c0_97] : memref<1x1x6x6x4xbf16, #tpu.memory_space<vmem>>, vector<1x1x4x4x4xbf16>
    %63 = vector.shape_cast %62 : vector<1x1x4x4x4xbf16> to vector<4x4x4xbf16>
    %64 = vector.shape_cast %63 : vector<4x4x4xbf16> to vector<16x4xbf16>
    %c0_98 = arith.constant 0 : index
    %c20_99 = arith.constant 20 : index
    %65 = vector.load %arg8[%c0_98, %c20_99] : memref<16x32xbf16, #tpu.memory_space<vmem>>, vector<16x4xbf16>
    tpu.vector_store %arg8[%c0_98, %c20_99], %64 {strides = array<i32>} : memref<16x32xbf16, #tpu.memory_space<vmem>>, vector<16x4xbf16>,
    %c0_100 = arith.constant 0 : index
    %c0_101 = arith.constant 0 : index
    %c1_102 = arith.constant 1 : index
    %c1_103 = arith.constant 1 : index
    %c0_104 = arith.constant 0 : index
    %66 = vector.load %arg3[%c0_100, %c0_101, %c1_102, %c1_103, %c0_104] : memref<1x1x6x6x4xbf16, #tpu.memory_space<vmem>>, vector<1x1x4x4x4xbf16>
    %67 = vector.shape_cast %66 : vector<1x1x4x4x4xbf16> to vector<4x4x4xbf16>
    %68 = vector.shape_cast %67 : vector<4x4x4xbf16> to vector<16x4xbf16>
    %c0_105 = arith.constant 0 : index
    %c24_106 = arith.constant 24 : index
    %69 = vector.load %arg8[%c0_105, %c24_106] : memref<16x32xbf16, #tpu.memory_space<vmem>>, vector<16x4xbf16>
    tpu.vector_store %arg8[%c0_105, %c24_106], %68 {strides = array<i32>} : memref<16x32xbf16, #tpu.memory_space<vmem>>, vector<16x4xbf16>,
    %c0_107 = arith.constant 0 : index
    %c0_108 = arith.constant 0 : index
    %c1_109 = arith.constant 1 : index
    %c2_110 = arith.constant 2 : index
    %c0_111 = arith.constant 0 : index
    %70 = vector.load %arg3[%c0_107, %c0_108, %c1_109, %c2_110, %c0_111] : memref<1x1x6x6x4xbf16, #tpu.memory_space<vmem>>, vector<1x1x4x4x4xbf16>
    %71 = vector.shape_cast %70 : vector<1x1x4x4x4xbf16> to vector<4x4x4xbf16>
    %72 = vector.shape_cast %71 : vector<4x4x4xbf16> to vector<16x4xbf16>
    %c0_112 = arith.constant 0 : index
    %c28_113 = arith.constant 28 : index
    %73 = vector.load %arg8[%c0_112, %c28_113] : memref<16x32xbf16, #tpu.memory_space<vmem>>, vector<16x4xbf16>
    tpu.vector_store %arg8[%c0_112, %c28_113], %72 {strides = array<i32>} : memref<16x32xbf16, #tpu.memory_space<vmem>>, vector<16x4xbf16>,
    %c0_114 = arith.constant 0 : index
    %c0_115 = arith.constant 0 : index
    %74 = vector.load %arg8[%c0_114, %c0_115] : memref<16x32xbf16, #tpu.memory_space<vmem>>, vector<16x32xbf16>
    %c1_116 = arith.constant 1 : index
    %c0_117 = arith.constant 0 : index
    %c0_118 = arith.constant 0 : index
    %75 = vector.load %arg5[%c1_116, %c0_117, %c0_118] : memref<8x32x8xbf16, #tpu.memory_space<vmem>>, vector<1x32x8xbf16>
    %76 = vector.shape_cast %75 : vector<1x32x8xbf16> to vector<32x8xbf16>
    %cst_119 = arith.constant dense<0.000000e+00> : vector<16x8xf32>
    %77 = tpu.matmul %74, %76, %cst_119 {dimension_numbers = #tpu.dot_dimension_numbers<[1], [0], [0], [1], [0, 0, 1, 1], [], []>} : vector<16x32xbf16>, vector<32x8xbf16>, vector<16x8xf32> -> vector<16x8xf32>
    %78 = vector.broadcast %0 : vector<1x8xf32> to vector<16x8xf32>
    %79 = arith.addf %77, %78 : vector<16x8xf32>
    %c0_120 = arith.constant 0 : index
    %c0_121 = arith.constant 0 : index
    %c1_122 = arith.constant 1 : index
    %c0_123 = arith.constant 0 : index
    %c0_124 = arith.constant 0 : index
    %80 = vector.load %arg7[%c0_120, %c0_121, %c1_122, %c0_123, %c0_124] : memref<1x1x8x16x8xf32, #tpu.memory_space<vmem>>, vector<1x1x1x16x8xf32>
    %81 = vector.shape_cast %80 : vector<1x1x1x16x8xf32> to vector<16x8xf32>
    %82 = vector.shape_cast %79 : vector<16x8xf32> to vector<1x1x1x16x8xf32>
    tpu.vector_store %arg7[%c0_120, %c0_121, %c1_122, %c0_123, %c0_124], %82 {strides = array<i32>} : memref<1x1x8x16x8xf32, #tpu.memory_space<vmem>>, vector<1x1x1x16x8xf32>,
    %c0_125 = arith.constant 0 : index
    %c0_126 = arith.constant 0 : index
    %c1_127 = arith.constant 1 : index
    %c0_128 = arith.constant 0 : index
    %c0_129 = arith.constant 0 : index
    %83 = vector.load %arg2[%c0_125, %c0_126, %c1_127, %c0_128, %c0_129] : memref<1x1x6x6x4xbf16, #tpu.memory_space<vmem>>, vector<1x1x4x4x4xbf16>
    %84 = vector.shape_cast %83 : vector<1x1x4x4x4xbf16> to vector<4x4x4xbf16>
    %85 = vector.shape_cast %84 : vector<4x4x4xbf16> to vector<16x4xbf16>
    %c0_130 = arith.constant 0 : index
    %c0_131 = arith.constant 0 : index
    %86 = vector.load %arg8[%c0_130, %c0_131] : memref<16x32xbf16, #tpu.memory_space<vmem>>, vector<16x4xbf16>
    tpu.vector_store %arg8[%c0_130, %c0_131], %85 {strides = array<i32>} : memref<16x32xbf16, #tpu.memory_space<vmem>>, vector<16x4xbf16>,
    %c0_132 = arith.constant 0 : index
    %c0_133 = arith.constant 0 : index
    %c1_134 = arith.constant 1 : index
    %c1_135 = arith.constant 1 : index
    %c0_136 = arith.constant 0 : index
    %87 = vector.load %arg2[%c0_132, %c0_133, %c1_134, %c1_135, %c0_136] : memref<1x1x6x6x4xbf16, #tpu.memory_space<vmem>>, vector<1x1x4x4x4xbf16>
    %88 = vector.shape_cast %87 : vector<1x1x4x4x4xbf16> to vector<4x4x4xbf16>
    %89 = vector.shape_cast %88 : vector<4x4x4xbf16> to vector<16x4xbf16>
    %c0_137 = arith.constant 0 : index
    %c4_138 = arith.constant 4 : index
    %90 = vector.load %arg8[%c0_137, %c4_138] : memref<16x32xbf16, #tpu.memory_space<vmem>>, vector<16x4xbf16>
    tpu.vector_store %arg8[%c0_137, %c4_138], %89 {strides = array<i32>} : memref<16x32xbf16, #tpu.memory_space<vmem>>, vector<16x4xbf16>,
    %c0_139 = arith.constant 0 : index
    %c0_140 = arith.constant 0 : index
    %c2_141 = arith.constant 2 : index
    %c0_142 = arith.constant 0 : index
    %c0_143 = arith.constant 0 : index
    %91 = vector.load %arg2[%c0_139, %c0_140, %c2_141, %c0_142, %c0_143] : memref<1x1x6x6x4xbf16, #tpu.memory_space<vmem>>, vector<1x1x4x4x4xbf16>
    %92 = vector.shape_cast %91 : vector<1x1x4x4x4xbf16> to vector<4x4x4xbf16>
    %93 = vector.shape_cast %92 : vector<4x4x4xbf16> to vector<16x4xbf16>
    %c0_144 = arith.constant 0 : index
    %c8_145 = arith.constant 8 : index
    %94 = vector.load %arg8[%c0_144, %c8_145] : memref<16x32xbf16, #tpu.memory_space<vmem>>, vector<16x4xbf16>
    tpu.vector_store %arg8[%c0_144, %c8_145], %93 {strides = array<i32>} : memref<16x32xbf16, #tpu.memory_space<vmem>>, vector<16x4xbf16>,
    %c0_146 = arith.constant 0 : index
    %c0_147 = arith.constant 0 : index
    %c2_148 = arith.constant 2 : index
    %c1_149 = arith.constant 1 : index
    %c0_150 = arith.constant 0 : index
    %95 = vector.load %arg2[%c0_146, %c0_147, %c2_148, %c1_149, %c0_150] : memref<1x1x6x6x4xbf16, #tpu.memory_space<vmem>>, vector<1x1x4x4x4xbf16>
    %96 = vector.shape_cast %95 : vector<1x1x4x4x4xbf16> to vector<4x4x4xbf16>
    %97 = vector.shape_cast %96 : vector<4x4x4xbf16> to vector<16x4xbf16>
    %c0_151 = arith.constant 0 : index
    %c12_152 = arith.constant 12 : index
    %98 = vector.load %arg8[%c0_151, %c12_152] : memref<16x32xbf16, #tpu.memory_space<vmem>>, vector<16x4xbf16>
    tpu.vector_store %arg8[%c0_151, %c12_152], %97 {strides = array<i32>} : memref<16x32xbf16, #tpu.memory_space<vmem>>, vector<16x4xbf16>,
    %c0_153 = arith.constant 0 : index
    %c0_154 = arith.constant 0 : index
    %c1_155 = arith.constant 1 : index
    %c0_156 = arith.constant 0 : index
    %c0_157 = arith.constant 0 : index
    %99 = vector.load %arg3[%c0_153, %c0_154, %c1_155, %c0_156, %c0_157] : memref<1x1x6x6x4xbf16, #tpu.memory_space<vmem>>, vector<1x1x4x4x4xbf16>
    %100 = vector.shape_cast %99 : vector<1x1x4x4x4xbf16> to vector<4x4x4xbf16>
    %101 = vector.shape_cast %100 : vector<4x4x4xbf16> to vector<16x4xbf16>
    %c0_158 = arith.constant 0 : index
    %c16_159 = arith.constant 16 : index
    %102 = vector.load %arg8[%c0_158, %c16_159] : memref<16x32xbf16, #tpu.memory_space<vmem>>, vector<16x4xbf16>
    tpu.vector_store %arg8[%c0_158, %c16_159], %101 {strides = array<i32>} : memref<16x32xbf16, #tpu.memory_space<vmem>>, vector<16x4xbf16>,
    %c0_160 = arith.constant 0 : index
    %c0_161 = arith.constant 0 : index
    %c1_162 = arith.constant 1 : index
    %c1_163 = arith.constant 1 : index
    %c0_164 = arith.constant 0 : index
    %103 = vector.load %arg3[%c0_160, %c0_161, %c1_162, %c1_163, %c0_164] : memref<1x1x6x6x4xbf16, #tpu.memory_space<vmem>>, vector<1x1x4x4x4xbf16>
    %104 = vector.shape_cast %103 : vector<1x1x4x4x4xbf16> to vector<4x4x4xbf16>
    %105 = vector.shape_cast %104 : vector<4x4x4xbf16> to vector<16x4xbf16>
    %c0_165 = arith.constant 0 : index
    %c20_166 = arith.constant 20 : index
    %106 = vector.load %arg8[%c0_165, %c20_166] : memref<16x32xbf16, #tpu.memory_space<vmem>>, vector<16x4xbf16>
    tpu.vector_store %arg8[%c0_165, %c20_166], %105 {strides = array<i32>} : memref<16x32xbf16, #tpu.memory_space<vmem>>, vector<16x4xbf16>,
    %c0_167 = arith.constant 0 : index
    %c0_168 = arith.constant 0 : index
    %c2_169 = arith.constant 2 : index
    %c0_170 = arith.constant 0 : index
    %c0_171 = arith.constant 0 : index
    %107 = vector.load %arg3[%c0_167, %c0_168, %c2_169, %c0_170, %c0_171] : memref<1x1x6x6x4xbf16, #tpu.memory_space<vmem>>, vector<1x1x4x4x4xbf16>
    %108 = vector.shape_cast %107 : vector<1x1x4x4x4xbf16> to vector<4x4x4xbf16>
    %109 = vector.shape_cast %108 : vector<4x4x4xbf16> to vector<16x4xbf16>
    %c0_172 = arith.constant 0 : index
    %c24_173 = arith.constant 24 : index
    %110 = vector.load %arg8[%c0_172, %c24_173] : memref<16x32xbf16, #tpu.memory_space<vmem>>, vector<16x4xbf16>
    tpu.vector_store %arg8[%c0_172, %c24_173], %109 {strides = array<i32>} : memref<16x32xbf16, #tpu.memory_space<vmem>>, vector<16x4xbf16>,
    %c0_174 = arith.constant 0 : index
    %c0_175 = arith.constant 0 : index
    %c2_176 = arith.constant 2 : index
    %c1_177 = arith.constant 1 : index
    %c0_178 = arith.constant 0 : index
    %111 = vector.load %arg3[%c0_174, %c0_175, %c2_176, %c1_177, %c0_178] : memref<1x1x6x6x4xbf16, #tpu.memory_space<vmem>>, vector<1x1x4x4x4xbf16>
    %112 = vector.shape_cast %111 : vector<1x1x4x4x4xbf16> to vector<4x4x4xbf16>
    %113 = vector.shape_cast %112 : vector<4x4x4xbf16> to vector<16x4xbf16>
    %c0_179 = arith.constant 0 : index
    %c28_180 = arith.constant 28 : index
    %114 = vector.load %arg8[%c0_179, %c28_180] : memref<16x32xbf16, #tpu.memory_space<vmem>>, vector<16x4xbf16>
    tpu.vector_store %arg8[%c0_179, %c28_180], %113 {strides = array<i32>} : memref<16x32xbf16, #tpu.memory_space<vmem>>, vector<16x4xbf16>,
    %c0_181 = arith.constant 0 : index
    %c0_182 = arith.constant 0 : index
    %115 = vector.load %arg8[%c0_181, %c0_182] : memref<16x32xbf16, #tpu.memory_space<vmem>>, vector<16x32xbf16>
    %c2_183 = arith.constant 2 : index
    %c0_184 = arith.constant 0 : index
    %c0_185 = arith.constant 0 : index
    %116 = vector.load %arg5[%c2_183, %c0_184, %c0_185] : memref<8x32x8xbf16, #tpu.memory_space<vmem>>, vector<1x32x8xbf16>
    %117 = vector.shape_cast %116 : vector<1x32x8xbf16> to vector<32x8xbf16>
    %cst_186 = arith.constant dense<0.000000e+00> : vector<16x8xf32>
    %118 = tpu.matmul %115, %117, %cst_186 {dimension_numbers = #tpu.dot_dimension_numbers<[1], [0], [0], [1], [0, 0, 1, 1], [], []>} : vector<16x32xbf16>, vector<32x8xbf16>, vector<16x8xf32> -> vector<16x8xf32>
    %119 = vector.broadcast %0 : vector<1x8xf32> to vector<16x8xf32>
    %120 = arith.addf %118, %119 : vector<16x8xf32>
    %c0_187 = arith.constant 0 : index
    %c0_188 = arith.constant 0 : index
    %c2_189 = arith.constant 2 : index
    %c0_190 = arith.constant 0 : index
    %c0_191 = arith.constant 0 : index
    %121 = vector.load %arg7[%c0_187, %c0_188, %c2_189, %c0_190, %c0_191] : memref<1x1x8x16x8xf32, #tpu.memory_space<vmem>>, vector<1x1x1x16x8xf32>
    %122 = vector.shape_cast %121 : vector<1x1x1x16x8xf32> to vector<16x8xf32>
    %123 = vector.shape_cast %120 : vector<16x8xf32> to vector<1x1x1x16x8xf32>
    tpu.vector_store %arg7[%c0_187, %c0_188, %c2_189, %c0_190, %c0_191], %123 {strides = array<i32>} : memref<1x1x8x16x8xf32, #tpu.memory_space<vmem>>, vector<1x1x1x16x8xf32>,
    %c0_192 = arith.constant 0 : index
    %c0_193 = arith.constant 0 : index
    %c1_194 = arith.constant 1 : index
    %c1_195 = arith.constant 1 : index
    %c0_196 = arith.constant 0 : index
    %124 = vector.load %arg2[%c0_192, %c0_193, %c1_194, %c1_195, %c0_196] : memref<1x1x6x6x4xbf16, #tpu.memory_space<vmem>>, vector<1x1x4x4x4xbf16>
    %125 = vector.shape_cast %124 : vector<1x1x4x4x4xbf16> to vector<4x4x4xbf16>
    %126 = vector.shape_cast %125 : vector<4x4x4xbf16> to vector<16x4xbf16>
    %c0_197 = arith.constant 0 : index
    %c0_198 = arith.constant 0 : index
    %127 = vector.load %arg8[%c0_197, %c0_198] : memref<16x32xbf16, #tpu.memory_space<vmem>>, vector<16x4xbf16>
    tpu.vector_store %arg8[%c0_197, %c0_198], %126 {strides = array<i32>} : memref<16x32xbf16, #tpu.memory_space<vmem>>, vector<16x4xbf16>,
    %c0_199 = arith.constant 0 : index
    %c0_200 = arith.constant 0 : index
    %c1_201 = arith.constant 1 : index
    %c2_202 = arith.constant 2 : index
    %c0_203 = arith.constant 0 : index
    %128 = vector.load %arg2[%c0_199, %c0_200, %c1_201, %c2_202, %c0_203] : memref<1x1x6x6x4xbf16, #tpu.memory_space<vmem>>, vector<1x1x4x4x4xbf16>
    %129 = vector.shape_cast %128 : vector<1x1x4x4x4xbf16> to vector<4x4x4xbf16>
    %130 = vector.shape_cast %129 : vector<4x4x4xbf16> to vector<16x4xbf16>
    %c0_204 = arith.constant 0 : index
    %c4_205 = arith.constant 4 : index
    %131 = vector.load %arg8[%c0_204, %c4_205] : memref<16x32xbf16, #tpu.memory_space<vmem>>, vector<16x4xbf16>
    tpu.vector_store %arg8[%c0_204, %c4_205], %130 {strides = array<i32>} : memref<16x32xbf16, #tpu.memory_space<vmem>>, vector<16x4xbf16>,
    %c0_206 = arith.constant 0 : index
    %c0_207 = arith.constant 0 : index
    %c2_208 = arith.constant 2 : index
    %c1_209 = arith.constant 1 : index
    %c0_210 = arith.constant 0 : index
    %132 = vector.load %arg2[%c0_206, %c0_207, %c2_208, %c1_209, %c0_210] : memref<1x1x6x6x4xbf16, #tpu.memory_space<vmem>>, vector<1x1x4x4x4xbf16>
    %133 = vector.shape_cast %132 : vector<1x1x4x4x4xbf16> to vector<4x4x4xbf16>
    %134 = vector.shape_cast %133 : vector<4x4x4xbf16> to vector<16x4xbf16>
    %c0_211 = arith.constant 0 : index
    %c8_212 = arith.constant 8 : index
    %135 = vector.load %arg8[%c0_211, %c8_212] : memref<16x32xbf16, #tpu.memory_space<vmem>>, vector<16x4xbf16>
    tpu.vector_store %arg8[%c0_211, %c8_212], %134 {strides = array<i32>} : memref<16x32xbf16, #tpu.memory_space<vmem>>, vector<16x4xbf16>,
    %c0_213 = arith.constant 0 : index
    %c0_214 = arith.constant 0 : index
    %c2_215 = arith.constant 2 : index
    %c2_216 = arith.constant 2 : index
    %c0_217 = arith.constant 0 : index
    %136 = vector.load %arg2[%c0_213, %c0_214, %c2_215, %c2_216, %c0_217] : memref<1x1x6x6x4xbf16, #tpu.memory_space<vmem>>, vector<1x1x4x4x4xbf16>
    %137 = vector.shape_cast %136 : vector<1x1x4x4x4xbf16> to vector<4x4x4xbf16>
    %138 = vector.shape_cast %137 : vector<4x4x4xbf16> to vector<16x4xbf16>
    %c0_218 = arith.constant 0 : index
    %c12_219 = arith.constant 12 : index
    %139 = vector.load %arg8[%c0_218, %c12_219] : memref<16x32xbf16, #tpu.memory_space<vmem>>, vector<16x4xbf16>
    tpu.vector_store %arg8[%c0_218, %c12_219], %138 {strides = array<i32>} : memref<16x32xbf16, #tpu.memory_space<vmem>>, vector<16x4xbf16>,
    %c0_220 = arith.constant 0 : index
    %c0_221 = arith.constant 0 : index
    %c1_222 = arith.constant 1 : index
    %c1_223 = arith.constant 1 : index
    %c0_224 = arith.constant 0 : index
    %140 = vector.load %arg3[%c0_220, %c0_221, %c1_222, %c1_223, %c0_224] : memref<1x1x6x6x4xbf16, #tpu.memory_space<vmem>>, vector<1x1x4x4x4xbf16>
    %141 = vector.shape_cast %140 : vector<1x1x4x4x4xbf16> to vector<4x4x4xbf16>
    %142 = vector.shape_cast %141 : vector<4x4x4xbf16> to vector<16x4xbf16>
    %c0_225 = arith.constant 0 : index
    %c16_226 = arith.constant 16 : index
    %143 = vector.load %arg8[%c0_225, %c16_226] : memref<16x32xbf16, #tpu.memory_space<vmem>>, vector<16x4xbf16>
    tpu.vector_store %arg8[%c0_225, %c16_226], %142 {strides = array<i32>} : memref<16x32xbf16, #tpu.memory_space<vmem>>, vector<16x4xbf16>,
    %c0_227 = arith.constant 0 : index
    %c0_228 = arith.constant 0 : index
    %c1_229 = arith.constant 1 : index
    %c2_230 = arith.constant 2 : index
    %c0_231 = arith.constant 0 : index
    %144 = vector.load %arg3[%c0_227, %c0_228, %c1_229, %c2_230, %c0_231] : memref<1x1x6x6x4xbf16, #tpu.memory_space<vmem>>, vector<1x1x4x4x4xbf16>
    %145 = vector.shape_cast %144 : vector<1x1x4x4x4xbf16> to vector<4x4x4xbf16>
    %146 = vector.shape_cast %145 : vector<4x4x4xbf16> to vector<16x4xbf16>
    %c0_232 = arith.constant 0 : index
    %c20_233 = arith.constant 20 : index
    %147 = vector.load %arg8[%c0_232, %c20_233] : memref<16x32xbf16, #tpu.memory_space<vmem>>, vector<16x4xbf16>
    tpu.vector_store %arg8[%c0_232, %c20_233], %146 {strides = array<i32>} : memref<16x32xbf16, #tpu.memory_space<vmem>>, vector<16x4xbf16>,
    %c0_234 = arith.constant 0 : index
    %c0_235 = arith.constant 0 : index
    %c2_236 = arith.constant 2 : index
    %c1_237 = arith.constant 1 : index
    %c0_238 = arith.constant 0 : index
    %148 = vector.load %arg3[%c0_234, %c0_235, %c2_236, %c1_237, %c0_238] : memref<1x1x6x6x4xbf16, #tpu.memory_space<vmem>>, vector<1x1x4x4x4xbf16>
    %149 = vector.shape_cast %148 : vector<1x1x4x4x4xbf16> to vector<4x4x4xbf16>
    %150 = vector.shape_cast %149 : vector<4x4x4xbf16> to vector<16x4xbf16>
    %c0_239 = arith.constant 0 : index
    %c24_240 = arith.constant 24 : index
    %151 = vector.load %arg8[%c0_239, %c24_240] : memref<16x32xbf16, #tpu.memory_space<vmem>>, vector<16x4xbf16>
    tpu.vector_store %arg8[%c0_239, %c24_240], %150 {strides = array<i32>} : memref<16x32xbf16, #tpu.memory_space<vmem>>, vector<16x4xbf16>,
    %c0_241 = arith.constant 0 : index
    %c0_242 = arith.constant 0 : index
    %c2_243 = arith.constant 2 : index
    %c2_244 = arith.constant 2 : index
    %c0_245 = arith.constant 0 : index
    %152 = vector.load %arg3[%c0_241, %c0_242, %c2_243, %c2_244, %c0_245] : memref<1x1x6x6x4xbf16, #tpu.memory_space<vmem>>, vector<1x1x4x4x4xbf16>
    %153 = vector.shape_cast %152 : vector<1x1x4x4x4xbf16> to vector<4x4x4xbf16>
    %154 = vector.shape_cast %153 : vector<4x4x4xbf16> to vector<16x4xbf16>
    %c0_246 = arith.constant 0 : index
    %c28_247 = arith.constant 28 : index
    %155 = vector.load %arg8[%c0_246, %c28_247] : memref<16x32xbf16, #tpu.memory_space<vmem>>, vector<16x4xbf16>
    tpu.vector_store %arg8[%c0_246, %c28_247], %154 {strides = array<i32>} : memref<16x32xbf16, #tpu.memory_space<vmem>>, vector<16x4xbf16>,
    %c0_248 = arith.constant 0 : index
    %c0_249 = arith.constant 0 : index
    %156 = vector.load %arg8[%c0_248, %c0_249] : memref<16x32xbf16, #tpu.memory_space<vmem>>, vector<16x32xbf16>
    %c3 = arith.constant 3 : index
    %c0_250 = arith.constant 0 : index
    %c0_251 = arith.constant 0 : index
    %157 = vector.load %arg5[%c3, %c0_250, %c0_251] : memref<8x32x8xbf16, #tpu.memory_space<vmem>>, vector<1x32x8xbf16>
    %158 = vector.shape_cast %157 : vector<1x32x8xbf16> to vector<32x8xbf16>
    %cst_252 = arith.constant dense<0.000000e+00> : vector<16x8xf32>
    %159 = tpu.matmul %156, %158, %cst_252 {dimension_numbers = #tpu.dot_dimension_numbers<[1], [0], [0], [1], [0, 0, 1, 1], [], []>} : vector<16x32xbf16>, vector<32x8xbf16>, vector<16x8xf32> -> vector<16x8xf32>
    %160 = vector.broadcast %0 : vector<1x8xf32> to vector<16x8xf32>
    %161 = arith.addf %159, %160 : vector<16x8xf32>
    %c0_253 = arith.constant 0 : index
    %c0_254 = arith.constant 0 : index
    %c3_255 = arith.constant 3 : index
    %c0_256 = arith.constant 0 : index
    %c0_257 = arith.constant 0 : index
    %162 = vector.load %arg7[%c0_253, %c0_254, %c3_255, %c0_256, %c0_257] : memref<1x1x8x16x8xf32, #tpu.memory_space<vmem>>, vector<1x1x1x16x8xf32>
    %163 = vector.shape_cast %162 : vector<1x1x1x16x8xf32> to vector<16x8xf32>
    %164 = vector.shape_cast %161 : vector<16x8xf32> to vector<1x1x1x16x8xf32>
    tpu.vector_store %arg7[%c0_253, %c0_254, %c3_255, %c0_256, %c0_257], %164 {strides = array<i32>} : memref<1x1x8x16x8xf32, #tpu.memory_space<vmem>>, vector<1x1x1x16x8xf32>,
    %c0_258 = arith.constant 0 : index
    %c0_259 = arith.constant 0 : index
    %c0_260 = arith.constant 0 : index
    %c0_261 = arith.constant 0 : index
    %c0_262 = arith.constant 0 : index
    %165 = vector.load %arg3[%c0_258, %c0_259, %c0_260, %c0_261, %c0_262] : memref<1x1x6x6x4xbf16, #tpu.memory_space<vmem>>, vector<1x1x4x4x4xbf16>
    %166 = vector.shape_cast %165 : vector<1x1x4x4x4xbf16> to vector<4x4x4xbf16>
    %167 = vector.shape_cast %166 : vector<4x4x4xbf16> to vector<16x4xbf16>
    %c0_263 = arith.constant 0 : index
    %c0_264 = arith.constant 0 : index
    %168 = vector.load %arg8[%c0_263, %c0_264] : memref<16x32xbf16, #tpu.memory_space<vmem>>, vector<16x4xbf16>
    tpu.vector_store %arg8[%c0_263, %c0_264], %167 {strides = array<i32>} : memref<16x32xbf16, #tpu.memory_space<vmem>>, vector<16x4xbf16>,
    %c0_265 = arith.constant 0 : index
    %c0_266 = arith.constant 0 : index
    %c0_267 = arith.constant 0 : index
    %c1_268 = arith.constant 1 : index
    %c0_269 = arith.constant 0 : index
    %169 = vector.load %arg3[%c0_265, %c0_266, %c0_267, %c1_268, %c0_269] : memref<1x1x6x6x4xbf16, #tpu.memory_space<vmem>>, vector<1x1x4x4x4xbf16>
    %170 = vector.shape_cast %169 : vector<1x1x4x4x4xbf16> to vector<4x4x4xbf16>
    %171 = vector.shape_cast %170 : vector<4x4x4xbf16> to vector<16x4xbf16>
    %c0_270 = arith.constant 0 : index
    %c4_271 = arith.constant 4 : index
    %172 = vector.load %arg8[%c0_270, %c4_271] : memref<16x32xbf16, #tpu.memory_space<vmem>>, vector<16x4xbf16>
    tpu.vector_store %arg8[%c0_270, %c4_271], %171 {strides = array<i32>} : memref<16x32xbf16, #tpu.memory_space<vmem>>, vector<16x4xbf16>,
    %c0_272 = arith.constant 0 : index
    %c0_273 = arith.constant 0 : index
    %c1_274 = arith.constant 1 : index
    %c0_275 = arith.constant 0 : index
    %c0_276 = arith.constant 0 : index
    %173 = vector.load %arg3[%c0_272, %c0_273, %c1_274, %c0_275, %c0_276] : memref<1x1x6x6x4xbf16, #tpu.memory_space<vmem>>, vector<1x1x4x4x4xbf16>
    %174 = vector.shape_cast %173 : vector<1x1x4x4x4xbf16> to vector<4x4x4xbf16>
    %175 = vector.shape_cast %174 : vector<4x4x4xbf16> to vector<16x4xbf16>
    %c0_277 = arith.constant 0 : index
    %c8_278 = arith.constant 8 : index
    %176 = vector.load %arg8[%c0_277, %c8_278] : memref<16x32xbf16, #tpu.memory_space<vmem>>, vector<16x4xbf16>
    tpu.vector_store %arg8[%c0_277, %c8_278], %175 {strides = array<i32>} : memref<16x32xbf16, #tpu.memory_space<vmem>>, vector<16x4xbf16>,
    %c0_279 = arith.constant 0 : index
    %c0_280 = arith.constant 0 : index
    %c1_281 = arith.constant 1 : index
    %c1_282 = arith.constant 1 : index
    %c0_283 = arith.constant 0 : index
    %177 = vector.load %arg3[%c0_279, %c0_280, %c1_281, %c1_282, %c0_283] : memref<1x1x6x6x4xbf16, #tpu.memory_space<vmem>>, vector<1x1x4x4x4xbf16>
    %178 = vector.shape_cast %177 : vector<1x1x4x4x4xbf16> to vector<4x4x4xbf16>
    %179 = vector.shape_cast %178 : vector<4x4x4xbf16> to vector<16x4xbf16>
    %c0_284 = arith.constant 0 : index
    %c12_285 = arith.constant 12 : index
    %180 = vector.load %arg8[%c0_284, %c12_285] : memref<16x32xbf16, #tpu.memory_space<vmem>>, vector<16x4xbf16>
    tpu.vector_store %arg8[%c0_284, %c12_285], %179 {strides = array<i32>} : memref<16x32xbf16, #tpu.memory_space<vmem>>, vector<16x4xbf16>,
    %c0_286 = arith.constant 0 : index
    %c0_287 = arith.constant 0 : index
    %c0_288 = arith.constant 0 : index
    %c0_289 = arith.constant 0 : index
    %c0_290 = arith.constant 0 : index
    %181 = vector.load %arg4[%c0_286, %c0_287, %c0_288, %c0_289, %c0_290] : memref<1x1x6x6x4xbf16, #tpu.memory_space<vmem>>, vector<1x1x4x4x4xbf16>
    %182 = vector.shape_cast %181 : vector<1x1x4x4x4xbf16> to vector<4x4x4xbf16>
    %183 = vector.shape_cast %182 : vector<4x4x4xbf16> to vector<16x4xbf16>
    %c0_291 = arith.constant 0 : index
    %c16_292 = arith.constant 16 : index
    %184 = vector.load %arg8[%c0_291, %c16_292] : memref<16x32xbf16, #tpu.memory_space<vmem>>, vector<16x4xbf16>
    tpu.vector_store %arg8[%c0_291, %c16_292], %183 {strides = array<i32>} : memref<16x32xbf16, #tpu.memory_space<vmem>>, vector<16x4xbf16>,
    %c0_293 = arith.constant 0 : index
    %c0_294 = arith.constant 0 : index
    %c0_295 = arith.constant 0 : index
    %c1_296 = arith.constant 1 : index
    %c0_297 = arith.constant 0 : index
    %185 = vector.load %arg4[%c0_293, %c0_294, %c0_295, %c1_296, %c0_297] : memref<1x1x6x6x4xbf16, #tpu.memory_space<vmem>>, vector<1x1x4x4x4xbf16>
    %186 = vector.shape_cast %185 : vector<1x1x4x4x4xbf16> to vector<4x4x4xbf16>
    %187 = vector.shape_cast %186 : vector<4x4x4xbf16> to vector<16x4xbf16>
    %c0_298 = arith.constant 0 : index
    %c20_299 = arith.constant 20 : index
    %188 = vector.load %arg8[%c0_298, %c20_299] : memref<16x32xbf16, #tpu.memory_space<vmem>>, vector<16x4xbf16>
    tpu.vector_store %arg8[%c0_298, %c20_299], %187 {strides = array<i32>} : memref<16x32xbf16, #tpu.memory_space<vmem>>, vector<16x4xbf16>,
    %c0_300 = arith.constant 0 : index
    %c0_301 = arith.constant 0 : index
    %c1_302 = arith.constant 1 : index
    %c0_303 = arith.constant 0 : index
    %c0_304 = arith.constant 0 : index
    %189 = vector.load %arg4[%c0_300, %c0_301, %c1_302, %c0_303, %c0_304] : memref<1x1x6x6x4xbf16, #tpu.memory_space<vmem>>, vector<1x1x4x4x4xbf16>
    %190 = vector.shape_cast %189 : vector<1x1x4x4x4xbf16> to vector<4x4x4xbf16>
    %191 = vector.shape_cast %190 : vector<4x4x4xbf16> to vector<16x4xbf16>
    %c0_305 = arith.constant 0 : index
    %c24_306 = arith.constant 24 : index
    %192 = vector.load %arg8[%c0_305, %c24_306] : memref<16x32xbf16, #tpu.memory_space<vmem>>, vector<16x4xbf16>
    tpu.vector_store %arg8[%c0_305, %c24_306], %191 {strides = array<i32>} : memref<16x32xbf16, #tpu.memory_space<vmem>>, vector<16x4xbf16>,
    %c0_307 = arith.constant 0 : index
    %c0_308 = arith.constant 0 : index
    %c1_309 = arith.constant 1 : index
    %c1_310 = arith.constant 1 : index
    %c0_311 = arith.constant 0 : index
    %193 = vector.load %arg4[%c0_307, %c0_308, %c1_309, %c1_310, %c0_311] : memref<1x1x6x6x4xbf16, #tpu.memory_space<vmem>>, vector<1x1x4x4x4xbf16>
    %194 = vector.shape_cast %193 : vector<1x1x4x4x4xbf16> to vector<4x4x4xbf16>
    %195 = vector.shape_cast %194 : vector<4x4x4xbf16> to vector<16x4xbf16>
    %c0_312 = arith.constant 0 : index
    %c28_313 = arith.constant 28 : index
    %196 = vector.load %arg8[%c0_312, %c28_313] : memref<16x32xbf16, #tpu.memory_space<vmem>>, vector<16x4xbf16>
    tpu.vector_store %arg8[%c0_312, %c28_313], %195 {strides = array<i32>} : memref<16x32xbf16, #tpu.memory_space<vmem>>, vector<16x4xbf16>,
    %c0_314 = arith.constant 0 : index
    %c0_315 = arith.constant 0 : index
    %197 = vector.load %arg8[%c0_314, %c0_315] : memref<16x32xbf16, #tpu.memory_space<vmem>>, vector<16x32xbf16>
    %c4_316 = arith.constant 4 : index
    %c0_317 = arith.constant 0 : index
    %c0_318 = arith.constant 0 : index
    %198 = vector.load %arg5[%c4_316, %c0_317, %c0_318] : memref<8x32x8xbf16, #tpu.memory_space<vmem>>, vector<1x32x8xbf16>
    %199 = vector.shape_cast %198 : vector<1x32x8xbf16> to vector<32x8xbf16>
    %cst_319 = arith.constant dense<0.000000e+00> : vector<16x8xf32>
    %200 = tpu.matmul %197, %199, %cst_319 {dimension_numbers = #tpu.dot_dimension_numbers<[1], [0], [0], [1], [0, 0, 1, 1], [], []>} : vector<16x32xbf16>, vector<32x8xbf16>, vector<16x8xf32> -> vector<16x8xf32>
    %201 = vector.broadcast %0 : vector<1x8xf32> to vector<16x8xf32>
    %202 = arith.addf %200, %201 : vector<16x8xf32>
    %c0_320 = arith.constant 0 : index
    %c0_321 = arith.constant 0 : index
    %c4_322 = arith.constant 4 : index
    %c0_323 = arith.constant 0 : index
    %c0_324 = arith.constant 0 : index
    %203 = vector.load %arg7[%c0_320, %c0_321, %c4_322, %c0_323, %c0_324] : memref<1x1x8x16x8xf32, #tpu.memory_space<vmem>>, vector<1x1x1x16x8xf32>
    %204 = vector.shape_cast %203 : vector<1x1x1x16x8xf32> to vector<16x8xf32>
    %205 = vector.shape_cast %202 : vector<16x8xf32> to vector<1x1x1x16x8xf32>
    tpu.vector_store %arg7[%c0_320, %c0_321, %c4_322, %c0_323, %c0_324], %205 {strides = array<i32>} : memref<1x1x8x16x8xf32, #tpu.memory_space<vmem>>, vector<1x1x1x16x8xf32>,
    %c0_325 = arith.constant 0 : index
    %c0_326 = arith.constant 0 : index
    %c0_327 = arith.constant 0 : index
    %c1_328 = arith.constant 1 : index
    %c0_329 = arith.constant 0 : index
    %206 = vector.load %arg3[%c0_325, %c0_326, %c0_327, %c1_328, %c0_329] : memref<1x1x6x6x4xbf16, #tpu.memory_space<vmem>>, vector<1x1x4x4x4xbf16>
    %207 = vector.shape_cast %206 : vector<1x1x4x4x4xbf16> to vector<4x4x4xbf16>
    %208 = vector.shape_cast %207 : vector<4x4x4xbf16> to vector<16x4xbf16>
    %c0_330 = arith.constant 0 : index
    %c0_331 = arith.constant 0 : index
    %209 = vector.load %arg8[%c0_330, %c0_331] : memref<16x32xbf16, #tpu.memory_space<vmem>>, vector<16x4xbf16>
    tpu.vector_store %arg8[%c0_330, %c0_331], %208 {strides = array<i32>} : memref<16x32xbf16, #tpu.memory_space<vmem>>, vector<16x4xbf16>,
    %c0_332 = arith.constant 0 : index
    %c0_333 = arith.constant 0 : index
    %c0_334 = arith.constant 0 : index
    %c2_335 = arith.constant 2 : index
    %c0_336 = arith.constant 0 : index
    %210 = vector.load %arg3[%c0_332, %c0_333, %c0_334, %c2_335, %c0_336] : memref<1x1x6x6x4xbf16, #tpu.memory_space<vmem>>, vector<1x1x4x4x4xbf16>
    %211 = vector.shape_cast %210 : vector<1x1x4x4x4xbf16> to vector<4x4x4xbf16>
    %212 = vector.shape_cast %211 : vector<4x4x4xbf16> to vector<16x4xbf16>
    %c0_337 = arith.constant 0 : index
    %c4_338 = arith.constant 4 : index
    %213 = vector.load %arg8[%c0_337, %c4_338] : memref<16x32xbf16, #tpu.memory_space<vmem>>, vector<16x4xbf16>
    tpu.vector_store %arg8[%c0_337, %c4_338], %212 {strides = array<i32>} : memref<16x32xbf16, #tpu.memory_space<vmem>>, vector<16x4xbf16>,
    %c0_339 = arith.constant 0 : index
    %c0_340 = arith.constant 0 : index
    %c1_341 = arith.constant 1 : index
    %c1_342 = arith.constant 1 : index
    %c0_343 = arith.constant 0 : index
    %214 = vector.load %arg3[%c0_339, %c0_340, %c1_341, %c1_342, %c0_343] : memref<1x1x6x6x4xbf16, #tpu.memory_space<vmem>>, vector<1x1x4x4x4xbf16>
    %215 = vector.shape_cast %214 : vector<1x1x4x4x4xbf16> to vector<4x4x4xbf16>
    %216 = vector.shape_cast %215 : vector<4x4x4xbf16> to vector<16x4xbf16>
    %c0_344 = arith.constant 0 : index
    %c8_345 = arith.constant 8 : index
    %217 = vector.load %arg8[%c0_344, %c8_345] : memref<16x32xbf16, #tpu.memory_space<vmem>>, vector<16x4xbf16>
    tpu.vector_store %arg8[%c0_344, %c8_345], %216 {strides = array<i32>} : memref<16x32xbf16, #tpu.memory_space<vmem>>, vector<16x4xbf16>,
    %c0_346 = arith.constant 0 : index
    %c0_347 = arith.constant 0 : index
    %c1_348 = arith.constant 1 : index
    %c2_349 = arith.constant 2 : index
    %c0_350 = arith.constant 0 : index
    %218 = vector.load %arg3[%c0_346, %c0_347, %c1_348, %c2_349, %c0_350] : memref<1x1x6x6x4xbf16, #tpu.memory_space<vmem>>, vector<1x1x4x4x4xbf16>
    %219 = vector.shape_cast %218 : vector<1x1x4x4x4xbf16> to vector<4x4x4xbf16>
    %220 = vector.shape_cast %219 : vector<4x4x4xbf16> to vector<16x4xbf16>
    %c0_351 = arith.constant 0 : index
    %c12_352 = arith.constant 12 : index
    %221 = vector.load %arg8[%c0_351, %c12_352] : memref<16x32xbf16, #tpu.memory_space<vmem>>, vector<16x4xbf16>
    tpu.vector_store %arg8[%c0_351, %c12_352], %220 {strides = array<i32>} : memref<16x32xbf16, #tpu.memory_space<vmem>>, vector<16x4xbf16>,
    %c0_353 = arith.constant 0 : index
    %c0_354 = arith.constant 0 : index
    %c0_355 = arith.constant 0 : index
    %c1_356 = arith.constant 1 : index
    %c0_357 = arith.constant 0 : index
    %222 = vector.load %arg4[%c0_353, %c0_354, %c0_355, %c1_356, %c0_357] : memref<1x1x6x6x4xbf16, #tpu.memory_space<vmem>>, vector<1x1x4x4x4xbf16>
    %223 = vector.shape_cast %222 : vector<1x1x4x4x4xbf16> to vector<4x4x4xbf16>
    %224 = vector.shape_cast %223 : vector<4x4x4xbf16> to vector<16x4xbf16>
    %c0_358 = arith.constant 0 : index
    %c16_359 = arith.constant 16 : index
    %225 = vector.load %arg8[%c0_358, %c16_359] : memref<16x32xbf16, #tpu.memory_space<vmem>>, vector<16x4xbf16>
    tpu.vector_store %arg8[%c0_358, %c16_359], %224 {strides = array<i32>} : memref<16x32xbf16, #tpu.memory_space<vmem>>, vector<16x4xbf16>,
    %c0_360 = arith.constant 0 : index
    %c0_361 = arith.constant 0 : index
    %c0_362 = arith.constant 0 : index
    %c2_363 = arith.constant 2 : index
    %c0_364 = arith.constant 0 : index
    %226 = vector.load %arg4[%c0_360, %c0_361, %c0_362, %c2_363, %c0_364] : memref<1x1x6x6x4xbf16, #tpu.memory_space<vmem>>, vector<1x1x4x4x4xbf16>
    %227 = vector.shape_cast %226 : vector<1x1x4x4x4xbf16> to vector<4x4x4xbf16>
    %228 = vector.shape_cast %227 : vector<4x4x4xbf16> to vector<16x4xbf16>
    %c0_365 = arith.constant 0 : index
    %c20_366 = arith.constant 20 : index
    %229 = vector.load %arg8[%c0_365, %c20_366] : memref<16x32xbf16, #tpu.memory_space<vmem>>, vector<16x4xbf16>
    tpu.vector_store %arg8[%c0_365, %c20_366], %228 {strides = array<i32>} : memref<16x32xbf16, #tpu.memory_space<vmem>>, vector<16x4xbf16>,
    %c0_367 = arith.constant 0 : index
    %c0_368 = arith.constant 0 : index
    %c1_369 = arith.constant 1 : index
    %c1_370 = arith.constant 1 : index
    %c0_371 = arith.constant 0 : index
    %230 = vector.load %arg4[%c0_367, %c0_368, %c1_369, %c1_370, %c0_371] : memref<1x1x6x6x4xbf16, #tpu.memory_space<vmem>>, vector<1x1x4x4x4xbf16>
    %231 = vector.shape_cast %230 : vector<1x1x4x4x4xbf16> to vector<4x4x4xbf16>
    %232 = vector.shape_cast %231 : vector<4x4x4xbf16> to vector<16x4xbf16>
    %c0_372 = arith.constant 0 : index
    %c24_373 = arith.constant 24 : index
    %233 = vector.load %arg8[%c0_372, %c24_373] : memref<16x32xbf16, #tpu.memory_space<vmem>>, vector<16x4xbf16>
    tpu.vector_store %arg8[%c0_372, %c24_373], %232 {strides = array<i32>} : memref<16x32xbf16, #tpu.memory_space<vmem>>, vector<16x4xbf16>,
    %c0_374 = arith.constant 0 : index
    %c0_375 = arith.constant 0 : index
    %c1_376 = arith.constant 1 : index
    %c2_377 = arith.constant 2 : index
    %c0_378 = arith.constant 0 : index
    %234 = vector.load %arg4[%c0_374, %c0_375, %c1_376, %c2_377, %c0_378] : memref<1x1x6x6x4xbf16, #tpu.memory_space<vmem>>, vector<1x1x4x4x4xbf16>
    %235 = vector.shape_cast %234 : vector<1x1x4x4x4xbf16> to vector<4x4x4xbf16>
    %236 = vector.shape_cast %235 : vector<4x4x4xbf16> to vector<16x4xbf16>
    %c0_379 = arith.constant 0 : index
    %c28_380 = arith.constant 28 : index
    %237 = vector.load %arg8[%c0_379, %c28_380] : memref<16x32xbf16, #tpu.memory_space<vmem>>, vector<16x4xbf16>
    tpu.vector_store %arg8[%c0_379, %c28_380], %236 {strides = array<i32>} : memref<16x32xbf16, #tpu.memory_space<vmem>>, vector<16x4xbf16>,
    %c0_381 = arith.constant 0 : index
    %c0_382 = arith.constant 0 : index
    %238 = vector.load %arg8[%c0_381, %c0_382] : memref<16x32xbf16, #tpu.memory_space<vmem>>, vector<16x32xbf16>
    %c5 = arith.constant 5 : index
    %c0_383 = arith.constant 0 : index
    %c0_384 = arith.constant 0 : index
    %239 = vector.load %arg5[%c5, %c0_383, %c0_384] : memref<8x32x8xbf16, #tpu.memory_space<vmem>>, vector<1x32x8xbf16>
    %240 = vector.shape_cast %239 : vector<1x32x8xbf16> to vector<32x8xbf16>
    %cst_385 = arith.constant dense<0.000000e+00> : vector<16x8xf32>
    %241 = tpu.matmul %238, %240, %cst_385 {dimension_numbers = #tpu.dot_dimension_numbers<[1], [0], [0], [1], [0, 0, 1, 1], [], []>} : vector<16x32xbf16>, vector<32x8xbf16>, vector<16x8xf32> -> vector<16x8xf32>
    %242 = vector.broadcast %0 : vector<1x8xf32> to vector<16x8xf32>
    %243 = arith.addf %241, %242 : vector<16x8xf32>
    %c0_386 = arith.constant 0 : index
    %c0_387 = arith.constant 0 : index
    %c5_388 = arith.constant 5 : index
    %c0_389 = arith.constant 0 : index
    %c0_390 = arith.constant 0 : index
    %244 = vector.load %arg7[%c0_386, %c0_387, %c5_388, %c0_389, %c0_390] : memref<1x1x8x16x8xf32, #tpu.memory_space<vmem>>, vector<1x1x1x16x8xf32>
    %245 = vector.shape_cast %244 : vector<1x1x1x16x8xf32> to vector<16x8xf32>
    %246 = vector.shape_cast %243 : vector<16x8xf32> to vector<1x1x1x16x8xf32>
    tpu.vector_store %arg7[%c0_386, %c0_387, %c5_388, %c0_389, %c0_390], %246 {strides = array<i32>} : memref<1x1x8x16x8xf32, #tpu.memory_space<vmem>>, vector<1x1x1x16x8xf32>,
    %c0_391 = arith.constant 0 : index
    %c0_392 = arith.constant 0 : index
    %c1_393 = arith.constant 1 : index
    %c0_394 = arith.constant 0 : index
    %c0_395 = arith.constant 0 : index
    %247 = vector.load %arg3[%c0_391, %c0_392, %c1_393, %c0_394, %c0_395] : memref<1x1x6x6x4xbf16, #tpu.memory_space<vmem>>, vector<1x1x4x4x4xbf16>
    %248 = vector.shape_cast %247 : vector<1x1x4x4x4xbf16> to vector<4x4x4xbf16>
    %249 = vector.shape_cast %248 : vector<4x4x4xbf16> to vector<16x4xbf16>
    %c0_396 = arith.constant 0 : index
    %c0_397 = arith.constant 0 : index
    %250 = vector.load %arg8[%c0_396, %c0_397] : memref<16x32xbf16, #tpu.memory_space<vmem>>, vector<16x4xbf16>
    tpu.vector_store %arg8[%c0_396, %c0_397], %249 {strides = array<i32>} : memref<16x32xbf16, #tpu.memory_space<vmem>>, vector<16x4xbf16>,
    %c0_398 = arith.constant 0 : index
    %c0_399 = arith.constant 0 : index
    %c1_400 = arith.constant 1 : index
    %c1_401 = arith.constant 1 : index
    %c0_402 = arith.constant 0 : index
    %251 = vector.load %arg3[%c0_398, %c0_399, %c1_400, %c1_401, %c0_402] : memref<1x1x6x6x4xbf16, #tpu.memory_space<vmem>>, vector<1x1x4x4x4xbf16>
    %252 = vector.shape_cast %251 : vector<1x1x4x4x4xbf16> to vector<4x4x4xbf16>
    %253 = vector.shape_cast %252 : vector<4x4x4xbf16> to vector<16x4xbf16>
    %c0_403 = arith.constant 0 : index
    %c4_404 = arith.constant 4 : index
    %254 = vector.load %arg8[%c0_403, %c4_404] : memref<16x32xbf16, #tpu.memory_space<vmem>>, vector<16x4xbf16>
    tpu.vector_store %arg8[%c0_403, %c4_404], %253 {strides = array<i32>} : memref<16x32xbf16, #tpu.memory_space<vmem>>, vector<16x4xbf16>,
    %c0_405 = arith.constant 0 : index
    %c0_406 = arith.constant 0 : index
    %c2_407 = arith.constant 2 : index
    %c0_408 = arith.constant 0 : index
    %c0_409 = arith.constant 0 : index
    %255 = vector.load %arg3[%c0_405, %c0_406, %c2_407, %c0_408, %c0_409] : memref<1x1x6x6x4xbf16, #tpu.memory_space<vmem>>, vector<1x1x4x4x4xbf16>
    %256 = vector.shape_cast %255 : vector<1x1x4x4x4xbf16> to vector<4x4x4xbf16>
    %257 = vector.shape_cast %256 : vector<4x4x4xbf16> to vector<16x4xbf16>
    %c0_410 = arith.constant 0 : index
    %c8_411 = arith.constant 8 : index
    %258 = vector.load %arg8[%c0_410, %c8_411] : memref<16x32xbf16, #tpu.memory_space<vmem>>, vector<16x4xbf16>
    tpu.vector_store %arg8[%c0_410, %c8_411], %257 {strides = array<i32>} : memref<16x32xbf16, #tpu.memory_space<vmem>>, vector<16x4xbf16>,
    %c0_412 = arith.constant 0 : index
    %c0_413 = arith.constant 0 : index
    %c2_414 = arith.constant 2 : index
    %c1_415 = arith.constant 1 : index
    %c0_416 = arith.constant 0 : index
    %259 = vector.load %arg3[%c0_412, %c0_413, %c2_414, %c1_415, %c0_416] : memref<1x1x6x6x4xbf16, #tpu.memory_space<vmem>>, vector<1x1x4x4x4xbf16>
    %260 = vector.shape_cast %259 : vector<1x1x4x4x4xbf16> to vector<4x4x4xbf16>
    %261 = vector.shape_cast %260 : vector<4x4x4xbf16> to vector<16x4xbf16>
    %c0_417 = arith.constant 0 : index
    %c12_418 = arith.constant 12 : index
    %262 = vector.load %arg8[%c0_417, %c12_418] : memref<16x32xbf16, #tpu.memory_space<vmem>>, vector<16x4xbf16>
    tpu.vector_store %arg8[%c0_417, %c12_418], %261 {strides = array<i32>} : memref<16x32xbf16, #tpu.memory_space<vmem>>, vector<16x4xbf16>,
    %c0_419 = arith.constant 0 : index
    %c0_420 = arith.constant 0 : index
    %c1_421 = arith.constant 1 : index
    %c0_422 = arith.constant 0 : index
    %c0_423 = arith.constant 0 : index
    %263 = vector.load %arg4[%c0_419, %c0_420, %c1_421, %c0_422, %c0_423] : memref<1x1x6x6x4xbf16, #tpu.memory_space<vmem>>, vector<1x1x4x4x4xbf16>
    %264 = vector.shape_cast %263 : vector<1x1x4x4x4xbf16> to vector<4x4x4xbf16>
    %265 = vector.shape_cast %264 : vector<4x4x4xbf16> to vector<16x4xbf16>
    %c0_424 = arith.constant 0 : index
    %c16_425 = arith.constant 16 : index
    %266 = vector.load %arg8[%c0_424, %c16_425] : memref<16x32xbf16, #tpu.memory_space<vmem>>, vector<16x4xbf16>
    tpu.vector_store %arg8[%c0_424, %c16_425], %265 {strides = array<i32>} : memref<16x32xbf16, #tpu.memory_space<vmem>>, vector<16x4xbf16>,
    %c0_426 = arith.constant 0 : index
    %c0_427 = arith.constant 0 : index
    %c1_428 = arith.constant 1 : index
    %c1_429 = arith.constant 1 : index
    %c0_430 = arith.constant 0 : index
    %267 = vector.load %arg4[%c0_426, %c0_427, %c1_428, %c1_429, %c0_430] : memref<1x1x6x6x4xbf16, #tpu.memory_space<vmem>>, vector<1x1x4x4x4xbf16>
    %268 = vector.shape_cast %267 : vector<1x1x4x4x4xbf16> to vector<4x4x4xbf16>
    %269 = vector.shape_cast %268 : vector<4x4x4xbf16> to vector<16x4xbf16>
    %c0_431 = arith.constant 0 : index
    %c20_432 = arith.constant 20 : index
    %270 = vector.load %arg8[%c0_431, %c20_432] : memref<16x32xbf16, #tpu.memory_space<vmem>>, vector<16x4xbf16>
    tpu.vector_store %arg8[%c0_431, %c20_432], %269 {strides = array<i32>} : memref<16x32xbf16, #tpu.memory_space<vmem>>, vector<16x4xbf16>,
    %c0_433 = arith.constant 0 : index
    %c0_434 = arith.constant 0 : index
    %c2_435 = arith.constant 2 : index
    %c0_436 = arith.constant 0 : index
    %c0_437 = arith.constant 0 : index
    %271 = vector.load %arg4[%c0_433, %c0_434, %c2_435, %c0_436, %c0_437] : memref<1x1x6x6x4xbf16, #tpu.memory_space<vmem>>, vector<1x1x4x4x4xbf16>
    %272 = vector.shape_cast %271 : vector<1x1x4x4x4xbf16> to vector<4x4x4xbf16>
    %273 = vector.shape_cast %272 : vector<4x4x4xbf16> to vector<16x4xbf16>
    %c0_438 = arith.constant 0 : index
    %c24_439 = arith.constant 24 : index
    %274 = vector.load %arg8[%c0_438, %c24_439] : memref<16x32xbf16, #tpu.memory_space<vmem>>, vector<16x4xbf16>
    tpu.vector_store %arg8[%c0_438, %c24_439], %273 {strides = array<i32>} : memref<16x32xbf16, #tpu.memory_space<vmem>>, vector<16x4xbf16>,
    %c0_440 = arith.constant 0 : index
    %c0_441 = arith.constant 0 : index
    %c2_442 = arith.constant 2 : index
    %c1_443 = arith.constant 1 : index
    %c0_444 = arith.constant 0 : index
    %275 = vector.load %arg4[%c0_440, %c0_441, %c2_442, %c1_443, %c0_444] : memref<1x1x6x6x4xbf16, #tpu.memory_space<vmem>>, vector<1x1x4x4x4xbf16>
    %276 = vector.shape_cast %275 : vector<1x1x4x4x4xbf16> to vector<4x4x4xbf16>
    %277 = vector.shape_cast %276 : vector<4x4x4xbf16> to vector<16x4xbf16>
    %c0_445 = arith.constant 0 : index
    %c28_446 = arith.constant 28 : index
    %278 = vector.load %arg8[%c0_445, %c28_446] : memref<16x32xbf16, #tpu.memory_space<vmem>>, vector<16x4xbf16>
    tpu.vector_store %arg8[%c0_445, %c28_446], %277 {strides = array<i32>} : memref<16x32xbf16, #tpu.memory_space<vmem>>, vector<16x4xbf16>,
    %c0_447 = arith.constant 0 : index
    %c0_448 = arith.constant 0 : index
    %279 = vector.load %arg8[%c0_447, %c0_448] : memref<16x32xbf16, #tpu.memory_space<vmem>>, vector<16x32xbf16>
    %c6 = arith.constant 6 : index
    %c0_449 = arith.constant 0 : index
    %c0_450 = arith.constant 0 : index
    %280 = vector.load %arg5[%c6, %c0_449, %c0_450] : memref<8x32x8xbf16, #tpu.memory_space<vmem>>, vector<1x32x8xbf16>
    %281 = vector.shape_cast %280 : vector<1x32x8xbf16> to vector<32x8xbf16>
    %cst_451 = arith.constant dense<0.000000e+00> : vector<16x8xf32>
    %282 = tpu.matmul %279, %281, %cst_451 {dimension_numbers = #tpu.dot_dimension_numbers<[1], [0], [0], [1], [0, 0, 1, 1], [], []>} : vector<16x32xbf16>, vector<32x8xbf16>, vector<16x8xf32> -> vector<16x8xf32>
    %283 = vector.broadcast %0 : vector<1x8xf32> to vector<16x8xf32>
    %284 = arith.addf %282, %283 : vector<16x8xf32>
    %c0_452 = arith.constant 0 : index
    %c0_453 = arith.constant 0 : index
    %c6_454 = arith.constant 6 : index
    %c0_455 = arith.constant 0 : index
    %c0_456 = arith.constant 0 : index
    %285 = vector.load %arg7[%c0_452, %c0_453, %c6_454, %c0_455, %c0_456] : memref<1x1x8x16x8xf32, #tpu.memory_space<vmem>>, vector<1x1x1x16x8xf32>
    %286 = vector.shape_cast %285 : vector<1x1x1x16x8xf32> to vector<16x8xf32>
    %287 = vector.shape_cast %284 : vector<16x8xf32> to vector<1x1x1x16x8xf32>
    tpu.vector_store %arg7[%c0_452, %c0_453, %c6_454, %c0_455, %c0_456], %287 {strides = array<i32>} : memref<1x1x8x16x8xf32, #tpu.memory_space<vmem>>, vector<1x1x1x16x8xf32>,
    %c0_457 = arith.constant 0 : index
    %c0_458 = arith.constant 0 : index
    %c1_459 = arith.constant 1 : index
    %c1_460 = arith.constant 1 : index
    %c0_461 = arith.constant 0 : index
    %288 = vector.load %arg3[%c0_457, %c0_458, %c1_459, %c1_460, %c0_461] : memref<1x1x6x6x4xbf16, #tpu.memory_space<vmem>>, vector<1x1x4x4x4xbf16>
    %289 = vector.shape_cast %288 : vector<1x1x4x4x4xbf16> to vector<4x4x4xbf16>
    %290 = vector.shape_cast %289 : vector<4x4x4xbf16> to vector<16x4xbf16>
    %c0_462 = arith.constant 0 : index
    %c0_463 = arith.constant 0 : index
    %291 = vector.load %arg8[%c0_462, %c0_463] : memref<16x32xbf16, #tpu.memory_space<vmem>>, vector<16x4xbf16>
    tpu.vector_store %arg8[%c0_462, %c0_463], %290 {strides = array<i32>} : memref<16x32xbf16, #tpu.memory_space<vmem>>, vector<16x4xbf16>,
    %c0_464 = arith.constant 0 : index
    %c0_465 = arith.constant 0 : index
    %c1_466 = arith.constant 1 : index
    %c2_467 = arith.constant 2 : index
    %c0_468 = arith.constant 0 : index
    %292 = vector.load %arg3[%c0_464, %c0_465, %c1_466, %c2_467, %c0_468] : memref<1x1x6x6x4xbf16, #tpu.memory_space<vmem>>, vector<1x1x4x4x4xbf16>
    %293 = vector.shape_cast %292 : vector<1x1x4x4x4xbf16> to vector<4x4x4xbf16>
    %294 = vector.shape_cast %293 : vector<4x4x4xbf16> to vector<16x4xbf16>
    %c0_469 = arith.constant 0 : index
    %c4_470 = arith.constant 4 : index
    %295 = vector.load %arg8[%c0_469, %c4_470] : memref<16x32xbf16, #tpu.memory_space<vmem>>, vector<16x4xbf16>
    tpu.vector_store %arg8[%c0_469, %c4_470], %294 {strides = array<i32>} : memref<16x32xbf16, #tpu.memory_space<vmem>>, vector<16x4xbf16>,
    %c0_471 = arith.constant 0 : index
    %c0_472 = arith.constant 0 : index
    %c2_473 = arith.constant 2 : index
    %c1_474 = arith.constant 1 : index
    %c0_475 = arith.constant 0 : index
    %296 = vector.load %arg3[%c0_471, %c0_472, %c2_473, %c1_474, %c0_475] : memref<1x1x6x6x4xbf16, #tpu.memory_space<vmem>>, vector<1x1x4x4x4xbf16>
    %297 = vector.shape_cast %296 : vector<1x1x4x4x4xbf16> to vector<4x4x4xbf16>
    %298 = vector.shape_cast %297 : vector<4x4x4xbf16> to vector<16x4xbf16>
    %c0_476 = arith.constant 0 : index
    %c8_477 = arith.constant 8 : index
    %299 = vector.load %arg8[%c0_476, %c8_477] : memref<16x32xbf16, #tpu.memory_space<vmem>>, vector<16x4xbf16>
    tpu.vector_store %arg8[%c0_476, %c8_477], %298 {strides = array<i32>} : memref<16x32xbf16, #tpu.memory_space<vmem>>, vector<16x4xbf16>,
    %c0_478 = arith.constant 0 : index
    %c0_479 = arith.constant 0 : index
    %c2_480 = arith.constant 2 : index
    %c2_481 = arith.constant 2 : index
    %c0_482 = arith.constant 0 : index
    %300 = vector.load %arg3[%c0_478, %c0_479, %c2_480, %c2_481, %c0_482] : memref<1x1x6x6x4xbf16, #tpu.memory_space<vmem>>, vector<1x1x4x4x4xbf16>
    %301 = vector.shape_cast %300 : vector<1x1x4x4x4xbf16> to vector<4x4x4xbf16>
    %302 = vector.shape_cast %301 : vector<4x4x4xbf16> to vector<16x4xbf16>
    %c0_483 = arith.constant 0 : index
    %c12_484 = arith.constant 12 : index
    %303 = vector.load %arg8[%c0_483, %c12_484] : memref<16x32xbf16, #tpu.memory_space<vmem>>, vector<16x4xbf16>
    tpu.vector_store %arg8[%c0_483, %c12_484], %302 {strides = array<i32>} : memref<16x32xbf16, #tpu.memory_space<vmem>>, vector<16x4xbf16>,
    %c0_485 = arith.constant 0 : index
    %c0_486 = arith.constant 0 : index
    %c1_487 = arith.constant 1 : index
    %c1_488 = arith.constant 1 : index
    %c0_489 = arith.constant 0 : index
    %304 = vector.load %arg4[%c0_485, %c0_486, %c1_487, %c1_488, %c0_489] : memref<1x1x6x6x4xbf16, #tpu.memory_space<vmem>>, vector<1x1x4x4x4xbf16>
    %305 = vector.shape_cast %304 : vector<1x1x4x4x4xbf16> to vector<4x4x4xbf16>
    %306 = vector.shape_cast %305 : vector<4x4x4xbf16> to vector<16x4xbf16>
    %c0_490 = arith.constant 0 : index
    %c16_491 = arith.constant 16 : index
    %307 = vector.load %arg8[%c0_490, %c16_491] : memref<16x32xbf16, #tpu.memory_space<vmem>>, vector<16x4xbf16>
    tpu.vector_store %arg8[%c0_490, %c16_491], %306 {strides = array<i32>} : memref<16x32xbf16, #tpu.memory_space<vmem>>, vector<16x4xbf16>,
    %c0_492 = arith.constant 0 : index
    %c0_493 = arith.constant 0 : index
    %c1_494 = arith.constant 1 : index
    %c2_495 = arith.constant 2 : index
    %c0_496 = arith.constant 0 : index
    %308 = vector.load %arg4[%c0_492, %c0_493, %c1_494, %c2_495, %c0_496] : memref<1x1x6x6x4xbf16, #tpu.memory_space<vmem>>, vector<1x1x4x4x4xbf16>
    %309 = vector.shape_cast %308 : vector<1x1x4x4x4xbf16> to vector<4x4x4xbf16>
    %310 = vector.shape_cast %309 : vector<4x4x4xbf16> to vector<16x4xbf16>
    %c0_497 = arith.constant 0 : index
    %c20_498 = arith.constant 20 : index
    %311 = vector.load %arg8[%c0_497, %c20_498] : memref<16x32xbf16, #tpu.memory_space<vmem>>, vector<16x4xbf16>
    tpu.vector_store %arg8[%c0_497, %c20_498], %310 {strides = array<i32>} : memref<16x32xbf16, #tpu.memory_space<vmem>>, vector<16x4xbf16>,
    %c0_499 = arith.constant 0 : index
    %c0_500 = arith.constant 0 : index
    %c2_501 = arith.constant 2 : index
    %c1_502 = arith.constant 1 : index
    %c0_503 = arith.constant 0 : index
    %312 = vector.load %arg4[%c0_499, %c0_500, %c2_501, %c1_502, %c0_503] : memref<1x1x6x6x4xbf16, #tpu.memory_space<vmem>>, vector<1x1x4x4x4xbf16>
    %313 = vector.shape_cast %312 : vector<1x1x4x4x4xbf16> to vector<4x4x4xbf16>
    %314 = vector.shape_cast %313 : vector<4x4x4xbf16> to vector<16x4xbf16>
    %c0_504 = arith.constant 0 : index
    %c24_505 = arith.constant 24 : index
    %315 = vector.load %arg8[%c0_504, %c24_505] : memref<16x32xbf16, #tpu.memory_space<vmem>>, vector<16x4xbf16>
    tpu.vector_store %arg8[%c0_504, %c24_505], %314 {strides = array<i32>} : memref<16x32xbf16, #tpu.memory_space<vmem>>, vector<16x4xbf16>,
    %c0_506 = arith.constant 0 : index
    %c0_507 = arith.constant 0 : index
    %c2_508 = arith.constant 2 : index
    %c2_509 = arith.constant 2 : index
    %c0_510 = arith.constant 0 : index
    %316 = vector.load %arg4[%c0_506, %c0_507, %c2_508, %c2_509, %c0_510] : memref<1x1x6x6x4xbf16, #tpu.memory_space<vmem>>, vector<1x1x4x4x4xbf16>
    %317 = vector.shape_cast %316 : vector<1x1x4x4x4xbf16> to vector<4x4x4xbf16>
    %318 = vector.shape_cast %317 : vector<4x4x4xbf16> to vector<16x4xbf16>
    %c0_511 = arith.constant 0 : index
    %c28_512 = arith.constant 28 : index
    %319 = vector.load %arg8[%c0_511, %c28_512] : memref<16x32xbf16, #tpu.memory_space<vmem>>, vector<16x4xbf16>
    tpu.vector_store %arg8[%c0_511, %c28_512], %318 {strides = array<i32>} : memref<16x32xbf16, #tpu.memory_space<vmem>>, vector<16x4xbf16>,
    %c0_513 = arith.constant 0 : index
    %c0_514 = arith.constant 0 : index
    %320 = vector.load %arg8[%c0_513, %c0_514] : memref<16x32xbf16, #tpu.memory_space<vmem>>, vector<16x32xbf16>
    %c7 = arith.constant 7 : index
    %c0_515 = arith.constant 0 : index
    %c0_516 = arith.constant 0 : index
    %321 = vector.load %arg5[%c7, %c0_515, %c0_516] : memref<8x32x8xbf16, #tpu.memory_space<vmem>>, vector<1x32x8xbf16>
    %322 = vector.shape_cast %321 : vector<1x32x8xbf16> to vector<32x8xbf16>
    %cst_517 = arith.constant dense<0.000000e+00> : vector<16x8xf32>
    %323 = tpu.matmul %320, %322, %cst_517 {dimension_numbers = #tpu.dot_dimension_numbers<[1], [0], [0], [1], [0, 0, 1, 1], [], []>} : vector<16x32xbf16>, vector<32x8xbf16>, vector<16x8xf32> -> vector<16x8xf32>
    %324 = vector.broadcast %0 : vector<1x8xf32> to vector<16x8xf32>
    %325 = arith.addf %323, %324 : vector<16x8xf32>
    %c0_518 = arith.constant 0 : index
    %c0_519 = arith.constant 0 : index
    %c7_520 = arith.constant 7 : index
    %c0_521 = arith.constant 0 : index
    %c0_522 = arith.constant 0 : index
    %326 = vector.load %arg7[%c0_518, %c0_519, %c7_520, %c0_521, %c0_522] : memref<1x1x8x16x8xf32, #tpu.memory_space<vmem>>, vector<1x1x1x16x8xf32>
    %327 = vector.shape_cast %326 : vector<1x1x1x16x8xf32> to vector<16x8xf32>
    %328 = vector.shape_cast %325 : vector<16x8xf32> to vector<1x1x1x16x8xf32>
    tpu.vector_store %arg7[%c0_518, %c0_519, %c7_520, %c0_521, %c0_522], %328 {strides = array<i32>} : memref<1x1x8x16x8xf32, #tpu.memory_space<vmem>>, vector<1x1x1x16x8xf32>,
    return
  }
  func.func @transform_0(%arg0: i32, %arg1: i32) -> (i32, i32, i32, i32, i32) {
    %c0_i32 = arith.constant 0 : i32
    %0 = arith.addi %arg1, %c0_i32 : i32
    %c0_i32_0 = arith.constant 0 : i32
    %c0_i32_1 = arith.constant 0 : i32
    %c0_i32_2 = arith.constant 0 : i32
    %c0_i32_3 = arith.constant 0 : i32
    return %arg0, %0, %c0_i32_0, %c0_i32_1, %c0_i32_2 : i32, i32, i32, i32, i32
  }
  func.func @transform_1(%arg0: i32, %arg1: i32) -> (i32, i32, i32, i32, i32) {
    %c1_i32 = arith.constant 1 : i32
    %0 = arith.addi %arg1, %c1_i32 : i32
    %c0_i32 = arith.constant 0 : i32
    %c0_i32_0 = arith.constant 0 : i32
    %c0_i32_1 = arith.constant 0 : i32
    %c0_i32_2 = arith.constant 0 : i32
    return %arg0, %0, %c0_i32, %c0_i32_0, %c0_i32_1 : i32, i32, i32, i32, i32
  }
  func.func @transform_2(%arg0: i32, %arg1: i32) -> (i32, i32, i32, i32, i32) {
    %c2_i32 = arith.constant 2 : i32
    %0 = arith.addi %arg1, %c2_i32 : i32
    %c0_i32 = arith.constant 0 : i32
    %c0_i32_0 = arith.constant 0 : i32
    %c0_i32_1 = arith.constant 0 : i32
    %c0_i32_2 = arith.constant 0 : i32
    return %arg0, %0, %c0_i32, %c0_i32_0, %c0_i32_1 : i32, i32, i32, i32, i32
  }
  func.func @transform_3(%arg0: i32, %arg1: i32) -> (i32, i32, i32) {
    %c0_i32 = arith.constant 0 : i32
    %c0_i32_0 = arith.constant 0 : i32
    %c0_i32_1 = arith.constant 0 : i32
    %c0_i32_2 = arith.constant 0 : i32
    return %c0_i32, %c0_i32_0, %c0_i32_1 : i32, i32, i32
  }
  func.func @transform_4(%arg0: i32, %arg1: i32) -> (i32, i32) {
    %c0_i32 = arith.constant 0 : i32
    %c0_i32_0 = arith.constant 0 : i32
    %c0_i32_1 = arith.constant 0 : i32
    return %c0_i32, %c0_i32_0 : i32, i32
  }
  func.func @transform_5(%arg0: i32, %arg1: i32) -> (i32, i32, i32, i32, i32) {
    %c0_i32 = arith.constant 0 : i32
    %c0_i32_0 = arith.constant 0 : i32
    %c0_i32_1 = arith.constant 0 : i32
    %c0_i32_2 = arith.constant 0 : i32
    return %arg0, %arg1, %c0_i32, %c0_i32_0, %c0_i32_1 : i32, i32, i32, i32, i32
  }
}

</mosaic_0001>

<bundles_post_ra>
// kernel: tpu_custom_call.1
= control target key start
LH: loop header
LB: loop body
LE: loop exit
PB: predicated region body
PF: predicated region fallthrough
CT: control target
= control target key end

     0   :  { %s7290_s18 = smov 0   ;;  %s7292_s19 = smov 0   ;;  %s8265_s0 = inlined_call_operand.vmem [shape: bf16[2,6,6,6,4], index: 0, kind: input, shape index: {}]   ;;  %s8266_s1 = inlined_call_operand.vmem [shape: bf16[2,6,6,6,4], index: 1, kind: input, shape index: {}]   ;;  %s8267_s2 = inlined_call_operand.vmem [shape: bf16[2,6,6,6,4], index: 2, kind: input, shape index: {}]   ;;  %s8268_s3 = inlined_call_operand.vmem [shape: bf16[8,32,8], index: 3, kind: input, shape index: {}]   ;;  %s8269_s4 = inlined_call_operand.vmem [shape: f32[1,8], index: 4, kind: input, shape index: {}]   ;;  %s8270_s5 = inlined_call_operand.vmem [shape: f32[2,4,8,16,8], index: 5, kind: output, shape index: {}]  }
   0x1   :  { %s7294_s20 = smov 0   ;;  %s7296_s21 = smov 0  }
   0x2   :  { %s7298_s22 = smov 0  }
   0x3 LB: > { %s24_s23 = sadd.s32 1, %s7240_s20  ;;  %s27_s24 = sadd.s32 1, %s7244_s21  ;;  %s7248_s22 = sphi %s7298_s22, %s15_s22   ;;  %s7244_s21 = sphi %s7296_s21, %s8283_s21   ;;  %s7240_s20 = sphi %s7294_s20, %s8282_s20   ;;  %s7236_s19 = sphi %s7292_s19, %s8281_s19   ;;  %s7232_s18 = sphi %s7290_s18, %s8280_s18  }
   0x4   : > { %p25_p0 = scmp.ge.s32.totalorder %s24_s23, 4  ;;  %p6464_p1 = scmp.ge.s32.totalorder %s7248_s22, 1 }
   0x5   : > { %p247_p2 = scmp.lt.s32.totalorder %s7248_s22, 9 }
   0x6   : > { %s8285_s23 = smov (%p25_p0, %s24_s23), 0  ;;  %s8287_s24 = smov (!%p25_p0, %s27_s24), %s7244_s21 }
   0x7   : > { %p248_p3 = pnand %p6464_p1, %p247_p2  ;;  %p29_p4 = scmp.ge.s32.totalorder %s8287_s24, 2 }
   0x8   : > { %p303_p5 = scmp.lt.s32.totalorder (!%p248_p3), %s7236_s19, 1  ;;  %p305_p6 = scmp.lt.s32.totalorder (!%p248_p3), %s7232_s18, 5  ;;  %v7250_v0 = vmov (!%p248_p3), 1983009808   ;;  %v358_v2 = vlaneseq (!%p248_p3)  ;;  %vm413_vm0 = vsmask.f32 (!%p248_p3), 1280 }
   0x9   : > { %s8289_s24 = smov (%p29_p4, %s8287_s24), 0  ;;  %251 = sbr.rel (%p248_p3) target bundleno = 535 (0x217), region = 40 }
   0xa   : > { %s312_s25 = sadd.s32 (!%p248_p3), 1, %s7232_s18  ;;  %v356_v1 = vunpack.c.l.s4 (!%p248_p3), %v7250_v0  ;;  %vm414_vm1 = vsmask.f32 (!%p248_p3), 3336  ;;  %v359_v4 = vshrl.u32 (!%p248_p3), %v358_v2, 7  ;;  %vm416_vm2 = vsmask.f32 (!%p248_p3), 5392 }
   0xb   : > { %p315_p7 = scmp.lt.s32.totalorder (!%p248_p3), %s312_s25, 5  ;;  %vm418_vm3 = vsmask.f32 (!%p248_p3), 7448  ;;  %vm415_vm4 = vmor (!%p248_p3), %vm413_vm0, %vm414_vm1  ;;  %s7251_s15 = smov (!%p248_p3), 8   ;;  %vm1170_vm7 = vcmask (!%p248_p3), 1040384   ;;  %vm1171_vm8 = vcmask (!%p248_p3), 1042434  }
   0xc   : > { %v357_v3 = vunpack.c.0.s8 (!%p248_p3), %v356_v1  ;;  %vm7355_vm5 = vmor (!%p248_p3), %vm415_vm4, %vm416_vm2  ;;  %s7252_s16 = smov (!%p248_p3), 16   ;;  %vm1173_vm9 = vcmask (!%p248_p3), 1044484   ;;  %vm1175_vm10 = vcmask (!%p248_p3), 1046534   ;;  %s323_s17 = sadd.s32 (!%p248_p3), 2, %s7232_s18  ;;  %vm371_vm14 = vcmask (!%p248_p3), 31744  }
   0xd   : > { %vm7365_vm6 = vmor (!%p248_p3), %vm7355_vm5, %vm418_vm3  ;;  %p7413_p8 = scmp.lt.s32.totalorder (!%p248_p3), %s323_s17, 5  ;;  %s7257_s8 = smov (!%p248_p3), 28   ;;  %vm496_vm15 = vcmask (!%p248_p3), 64544   ;;  %vm527_vm0 = vcmask (!%p248_p3), 97344   ;;  %vm645_vm1 = vcmask (!%p248_p3), 130144   ;;  %vm675_vm2 = vcmask (!%p248_p3), 162944  }
   0xe   : > { %v7336_v5 = vsub.s32 (!%p248_p3), %v357_v3, %v359_v4  ;;  %vm7402_vm11 = vmor (!%p248_p3), %vm1170_vm7, %vm1171_vm8  ;;  %vm793_vm3 = vcmask (!%p248_p3), 195744   ;;  %vm824_vm4 = vcmask (!%p248_p3), 228544   ;;  %vm942_vm5 = vcmask (!%p248_p3), 261344   ;;  %p336_p9 = scmp.lt.s32.totalorder (!%p248_p3), %s7232_s18, 3 }
   0xf   : > { %vm1174_vm12 = vmor (!%p248_p3), %vm7402_vm11, %vm1173_vm9  ;;  %vm7259_vm7 = vmmov (!%p248_p3), 0   ;;  %vm967_vm8 = vcmask (!%p248_p3), 261120  }
  0x10   : > { %s8291_s19 = smov (!%p303_p5, %s7236_s19), 1  ;;  %s8293_s25 = smov (!%p315_p7, %s312_s25), 5  ;;  %vm7429_vm13 = vmor %vm1174_vm12, %vm1175_vm10 }
  0x11   : > { %s306_s26 = scalar_select %p305_p6, %s7232_s18, 5 }
  0x12   : > { %s7328_s27 = smul.u32 36, %s8291_s19  ;;  %s8295_s17 = smov (!%p7413_p8, %s323_s17), 5 }
  0x13   : > { %s7076_s28 = smul.u32 6, %s306_s26  ;;  %s7254_s26 = smov 12  }
  0x14   : > { %s7078_s6 = smul.u32 6, %s8293_s25  ;;  %s7253_s25 = smov 4  }
  0x15   : > { %s309_s29 = sadd.s32 %s7328_s27, %s7076_s28  ;;  %s8297_s18 = smov (!%p336_p9, %s7232_s18), 3 }
  0x16   : > { %s6465_s30 = sshll.u32 %s309_s29, 2  ;;  %s319_s10 = sadd.s32 %s7078_s6, %s7328_s27 }
  0x17   : > { %s7334_s9 = scalar_lea.vmem %s8265_s0, %s6465_s30  ;;  %s6466_s11 = sshll.u32 %s319_s10, 2 }
  0x18   : > { %v7178_v6 = vld.sshfl [vmem:[%s7334_s9 + $0x4] sm:$0xf pattern:$0x76325410]  ;;  %s7343_s14 = scalar_lea.vmem %s8266_s1, %s6466_s11  ;;  %s7255_s29 = smov 24  }
  0x19   : > { %v7179_v7 = vld.sshfl [vmem:[%s7334_s9 + $0xc] sm:$0xf pattern:$0x76325410]  ;;  %s7256_s30 = smov 20   ;;  %s7079_s6 = smul.u32 6, %s8295_s17 }
  0x1a   : > { %v6471_v8 = vld.sshfl [vmem:[%s7334_s9] sm:$0x13 pattern:$0x76325410]  ;;  %v523_v15 = vcombine.low %v7178_v6, %v7179_v7  ;;  %s6468_s10 = sshll.u32 %s8297_s18, 4  ;;  %s6469_s11 = sshll.u32 %s8291_s19, 6 }
  0x1b   : > { %v7180_v9 = vld.sshfl [vmem:[%s7343_s14] sm:$0xf pattern:$0x76325410]  ;;  %v388_v11 = vcombine.high %v6471_v8, %v6471_v8  ;;  %v421_v13 = vshrl.u32 %v6471_v8, 16  ;;  %v424_v14 = vshll.u32 %v6471_v8, 16  ;;  %s7477_s7 = sadd.s32 %s7079_s6, %s7328_s27 }
  0x1c   : > { %v7181_v10 = vld.sshfl [vmem:[%s7343_s14 + $0x8] sm:$0xf pattern:$0x76325410]  ;;  %524 = vrot.lane.b32.xlu0 %v523_v15, %s7251_s15  ;;  %s6467_s27 = sshll.u32 %s7477_s7, 2 }
  0x1d   : > { %v6472_v12 = vld.sshfl [vmem:[%s7334_s9 + $0x4] sm:$0x13 pattern:$0x76325410]  ;;  %v423_v21 = vrot.slane %v421_v13, 6  ;;  %v426_v22 = vrot.slane %v424_v14, 7  ;;  %v671_v23 = vcombine.low %v7180_v9, %v7181_v10  ;;  %s7511_s12 = scalar_lea.vmem %s8267_s2, %s6467_s27 }
  0x1e   : > { %v6473_v16 = vld.sshfl [vmem:[%s7334_s9 + $0x8] sm:$0x13 pattern:$0x76325410]  ;;  %v396_v17 = vcombine.high %v6472_v12, %v6472_v12  ;;  %v430_v25 = vshll.u32 %v388_v11, 16  ;;  %v435_v26 = vshrl.u32 %v6472_v12, 16 }
  0x1f   : > { %v6474_v18 = vld.sshfl [vmem:[%s7334_s9 + $0xc] sm:$0x13 pattern:$0x76325410]  ;;  %v404_v19 = vcombine.high %v6473_v16, %v6473_v16  ;;  %v427_v27 = vor.u32 %v426_v22, %v423_v21  ;;  %v438_v28 = vshll.u32 %v6472_v12, 16  ;;  %v449_v30 = vshrl.u32 %v6473_v16, 16  ;;  %672 = vrot.lane.b32.xlu1 %v671_v23, %s7252_s16 }
  0x20   : > { %v412_v24 = vcombine.high %v6474_v18, %v6474_v18  ;;  %v444_v29 = vshll.u32 %v396_v17, 16  ;;  %v6486_v31 = vld.sshfl [vmem:[%s7334_s9 + $0x10] sm:$0x13 pattern:$0x76325410]  ;;  %v432_v33 = vrot.slane %v430_v25, 7 }
  0x21   : > { %v437_v34 = vrot.slane %v435_v26, 6  ;;  %v452_v35 = vshll.u32 %v6473_v16, 16  ;;  %v458_v36 = vshll.u32 %v404_v19, 16  ;;  %v428_v37 = vrot.slane %v427_v27, 2 }
  0x22   : > { %v440_v38 = vrot.slane %v438_v28, 7  ;;  %v446_v39 = vrot.slane %v444_v29, 7  ;;  %v451_v40 = vrot.slane %v449_v30, 6  ;;  %v463_v43 = vshrl.u32 %v6474_v18, 16 }
  0x23   : > { %v454_v41 = vrot.slane %v452_v35, 7  ;;  %v460_v42 = vrot.slane %v458_v36, 7  ;;  %v466_v44 = vshll.u32 %v6474_v18, 16  ;;  %v433_v45 = vsel %vm7365_vm6, %v428_v37, %v432_v33 }
  0x24   : > { %v441_v46 = vor.u32 %v440_v38, %v437_v34  ;;  %v472_v47 = vshll.u32 %v412_v24, 16  ;;  %v568_v48 = vcombine.high %v6486_v31, %v6486_v31  ;;  %v6487_v49 = vld.sshfl [vmem:[%s7343_s14] sm:$0x13 pattern:$0x76325410]  ;;  %v465_v51 = vrot.slane %v463_v43, 6 }
  0x25   : > { %v455_v50 = vor.u32 %v454_v41, %v451_v40  ;;  %v468_v52 = vrot.slane %v466_v44, 7  ;;  %v612_v53 = vshrl.u32 %v6486_v31, 16  ;;  %v615_v56 = vshll.u32 %v6486_v31, 16 }
  0x26   : > { %v442_v54 = vrot.slane %v441_v46, 2  ;;  %v474_v55 = vrot.slane %v472_v47, 7  ;;  %v621_v57 = vshll.u32 %v568_v48, 16  ;;  %v692_v62 = vcombine.high %v6487_v49, %v6487_v49 }
  0x27   : > { %v456_v58 = vrot.slane %v455_v50, 2  ;;  %v469_v59 = vor.u32 %v468_v52, %v465_v51  ;;  %v614_v60 = vrot.slane %v612_v53, 6  ;;  %v6488_v61 = vld.sshfl [vmem:[%s7343_s14 + $0x4] sm:$0x13 pattern:$0x76325410] }
  0x28   : > { %v447_v63 = vsel %vm7365_vm6, %v442_v54, %v446_v39  ;;  %v617_v0 = vrot.slane %v615_v56, 7  ;;  %v623_v1 = vrot.slane %v621_v57, 7  ;;  %v6489_v2 = vld.sshfl [vmem:[%s7343_s14 + $0x8] sm:$0x13 pattern:$0x76325410]  ;;  %v700_v3 = vcombine.high %v6488_v61, %v6488_v61 }
  0x29   : > { %v461_v4 = vsel %vm7365_vm6, %v456_v58, %v460_v42  ;;  %v470_v6 = vrot.slane %v469_v59, 2  ;;  %v476_v7 = vcombine.low %v433_v45, %v447_v63  ;;  %v6490_v8 = vld.sshfl [vmem:[%s7343_s14 + $0xc] sm:$0x13 pattern:$0x76325410]  ;;  %v708_v9 = vcombine.high %v6489_v2, %v6489_v2 }
  0x2a   : > { %v618_v10 = vor.u32 %v617_v0, %v614_v60  ;;  %v625_v11 = vcombine.low %v447_v63, %v461_v4  ;;  %v716_v12 = vcombine.high %v6490_v8, %v6490_v8  ;;  %v718_v13 = vshrl.u32 %v6487_v49, 16  ;;  %v7182_v35 = vld.sshfl [vmem:[%s7343_s14 + $0x4] sm:$0xf pattern:$0x76325410] }
  0x2b   : > { %v475_v14 = vsel %vm7365_vm6, %v470_v6, %v474_v55  ;;  %v484_v15 = vrot.slane %v476_v7, %v7336_v5  ;;  %v721_v16 = vshll.u32 %v6487_v49, 16  ;;  %v727_v17 = vshll.u32 %v692_v62, 16  ;;  %v7183_v36 = vld.sshfl [vmem:[%s7343_s14 + $0xc] sm:$0xf pattern:$0x76325410] }
  0x2c   : > { %v477_v18 = vcombine.low %v461_v4, %v475_v14  ;;  %v619_v19 = vrot.slane %v618_v10, 2  ;;  %v633_v20 = vrot.slane %v625_v11, %v7336_v5  ;;  %v720_v21 = vrot.slane %v718_v13, 6  ;;  %v6502_v45 = vld.sshfl [vmem:[%s7343_s14 + $0x10] sm:$0x13 pattern:$0x76325410] }
  0x2d   : > { %v723_v22 = vrot.slane %v721_v16, 7  ;;  %v729_v23 = vrot.slane %v727_v17, 7  ;;  %v732_v24 = vshrl.u32 %v6488_v61, 16  ;;  %v735_v25 = vshll.u32 %v6488_v61, 16 }
  0x2e   : > { %v491_v26 = vrot.slane %v477_v18, %v7336_v5  ;;  %v7386_v27 = vsel %vm7365_vm6, %v619_v19, %v623_v1  ;;  %v741_v28 = vshll.u32 %v700_v3, 16  ;;  %v746_v29 = vshrl.u32 %v6489_v2, 16  ;;  %v6511_v54 = vld.sshfl [vmem:[%s7334_s9] sm:$0x12 pattern:$0x76325410] }
  0x2f   : > { %v626_v30 = vcombine.low %v475_v14, %v7386_v27  ;;  %v724_v31 = vor.u32 %v723_v22, %v720_v21  ;;  %v734_v33 = vrot.slane %v732_v24, 6  ;;  %v737_v34 = vrot.slane %v735_v25, 7  ;;  %v6512_v62 = vld.sshfl [vmem:[%s7334_s9 + $0x4] sm:$0x12 pattern:$0x76325410] }
  0x30   : > { %v492_v37 = vcombine.low %v484_v15, %v491_v26  ;;  %v743_v38 = vrot.slane %v741_v28, 7  ;;  %v748_v39 = vrot.slane %v746_v29, 6  ;;  %v749_v40 = vshll.u32 %v6489_v2, 16 }
  0x31   : > { %v640_v41 = vrot.slane %v626_v30, %v7336_v5  ;;  %v725_v42 = vrot.slane %v724_v31, 2  ;;  %v738_v43 = vor.u32 %v737_v34, %v734_v33  ;;  %v755_v44 = vshll.u32 %v708_v9, 16  ;;  %v6513_v3 = vld.sshfl [vmem:[%s7334_s9 + $0x8] sm:$0x12 pattern:$0x76325410] }
  0x32   : > { %493 = vrot.lane.b32.xlu0 %v492_v37, %s7253_s25  ;;  %v751_v46 = vrot.slane %v749_v40, 7  ;;  %v760_v47 = vshrl.u32 %v6490_v8, 16  ;;  %v763_v48 = vshll.u32 %v6490_v8, 16  ;;  %v769_v49 = vshll.u32 %v716_v12, 16 }
  0x33   : > { %v7395_v50 = vcombine.low %v633_v20, %v640_v41  ;;  %v730_v51 = vsel %vm7365_vm6, %v725_v42, %v729_v23  ;;  %v739_v52 = vrot.slane %v738_v43, 2  ;;  %v757_v53 = vrot.slane %v755_v44, 7  ;;  %v6514_v8 = vld.sshfl [vmem:[%s7334_s9 + $0xc] sm:$0x12 pattern:$0x76325410] }
  0x34   : > { %v752_v55 = vor.u32 %v751_v46, %v748_v39  ;;  %v762_v56 = vrot.slane %v760_v47, 6  ;;  %v765_v57 = vrot.slane %v763_v48, 7  ;;  %v771_v58 = vrot.slane %v769_v49, 7 }
  0x35   : > { %642 = vrot.lane.b32.xlu1 %v7395_v50, %s7254_s26  ;;  %v744_v60 = vsel %vm7365_vm6, %v739_v52, %v743_v38  ;;  %v865_v61 = vcombine.high %v6502_v45, %v6502_v45  ;;  %v909_v2 = vshrl.u32 %v6502_v45, 16  ;;  %v820_v4 = vcombine.low %v7182_v35, %v7183_v36  ;;  %v6534_v28 = vld.sshfl [vmem:[%s7334_s9 + $0x10] sm:$0x12 pattern:$0x76325410] }
  0x36   : > { %v753_v63 = vrot.slane %v752_v55, 2  ;;  %v766_v0 = vor.u32 %v765_v57, %v762_v56  ;;  %v773_v1 = vcombine.low %v730_v51, %v744_v60  ;;  %v912_v6 = vshll.u32 %v6502_v45, 16  ;;  %v6543_v38 = vld.sshfl [vmem:[%s7343_s14] sm:$0x12 pattern:$0x76325410] }
  0x37   : > { %v918_v7 = vshll.u32 %v865_v61, 16  ;;  %v1145_v9 = vcombine.high %v6511_v54, %v6511_v54  ;;  %v911_v13 = vrot.slane %v909_v2, 6  ;;  %v1153_v17 = vcombine.high %v6512_v62, %v6512_v62  ;;  %v6544_v39 = vld.sshfl [vmem:[%s7343_s14 + $0x4] sm:$0x12 pattern:$0x76325410] }
  0x38   : > { %v758_v10 = vsel %vm7365_vm6, %v753_v63, %v757_v53  ;;  %v767_v11 = vrot.slane %v766_v0, 2  ;;  %v781_v12 = vrot.slane %v773_v1, %v7336_v5  ;;  %v914_v14 = vrot.slane %v912_v6, 7  ;;  %v6545_v43 = vld.sshfl [vmem:[%s7343_s14 + $0x8] sm:$0x12 pattern:$0x76325410] }
  0x39   : > { %821 = vrot.lane.b32.xlu1 %v820_v4, %s7255_s29  ;;  %v920_v15 = vrot.slane %v918_v7, 7  ;;  %v922_v16 = vcombine.low %v744_v60, %v758_v10  ;;  %v1161_v19 = vcombine.high %v6513_v3, %v6513_v3  ;;  %v1169_v20 = vcombine.high %v6514_v8, %v6514_v8  ;;  %v6546_v56 = vld.sshfl [vmem:[%s7343_s14 + $0xc] sm:$0x12 pattern:$0x76325410] }
  0x3a   : > { %v772_v18 = vsel %vm7365_vm6, %v767_v11, %v771_v58  ;;  %v6515_v22 = vrot.slane %v6511_v54, 9  ;;  %v915_v24 = vor.u32 %v914_v14, %v911_v13  ;;  %v1179_v26 = vrot.slane %v1145_v9, 7  ;;  %v6566_v4 = vld.sshfl [vmem:[%s7343_s14 + $0x10] sm:$0x12 pattern:$0x76325410] }
  0x3b   : > { %v774_v23 = vcombine.low %v758_v10, %v772_v18  ;;  %v930_v25 = vrot.slane %v922_v16, %v7336_v5  ;;  %v6516_v29 = vrot.slane %v6512_v62, 9  ;;  %v1183_v30 = vrot.slane %v1153_v17, 7  ;;  %v7488_v17 = vld.sshfl [vmem:[%s7334_s9 + $0x8] sm:$0xf pattern:$0x76325410] }
  0x3c   : > { %v6517_v31 = vrot.slane %v6513_v3, 9  ;;  %v1187_v33 = vrot.slane %v1161_v19, 7  ;;  %v916_v35 = vrot.slane %v915_v24, 2  ;;  %v1180_v36 = vsel %vm7429_vm13, %v6515_v22, %v1179_v26 }
  0x3d   : > { %v788_v34 = vrot.slane %v774_v23, %v7336_v5  ;;  %v6518_v37 = vrot.slane %v6514_v8, 9  ;;  %v1184_v40 = vsel %vm7429_vm13, %v6516_v29, %v1183_v30  ;;  %v1191_v42 = vrot.slane %v1169_v20, 7  ;;  %v6507_v21 = vld.sshfl [vmem:[%s7334_s9] sm:$0x13 pattern:$0x76325410] }
  0x3e   : > { %v1188_v41 = vsel %vm7429_vm13, %v6517_v31, %v1187_v33  ;;  %v7455_v45 = vsel %vm7365_vm6, %v916_v35, %v920_v15  ;;  %v1193_v46 = vcombine.low %v1180_v36, %v1184_v40  ;;  %v1370_v47 = vcombine.high %v6534_v28, %v6534_v28  ;;  %v6600_v31 = vld.sshfl [vmem:[%s7334_s9 + $0x8] sm:$0x13 pattern:$0x76325410] }
  0x3f   : > { %v7451_v44 = vcombine.low %v781_v12, %v788_v34  ;;  %v923_v48 = vcombine.low %v772_v18, %v7455_v45  ;;  %v1192_v49 = vsel %vm7429_vm13, %v6518_v37, %v1191_v42  ;;  %v6538_v51 = vrot.slane %v6534_v28, 9  ;;  %v7491_v18 = vld.sshfl [vmem:[%s7334_s9 + $0x10] sm:$0xf pattern:$0x76325410] }
  0x40   : > { %v1194_v52 = vcombine.low %v1188_v41, %v1192_v49  ;;  %v1201_v53 = vrot.slane %v1193_v46, %v7336_v5  ;;  %v1385_v54 = vrot.slane %v1370_v47, 7  ;;  %v1387_v55 = vcombine.low %v1184_v40, %v1188_v41  ;;  %v6601_v34 = vld.sshfl [vmem:[%s7334_s9 + $0xc] sm:$0x13 pattern:$0x76325410] }
  0x41   : > { %790 = vrot.lane.b32.xlu0 %v7451_v44, %s7256_s30  ;;  %v937_v57 = vrot.slane %v923_v48, %v7336_v5  ;;  %v1540_v58 = vcombine.high %v6543_v38, %v6543_v38  ;;  %v1548_v59 = vcombine.high %v6544_v39, %v6544_v39  ;;  %v1556_v63 = vcombine.high %v6545_v43, %v6545_v43  ;;  %v6603_v37 = vld.sshfl [vmem:[%s7334_s9 + $0x14] sm:$0x13 pattern:$0x76325410] }
  0x42   : > { %v1208_v60 = vrot.slane %v1194_v52, %v7336_v5  ;;  %v7469_v61 = vsel %vm7429_vm13, %v6538_v51, %v1385_v54  ;;  %v1395_v62 = vrot.slane %v1387_v55, %v7336_v5  ;;  %v1564_v2 = vcombine.high %v6546_v56, %v6546_v56  ;;  %v7527_v51 = vld.sshfl [vmem:[%s7343_s14 + $0x8] sm:$0xf pattern:$0x76325410] }
  0x43   : > { %v7472_v0 = vcombine.low %v930_v25, %v937_v57  ;;  %v1388_v1 = vcombine.low %v1192_v49, %v7469_v61  ;;  %v6547_v3 = vrot.slane %v6543_v38, 9  ;;  %v1567_v7 = vrot.slane %v1540_v58, 7  ;;  %v7187_v49 = vld.sshfl [vmem:[%s7343_s14 + $0xc] sm:$0xf pattern:$0x76325410] }
  0x44   : > { %v1209_v6 = vcombine.low %v1201_v53, %v1208_v60  ;;  %v6548_v8 = vrot.slane %v6544_v39, 9  ;;  %v1571_v9 = vrot.slane %v1548_v59, 7  ;;  %v6549_v11 = vrot.slane %v6545_v43, 9 }
  0x45   : > { %939 = vrot.lane.b32.xlu0 %v7472_v0, %s7257_s8  ;;  %v1402_v10 = vrot.slane %v1388_v1, %v7336_v5  ;;  %v1575_v12 = vrot.slane %v1556_v63, 7  ;;  %v6550_v13 = vrot.slane %v6546_v56, 9  ;;  %v1568_v14 = vsel %vm7429_vm13, %v6547_v3, %v1567_v7  ;;  %v7186_v43 = vld.sshfl [vmem:[%s7343_s14 + $0x4] sm:$0xf pattern:$0x76325410] }
  0x46   : > { %1210 = vrot.lane.b32.xlu1 %v1209_v6, %s7253_s25  ;;  %v1572_v15 = vsel %vm7429_vm13, %v6548_v8, %v1571_v9  ;;  %v1579_v16 = vrot.slane %v1564_v2, 7  ;;  %v1758_v23 = vcombine.high %v6566_v4, %v6566_v4  ;;  %v6570_v25 = vrot.slane %v6566_v4, 9  ;;  %v7189_v1 = vld.sshfl [vmem:[%s7343_s14 + $0x10] sm:$0xf pattern:$0x76325410] }
  0x47   : > { %v7493_v19 = vcombine.low %v1395_v62, %v1402_v10  ;;  %v1576_v20 = vsel %vm7429_vm13, %v6549_v11, %v1575_v12  ;;  %v1581_v22 = vcombine.low %v1568_v14, %v1572_v15  ;;  %v2050_v38 = vcombine.high %v6600_v31, %v6600_v31  ;;  %v6624_v11 = vld.sshfl [vmem:[%s7343_s14 + $0x8] sm:$0x13 pattern:$0x76325410] }
  0x48   : > { %v1580_v24 = vsel %vm7429_vm13, %v6550_v13, %v1579_v16  ;;  %v1775_v26 = vcombine.low %v1572_v15, %v1576_v20  ;;  %v1773_v30 = vrot.slane %v1758_v23, 7  ;;  %v2030_v40 = vcombine.low %v7488_v17, %v7491_v18  ;;  %v6625_v15 = vld.sshfl [vmem:[%s7343_s14 + $0xc] sm:$0x13 pattern:$0x76325410] }
  0x49   : > { %1327 = vrot.lane.b32.xlu0 %v7395_v50, %s7251_s15  ;;  %v1582_v28 = vcombine.low %v1576_v20, %v1580_v24  ;;  %v1589_v29 = vrot.slane %v1581_v22, %v7336_v5  ;;  %v2058_v41 = vcombine.high %v6601_v34, %v6601_v34  ;;  %v2074_v42 = vcombine.high %v6603_v37, %v6603_v37  ;;  %v6627_v18 = vld.sshfl [vmem:[%s7343_s14 + $0x14] sm:$0x13 pattern:$0x76325410] }
  0x4a   : > { %1404 = vrot.lane.b32.xlu1 %v7493_v19, %s7254_s26  ;;  %v1783_v33 = vrot.slane %v1775_v26, %v7336_v5  ;;  %v7516_v36 = vsel %vm7429_vm13, %v6570_v25, %v1773_v30  ;;  %v2076_v47 = vshrl.u32 %v6600_v31, 16  ;;  %v2079_v48 = vshll.u32 %v6600_v31, 16 }
  0x4b   : > { %v1596_v35 = vrot.slane %v1582_v28, %v7336_v5  ;;  %v1776_v39 = vcombine.low %v1580_v24, %v7516_v36  ;;  %v2085_v53 = vshll.u32 %v2050_v38, 16  ;;  %v2090_v54 = vshrl.u32 %v6601_v34, 16 }
  0x4c   : > { %v2093_v55 = vshll.u32 %v6601_v34, 16  ;;  %v2078_v56 = vrot.slane %v2076_v47, 6  ;;  %v2081_v57 = vrot.slane %v2079_v48, 7  ;;  %v2099_v58 = vshll.u32 %v2058_v41, 16 }
  0x4d   : > { %1521 = vrot.lane.b32.xlu0 %v7451_v44, %s7252_s16  ;;  %v1597_v46 = vcombine.low %v1589_v29, %v1596_v35  ;;  %v1790_v52 = vrot.slane %v1776_v39, %v7336_v5  ;;  %v2118_v59 = vshrl.u32 %v6603_v37, 16  ;;  %v2087_v60 = vrot.slane %v2085_v53, 7 }
  0x4e   : > { %v2092_v62 = vrot.slane %v2090_v54, 6  ;;  %v2095_v63 = vrot.slane %v2093_v55, 7  ;;  %v2082_v2 = vor.u32 %v2081_v57, %v2078_v56  ;;  %v2101_v3 = vrot.slane %v2099_v58, 7 }
  0x4f   : > { %1598 = vrot.lane.b32.xlu1 %v1597_v46, %s7256_s30  ;;  %v7531_v44 = vcombine.low %v1783_v33, %v1790_v52  ;;  %v2120_v4 = vrot.slane %v2118_v59, 6  ;;  %v2121_v6 = vshll.u32 %v6603_v37, 16  ;;  %v2127_v8 = vshll.u32 %v2074_v42, 16 }
  0x50   : > { %v2096_v7 = vor.u32 %v2095_v63, %v2092_v62  ;;  %v2083_v9 = vrot.slane %v2082_v2, 2  ;;  %v2176_v14 = vcombine.low %v7186_v43, %v7187_v49  ;;  %v2343_v20 = vcombine.high %v6624_v11, %v6624_v11  ;;  %v6663_v43 = vld.sshfl [vmem:[%s7334_s9 + $0x10] sm:$0x13 pattern:$0x76325410] }
  0x51   : > { %1715 = vrot.lane.b32.xlu0 %v7472_v0, %s7255_s29  ;;  %v2123_v10 = vrot.slane %v2121_v6, 7  ;;  %v2129_v13 = vrot.slane %v2127_v8, 7  ;;  %v2323_v23 = vcombine.low %v7527_v51, %v7189_v1  ;;  %v2351_v24 = vcombine.high %v6625_v15, %v6625_v15  ;;  %v6669_v54 = vld.sshfl [vmem:[%s7334_s9 + $0x8] sm:$0x12 pattern:$0x76325410] }
  0x52   : > { %v2097_v12 = vrot.slane %v2096_v7, 2  ;;  %v2088_v16 = vsel %vm7365_vm6, %v2083_v9, %v2087_v60  ;;  %v2367_v25 = vcombine.high %v6627_v18, %v6627_v18  ;;  %v2369_v29 = vshrl.u32 %v6624_v11, 16  ;;  %v6670_v58 = vld.sshfl [vmem:[%s7334_s9 + $0xc] sm:$0x12 pattern:$0x76325410] }
  0x53   : > { %1792 = vrot.lane.b32.xlu1 %v7531_v44, %s7257_s8  ;;  %v2124_v17 = vor.u32 %v2123_v10, %v2120_v4  ;;  %v2378_v30 = vshll.u32 %v2343_v20, 16  ;;  %v2383_v31 = vshrl.u32 %v6625_v15, 16  ;;  %v2386_v33 = vshll.u32 %v6625_v15, 16 }
  0x54   : > { %v2102_v22 = vsel %vm7365_vm6, %v2097_v12, %v2101_v3  ;;  %v2371_v37 = vrot.slane %v2369_v29, 6  ;;  %v2392_v38 = vshll.u32 %v2351_v24, 16  ;;  %v2411_v48 = vshrl.u32 %v6627_v18, 16 }
  0x55   : > { %2001 = vrot.lane.b32.xlu0 %v7395_v50, %s7253_s25  ;;  %v2125_v26 = vrot.slane %v2124_v17, 2  ;;  %v2131_v28 = vcombine.low %v2088_v16, %v2102_v22  ;;  %v2372_v50 = vshll.u32 %v6624_v11, 16  ;;  %v2380_v41 = vrot.slane %v2378_v30, 7 }
  0x56   : > { %v2385_v42 = vrot.slane %v2383_v31, 6  ;;  %v2388_v46 = vrot.slane %v2386_v33, 7  ;;  %v2394_v47 = vrot.slane %v2392_v38, 7  ;;  %v2414_v49 = vshll.u32 %v6627_v18, 16 }
  0x57   : > { %2031 = vrot.lane.b32.xlu1 %v2030_v40, %s7251_s15  ;;  %v7551_v34 = vsel %vm7365_vm6, %v2125_v26, %v2129_v13  ;;  %v7554_v35 = vrot.slane %v2131_v28, %v7336_v5  ;;  %v2374_v40 = vrot.slane %v2372_v50, 7  ;;  %v2420_v53 = vshll.u32 %v2367_v25, 16  ;;  %v6672_v63 = vld.sshfl [vmem:[%s7334_s9 + $0x14] sm:$0x12 pattern:$0x76325410] }
  0x58   : > { %v2132_v39 = vcombine.low %v7386_v27, %v7551_v34  ;;  %v2389_v55 = vor.u32 %v2388_v46, %v2385_v42  ;;  %v2413_v56 = vrot.slane %v2411_v48, 6  ;;  %v2416_v27 = vrot.slane %v2414_v49, 7  ;;  %v6684_v29 = vld.sshfl [vmem:[%s7343_s14 + $0x10] sm:$0x13 pattern:$0x76325410] }
  0x59   : > { %v2375_v52 = vor.u32 %v2374_v40, %v2371_v37  ;;  %v2733_v57 = vcombine.high %v6663_v43, %v6663_v43  ;;  %v2422_v62 = vrot.slane %v2420_v53, 7  ;;  %v2771_v3 = vshrl.u32 %v6663_v43, 16  ;;  %v6709_v48 = vld.sshfl [vmem:[%s7343_s14 + $0x8] sm:$0x12 pattern:$0x76325410] }
  0x5a   : > { %v2146_v51 = vrot.slane %v2132_v39, %v7336_v5  ;;  %v2390_v1 = vrot.slane %v2389_v55, 2  ;;  %v2417_v2 = vor.u32 %v2416_v27, %v2413_v56  ;;  %v2774_v4 = vshll.u32 %v6663_v43, 16  ;;  %v6710_v49 = vld.sshfl [vmem:[%s7343_s14 + $0xc] sm:$0x12 pattern:$0x76325410] }
  0x5b   : > { %2177 = vrot.lane.b32.xlu1 %v2176_v14, %s7252_s16  ;;  %v2376_v60 = vrot.slane %v2375_v52, 2  ;;  %v2780_v7 = vshll.u32 %v2733_v57, 16  ;;  %v2834_v8 = vcombine.high %v6669_v54, %v6669_v54  ;;  %v2773_v11 = vrot.slane %v2771_v3, 6 }
  0x5c   : > { %v2147_v59 = vcombine.low %v7554_v35, %v2146_v51  ;;  %v7573_v9 = vsel %vm7365_vm6, %v2390_v1, %v2394_v47  ;;  %v2418_v10 = vrot.slane %v2417_v2, 2  ;;  %v2776_v12 = vrot.slane %v2774_v4, 7 }
  0x5d   : > { %v7569_v6 = vsel %vm7365_vm6, %v2376_v60, %v2380_v41  ;;  %v2782_v14 = vrot.slane %v2780_v7, 7  ;;  %v2842_v15 = vcombine.high %v6670_v58, %v6670_v58  ;;  %v2858_v16 = vcombine.high %v6672_v63, %v6672_v63 }
  0x5e   : > { %2148 = vrot.lane.b32.xlu0 %v2147_v59, %s7254_s26  ;;  %v2424_v13 = vcombine.low %v7569_v6, %v7573_v9  ;;  %v7579_v17 = vsel %vm7365_vm6, %v2418_v10, %v2422_v62  ;;  %v2777_v18 = vor.u32 %v2776_v12, %v2773_v11  ;;  %v6673_v20 = vrot.slane %v6669_v54, 9  ;;  %v6726_v12 = vld.sshfl [vmem:[%s7343_s14] sm:$0x13 pattern:$0x76325410] }
  0x5f   : > { %2324 = vrot.lane.b32.xlu1 %v2323_v23, %s7255_s29  ;;  %v2861_v22 = vrot.slane %v2834_v8, 7  ;;  %v6681_v23 = vld.sshfl [vmem:[%s7343_s14 + $0x4] sm:$0x13 pattern:$0x76325410]  ;;  %v2425_v24 = vcombine.low %v7455_v45, %v7579_v17  ;;  %v6674_v26 = vrot.slane %v6670_v58, 9  ;;  %v2935_v37 = vcombine.high %v6684_v29, %v6684_v29 }
  0x60   : > { %v7589_v25 = vrot.slane %v2424_v13, %v7336_v5  ;;  %v2865_v28 = vrot.slane %v2842_v15, 7  ;;  %v2778_v50 = vrot.slane %v2777_v18, 2  ;;  %v6676_v30 = vrot.slane %v6672_v63, 9 }
  0x61   : > { %v2873_v31 = vrot.slane %v2858_v16, 7  ;;  %v2439_v33 = vrot.slane %v2425_v24, %v7336_v5  ;;  %v2911_v45 = vcombine.high %v6681_v23, %v6681_v23  ;;  %v2937_v41 = vshrl.u32 %v6681_v23, 16  ;;  %v6712_v58 = vld.sshfl [vmem:[%s7343_s14 + $0x14] sm:$0x12 pattern:$0x76325410] }
  0x62   : > { %2294 = vrot.lane.b32.xlu0 %v7472_v0, %s7256_s30  ;;  %v2866_v0 = vsel %vm7429_vm13, %v6674_v26, %v2865_v28  ;;  %v2783_v38 = vsel %vm7365_vm6, %v2778_v50, %v2782_v14  ;;  %v2940_v47 = vshll.u32 %v6681_v23, 16  ;;  %v2979_v54 = vshrl.u32 %v6684_v29, 16  ;;  %v7616_v15 = vld.sshfl [vmem:[%s7343_s14 + $0x4] sm:$0xf pattern:$0x76325410] }
  0x63   : > { %2698 = vrot.lane.b32.xlu1 %v7493_v19, %s7253_s25  ;;  %v2862_v19 = vsel %vm7429_vm13, %v6673_v20, %v2861_v22  ;;  %v2874_v39 = vsel %vm7429_vm13, %v6676_v30, %v2873_v31  ;;  %v2440_v42 = vcombine.low %v7589_v25, %v2439_v33  ;;  %v2799_v43 = vcombine.low %v2783_v38, %v7551_v34  ;;  %v7634_v50 = vld.sshfl [vmem:[%s7511_s12] sm:$0xf pattern:$0x76325410] }
  0x64   : > { %v2875_v40 = vcombine.low %v2862_v19, %v2866_v0  ;;  %v2876_v46 = vcombine.low %v7469_v61, %v2874_v39  ;;  %v2939_v52 = vrot.slane %v2937_v41, 6  ;;  %v2946_v53 = vshll.u32 %v2911_v45, 16 }
  0x65   : > { %v2813_v55 = vrot.slane %v2799_v43, %v7336_v5  ;;  %v2942_v27 = vrot.slane %v2940_v47, 7  ;;  %v2982_v57 = vshll.u32 %v6684_v29, 16  ;;  %v2981_v61 = vrot.slane %v2979_v54, 6 }
  0x66   : > { %v2883_v51 = vrot.slane %v2875_v40, %v7336_v5  ;;  %2441 = vrot.lane.b32.xlu0 %v2440_v42, %s7257_s8  ;;  %v2890_v56 = vrot.slane %v2876_v46, %v7336_v5  ;;  %v2948_v34 = vrot.slane %v2946_v53, 7  ;;  %v2988_v59 = vshll.u32 %v2935_v37, 16  ;;  %v7191_v29 = vld.sshfl [vmem:[%s7343_s14 + $0xc] sm:$0xf pattern:$0x76325410] }
  0x67   : > { %v2814_v60 = vcombine.low %v7554_v35, %v2813_v55  ;;  %v2943_v63 = vor.u32 %v2942_v27, %v2939_v52  ;;  %v2984_v1 = vrot.slane %v2982_v57, 7  ;;  %v3222_v3 = vcombine.high %v6709_v48, %v6709_v48  ;;  %v6742_v46 = vld.sshfl [vmem:[%s7511_s12] sm:$0x13 pattern:$0x76325410] }
  0x68   : > { %v2891_v62 = vcombine.low %v2883_v51, %v2890_v56  ;;  %v2990_v2 = vrot.slane %v2988_v59, 7  ;;  %v3230_v4 = vcombine.high %v6710_v49, %v6710_v49  ;;  %v3246_v10 = vcombine.high %v6712_v58, %v6712_v58  ;;  %v6744_v52 = vld.sshfl [vmem:[%s7511_s12 + $0x8] sm:$0x13 pattern:$0x76325410] }
  0x69   : > { %v2944_v7 = vrot.slane %v2943_v63, 2  ;;  %v2985_v8 = vor.u32 %v2984_v1, %v2981_v61  ;;  %v6713_v11 = vrot.slane %v6709_v48, 9  ;;  %v3249_v13 = vrot.slane %v3222_v3, 7 }
  0x6a   : > { %2815 = vrot.lane.b32.xlu0 %v2814_v60, %s7251_s15  ;;  %2892 = vrot.lane.b32.xlu1 %v2891_v62, %s7254_s26  ;;  %v6714_v35 = vrot.slane %v6710_v49, 9  ;;  %v3253_v14 = vrot.slane %v3230_v4, 7  ;;  %v6716_v20 = vrot.slane %v6712_v58, 9  ;;  %v3261_v22 = vrot.slane %v3246_v10, 7 }
  0x6b   : > { %v7620_v16 = vsel %vm7365_vm6, %v2944_v7, %v2948_v34  ;;  %v2986_v18 = vrot.slane %v2985_v8, 2  ;;  %v7626_v24 = vsel %vm7429_vm13, %v6713_v11, %v3249_v13  ;;  %v3391_v28 = vcombine.high %v6726_v12, %v6726_v12  ;;  %v6743_v48 = vld.sshfl [vmem:[%s7511_s12 + $0x4] sm:$0x13 pattern:$0x76325410] }
  0x6c   : > { %v2992_v23 = vcombine.low %v7620_v16, %v7569_v6  ;;  %v7630_v26 = vsel %vm7429_vm13, %v6714_v35, %v3253_v14  ;;  %v3262_v6 = vsel %vm7429_vm13, %v6716_v20, %v3261_v22  ;;  %v3417_v31 = vshrl.u32 %v6726_v12, 16  ;;  %v6745_v55 = vld.sshfl [vmem:[%s7511_s12 + $0xc] sm:$0x13 pattern:$0x76325410] }
  0x6d   : > { %v7638_v19 = vsel %vm7365_vm6, %v2986_v18, %v2990_v2  ;;  %v3263_v30 = vcombine.low %v7626_v24, %v7630_v26  ;;  %v3264_v37 = vcombine.low %v7516_v36, %v3262_v6  ;;  %v3420_v40 = vshll.u32 %v6726_v12, 16  ;;  %v7194_v12 = vld.sshfl [vmem:[%s7511_s12 + $0x4] sm:$0xf pattern:$0x76325410] }
  0x6e   : > { %3086 = vrot.lane.b32.xlu1 %v7531_v44, %s7256_s30  ;;  %v2993_v33 = vcombine.low %v7573_v9, %v7638_v19  ;;  %v3000_v0 = vrot.slane %v2992_v23, %v7336_v5  ;;  %v3187_v45 = vcombine.low %v7638_v19, %v7579_v17  ;;  %v7193_v44 = vld.sshfl [vmem:[%s7511_s12 + $0x8] sm:$0xf pattern:$0x76325410]  ;;  %v3419_v39 = vrot.slane %v3417_v31, 6 }
  0x6f   : > { %v7654_v38 = vrot.slane %v3263_v30, %v7336_v5  ;;  %v3426_v41 = vshll.u32 %v3391_v28, 16  ;;  %v3278_v43 = vrot.slane %v3264_v37, %v7336_v5  ;;  %v3422_v47 = vrot.slane %v3420_v40, 7  ;;  %v7195_v13 = vld.sshfl [vmem:[%s7511_s12 + $0xc] sm:$0xf pattern:$0x76325410] }
  0x70   : > { %v3007_v42 = vrot.slane %v2993_v33, %v7336_v5  ;;  %v3201_v9 = vrot.slane %v3187_v45, %v7336_v5  ;;  %v3517_v54 = vcombine.low %v7616_v15, %v7191_v29  ;;  %v3683_v56 = vcombine.high %v6742_v46, %v6742_v46  ;;  %v6757_v31 = vld.sshfl [vmem:[%s7511_s12 + $0x10] sm:$0x13 pattern:$0x76325410] }
  0x71   : > { %v3428_v17 = vrot.slane %v3426_v41, 7  ;;  %v3279_v51 = vcombine.low %v7654_v38, %v3278_v43  ;;  %v3423_v53 = vor.u32 %v3422_v47, %v3419_v39  ;;  %v3691_v27 = vcombine.high %v6743_v48, %v6743_v48  ;;  %v6771_v43 = vld.sshfl [vmem:[%s7343_s14] sm:$0x12 pattern:$0x76325410] }
  0x72   : > { %v7661_v36 = vcombine.low %v3000_v0, %v3007_v42  ;;  %v3202_v49 = vcombine.low %v7589_v25, %v3201_v9  ;;  %v3663_v57 = vcombine.low %v7634_v50, %v7193_v44  ;;  %v3699_v58 = vcombine.high %v6744_v52, %v6744_v52 }
  0x73   : > { %3280 = vrot.lane.b32.xlu1 %v3279_v51, %s7257_s8  ;;  %v3707_v34 = vcombine.high %v6745_v55, %v6745_v55  ;;  %v3709_v61 = vshrl.u32 %v6742_v46, 16  ;;  %v3424_v59 = vrot.slane %v3423_v53, 2  ;;  %v3712_v60 = vshll.u32 %v6742_v46, 16 }
  0x74   : > { %3009 = vrot.lane.b32.xlu0 %v7661_v36, %s7252_s16  ;;  %v3718_v62 = vshll.u32 %v3683_v56, 16  ;;  %v3723_v63 = vshrl.u32 %v6743_v48, 16  ;;  %v3726_v2 = vshll.u32 %v6743_v48, 16  ;;  %v3732_v3 = vshll.u32 %v3691_v27, 16 }
  0x75   : > { %v3711_v1 = vrot.slane %v3709_v61, 6  ;;  %v3737_v4 = vshrl.u32 %v6744_v52, 16  ;;  %v3429_v7 = vsel %vm7365_vm6, %v3424_v59, %v3428_v17  ;;  %v3714_v8 = vrot.slane %v3712_v60, 7 }
  0x76   : > { %v3720_v10 = vrot.slane %v3718_v62, 7  ;;  %v3725_v11 = vrot.slane %v3723_v63, 6  ;;  %v3472_v35 = vcombine.low %v3429_v7, %v7620_v16  ;;  %v3728_v14 = vrot.slane %v3726_v2, 7 }
  0x77   : > { %3518 = vrot.lane.b32.xlu1 %v3517_v54, %s7251_s15  ;;  %v3734_v15 = vrot.slane %v3732_v3, 7  ;;  %v3739_v18 = vrot.slane %v3737_v4, 6  ;;  %v3715_v20 = vor.u32 %v3714_v8, %v3711_v1  ;;  %v3740_v22 = vshll.u32 %v6744_v52, 16 }
  0x78   : > { %3203 = vrot.lane.b32.xlu0 %v3202_v49, %s7255_s29  ;;  %v3746_v23 = vshll.u32 %v3699_v58, 16  ;;  %v3751_v28 = vshrl.u32 %v6745_v55, 16  ;;  %v3480_v29 = vrot.slane %v3472_v35, %v7336_v5  ;;  %v3729_v50 = vor.u32 %v3728_v14, %v3725_v11  ;;  %v6772_v49 = vld.sshfl [vmem:[%s7343_s14 + $0x4] sm:$0x12 pattern:$0x76325410] }
  0x79   : > { %v3754_v6 = vshll.u32 %v6745_v55, 16  ;;  %v3760_v30 = vshll.u32 %v3707_v34, 16  ;;  %v3716_v33 = vrot.slane %v3715_v20, 2  ;;  %v3742_v0 = vrot.slane %v3740_v22, 7 }
  0x7a   : > { %v3748_v45 = vrot.slane %v3746_v23, 7  ;;  %v3753_v37 = vrot.slane %v3751_v28, 6  ;;  %v3488_v44 = vcombine.low %v3480_v29, %v7589_v25  ;;  %v3730_v39 = vrot.slane %v3729_v50, 2 }
  0x7b   : > { %3664 = vrot.lane.b32.xlu1 %v3663_v57, %s7252_s16  ;;  %v3756_v40 = vrot.slane %v3754_v6, 7  ;;  %v3762_v41 = vrot.slane %v3760_v30, 7  ;;  %v3721_v42 = vsel %vm7365_vm6, %v3716_v33, %v3720_v10  ;;  %v3743_v9 = vor.u32 %v3742_v0, %v3739_v18  ;;  %v6784_v1 = vld.sshfl [vmem:[%s7343_s14 + $0x8] sm:$0x13 pattern:$0x76325410] }
  0x7c   : > { %3489 = vrot.lane.b32.xlu0 %v3488_v44, %s7253_s25  ;;  %v3735_v46 = vsel %vm7365_vm6, %v3730_v39, %v3734_v15  ;;  %v3854_v17 = vcombine.high %v6757_v31, %v6757_v31  ;;  %v3898_v48 = vshrl.u32 %v6757_v31, 16  ;;  %v3810_v52 = vcombine.low %v7194_v12, %v7195_v13  ;;  %v6785_v8 = vld.sshfl [vmem:[%s7343_s14 + $0xc] sm:$0x13 pattern:$0x76325410] }
  0x7d   : > { %v3757_v47 = vor.u32 %v3756_v40, %v3753_v37  ;;  %v3744_v25 = vrot.slane %v3743_v9, 2  ;;  %v3764_v51 = vcombine.low %v3721_v42, %v3735_v46  ;;  %v3901_v53 = vshll.u32 %v6757_v31, 16  ;;  %v6794_v18 = vld.sshfl [vmem:[%s7343_s14 + $0x10] sm:$0x12 pattern:$0x76325410] }
  0x7e   : > { %v3900_v55 = vrot.slane %v3898_v48, 6  ;;  %v3907_v56 = vshll.u32 %v3854_v17, 16  ;;  %v4127_v27 = vcombine.high %v6771_v43, %v6771_v43  ;;  %v4135_v61 = vcombine.high %v6772_v49, %v6772_v49  ;;  %v6803_v31 = vld.sshfl [vmem:[%s7511_s12] sm:$0x12 pattern:$0x76325410] }
  0x7f   : > { %v3758_v54 = vrot.slane %v3757_v47, 2  ;;  %v3749_v57 = vsel %vm7365_vm6, %v3744_v25, %v3748_v45  ;;  %v3772_v58 = vrot.slane %v3764_v51, %v7336_v5  ;;  %3811 = vrot.lane.b32.xlu1 %v3810_v52, %s7255_s29  ;;  %v3903_v34 = vrot.slane %v3901_v53, 7  ;;  %v6804_v44 = vld.sshfl [vmem:[%s7511_s12 + $0x4] sm:$0x12 pattern:$0x76325410] }
  0x80   : > { %3635 = vrot.lane.b32.xlu0 %v7661_v36, %s7254_s26  ;;  %v3909_v60 = vrot.slane %v3907_v56, 7  ;;  %v3911_v62 = vcombine.low %v3735_v46, %v3749_v57  ;;  %v6775_v63 = vrot.slane %v6771_v43, 9  ;;  %v4154_v4 = vrot.slane %v4127_v27, 7 }
  0x81   : > { %v3763_v59 = vsel %vm7365_vm6, %v3758_v54, %v3762_v41  ;;  %v3904_v3 = vor.u32 %v3903_v34, %v3900_v55  ;;  %v6776_v7 = vrot.slane %v6772_v49, 9  ;;  %v4158_v11 = vrot.slane %v4135_v61, 7  ;;  %v6805_v39 = vld.sshfl [vmem:[%s7511_s12 + $0x8] sm:$0x12 pattern:$0x76325410] }
  0x82   : > { %v3765_v2 = vcombine.low %v3749_v57, %v3763_v59  ;;  %v3919_v10 = vrot.slane %v3911_v62, %v7336_v5  ;;  %v4212_v12 = vcombine.high %v6784_v1, %v6784_v1  ;;  %v4220_v13 = vcombine.high %v6785_v8, %v6785_v8  ;;  %v6806_v43 = vld.sshfl [vmem:[%s7511_s12 + $0xc] sm:$0x12 pattern:$0x76325410] }
  0x83   : > { %v3905_v35 = vrot.slane %v3904_v3, 2  ;;  %v4155_v14 = vsel %vm7429_vm13, %v6775_v63, %v4154_v4  ;;  %v4244_v15 = vshrl.u32 %v6784_v1, 16  ;;  %v7707_v20 = vsel %vm7429_vm13, %v6776_v7, %v4158_v11 }
  0x84   : > { %v3779_v36 = vrot.slane %v3765_v2, %v7336_v5  ;;  %v4247_v22 = vshll.u32 %v6784_v1, 16  ;;  %v4253_v23 = vshll.u32 %v4212_v12, 16  ;;  %v4258_v28 = vshrl.u32 %v6785_v8, 16 }
  0x85   : > { %v7713_v50 = vsel %vm7365_vm6, %v3905_v35, %v3909_v60  ;;  %v4168_v6 = vcombine.low %v4155_v14, %v7707_v20  ;;  %v4246_v30 = vrot.slane %v4244_v15, 6  ;;  %v4261_v41 = vshll.u32 %v6785_v8, 16  ;;  %v6826_v60 = vld.sshfl [vmem:[%s7511_s12 + $0x10] sm:$0x12 pattern:$0x76325410] }
  0x86   : > { %v7709_v29 = vcombine.low %v3772_v58, %v3779_v36  ;;  %v3912_v33 = vcombine.low %v3763_v59, %v7713_v50  ;;  %v4249_v0 = vrot.slane %v4247_v22, 7  ;;  %v4255_v45 = vrot.slane %v4253_v23, 7  ;;  %v6848_v22 = vld.sshfl [vmem:[%s7343_s14 + $0x4] sm:$0x13 pattern:$0x76325410] }
  0x87   : > { %v4260_v37 = vrot.slane %v4258_v28, 6  ;;  %v4176_v40 = vrot.slane %v4168_v6, %v7336_v5  ;;  %v4267_v42 = vshll.u32 %v4220_v13, 16  ;;  %v4345_v9 = vcombine.high %v6794_v18, %v6794_v18  ;;  %v6851_v6 = vld.sshfl [vmem:[%s7343_s14 + $0x10] sm:$0x13 pattern:$0x76325410] }
  0x88   : > { %3781 = vrot.lane.b32.xlu0 %v7709_v29, %s7256_s30  ;;  %v3926_v46 = vrot.slane %v3912_v33, %v7336_v5  ;;  %v4250_v47 = vor.u32 %v4249_v0, %v4246_v30  ;;  %v6798_v17 = vrot.slane %v6794_v18, 9  ;;  %v4362_v48 = vcombine.low %v7707_v20, %v7626_v24 }
  0x89   : > { %v4184_v49 = vcombine.low %v4176_v40, %v7654_v38  ;;  %v4263_v25 = vrot.slane %v4261_v41, 7  ;;  %v4269_v51 = vrot.slane %v4267_v42, 7  ;;  %v4360_v52 = vrot.slane %v4345_v9, 7 }
  0x8a   : > { %v7728_v53 = vcombine.low %v3919_v10, %v3926_v46  ;;  %v4251_v54 = vrot.slane %v4250_v47, 2  ;;  %v4370_v55 = vrot.slane %v4362_v48, %v7336_v5  ;;  %v4515_v56 = vcombine.high %v6803_v31, %v6803_v31  ;;  %v7197_v41 = vld.sshfl [vmem:[%s7343_s14 + $0x10] sm:$0xf pattern:$0x76325410] }
  0x8b   : > { %4185 = vrot.lane.b32.xlu1 %v4184_v49, %s7253_s25  ;;  %v4264_v27 = vor.u32 %v4263_v25, %v4260_v37  ;;  %v7734_v57 = vsel %vm7429_vm13, %v6798_v17, %v4360_v52  ;;  %v4523_v24 = vcombine.high %v6804_v44, %v6804_v44  ;;  %v4531_v58 = vcombine.high %v6805_v39, %v6805_v39  ;;  %v6863_v46 = vld.sshfl [vmem:[%s7343_s14 + $0x14] sm:$0x13 pattern:$0x76325410] }
  0x8c   : > { %3928 = vrot.lane.b32.xlu0 %v7728_v53, %s7257_s8  ;;  %v7740_v38 = vsel %vm7365_vm6, %v4251_v54, %v4255_v45  ;;  %v4363_v34 = vcombine.low %v7630_v26, %v7734_v57  ;;  %v4539_v61 = vcombine.high %v6806_v43, %v6806_v43  ;;  %v6807_v59 = vrot.slane %v6803_v31, 9  ;;  %v7769_v45 = vld.sshfl [vmem:[%s7343_s14 + $0x8] sm:$0xf pattern:$0x76325410] }
  0x8d   : > { %v4265_v62 = vrot.slane %v4264_v27, 2  ;;  %v4285_v63 = vcombine.low %v7620_v16, %v7740_v38  ;;  %v4542_v1 = vrot.slane %v4515_v56, 7  ;;  %v6808_v2 = vrot.slane %v6804_v44, 9 }
  0x8e   : > { %v4377_v3 = vrot.slane %v4363_v34, %v7336_v5  ;;  %v4546_v4 = vrot.slane %v4523_v24, 7  ;;  %v6809_v7 = vrot.slane %v6805_v39, 9  ;;  %v4550_v8 = vrot.slane %v4531_v58, 7 }
  0x8f   : > { %v7750_v10 = vsel %vm7365_vm6, %v4265_v62, %v4269_v51  ;;  %v4293_v26 = vrot.slane %v4285_v63, %v7336_v5  ;;  %v4543_v11 = vsel %vm7429_vm13, %v6807_v59, %v4542_v1  ;;  %v6810_v12 = vrot.slane %v6806_v43, 9  ;;  %v7782_v25 = vld.sshfl [vmem:[%s7511_s12 + $0x4] sm:$0xf pattern:$0x76325410] }
  0x90   : > { %v4286_v16 = vcombine.low %v7750_v10, %v7638_v19  ;;  %v4378_v13 = vcombine.low %v4370_v55, %v4377_v3  ;;  %v4547_v36 = vsel %vm7429_vm13, %v6808_v2, %v4546_v4  ;;  %v4551_v35 = vsel %vm7429_vm13, %v6809_v7, %v4550_v8  ;;  %v7787_v62 = vld.sshfl [vmem:[%s7511_s12 + $0x8] sm:$0xf pattern:$0x76325410] }
  0x91   : > { %v4554_v14 = vrot.slane %v4539_v61, 7  ;;  %v4556_v15 = vcombine.low %v4543_v11, %v4547_v36  ;;  %v4733_v18 = vcombine.high %v6826_v60, %v6826_v60  ;;  %v6830_v28 = vrot.slane %v6826_v60, 9  ;;  %v7199_v60 = vld.sshfl [vmem:[%s7511_s12 + $0xc] sm:$0xf pattern:$0x76325410] }
  0x92   : > { %v4300_v23 = vrot.slane %v4286_v16, %v7336_v5  ;;  %4379 = vrot.lane.b32.xlu1 %v4378_v13, %s7254_s26  ;;  %v4750_v19 = vcombine.low %v4547_v36, %v4551_v35  ;;  %v4878_v30 = vcombine.high %v6848_v22, %v6848_v22  ;;  %v4902_v40 = vcombine.high %v6851_v6, %v6851_v6  ;;  %v7795_v3 = vld.sshfl [vmem:[%s7511_s12 + $0x10] sm:$0xf pattern:$0x76325410] }
  0x93   : > { %v4555_v31 = vsel %vm7429_vm13, %v6810_v12, %v4554_v14  ;;  %v4564_v33 = vrot.slane %v4556_v15, %v7336_v5  ;;  %v4748_v0 = vrot.slane %v4733_v18, 7  ;;  %v4904_v9 = vshrl.u32 %v6848_v22, 16 }
  0x94   : > { %v4301_v37 = vcombine.low %v4293_v26, %v4300_v23  ;;  %v4557_v44 = vcombine.low %v4551_v35, %v4555_v31  ;;  %v4758_v39 = vrot.slane %v4750_v19, %v7336_v5  ;;  %v4907_v43 = vshll.u32 %v6848_v22, 16  ;;  %v6884_v23 = vld.sshfl [vmem:[%s7511_s12 + $0x8] sm:$0x13 pattern:$0x76325410] }
  0x95   : > { %v7775_v42 = vsel %vm7429_vm13, %v6830_v28, %v4748_v0  ;;  %v4913_v48 = vshll.u32 %v4878_v30, 16  ;;  %v4946_v49 = vshrl.u32 %v6851_v6, 16  ;;  %v4906_v51 = vrot.slane %v4904_v9, 6  ;;  %v7811_v28 = vpop.permute.xlu1 %672 }
  0x96   : > { %4302 = vrot.lane.b32.xlu0 %v4301_v37, %s7251_s15  ;;  %v4571_v47 = vrot.slane %v4557_v44, %v7336_v5  ;;  %v4751_v17 = vcombine.low %v4555_v31, %v7775_v42  ;;  %v4909_v52 = vrot.slane %v4907_v43, 7  ;;  %v4949_v54 = vshll.u32 %v6851_v6, 16  ;;  %v6885_v31 = vld.sshfl [vmem:[%s7511_s12 + $0xc] sm:$0x13 pattern:$0x76325410] }
  0x97   : > { %v4955_v55 = vshll.u32 %v4902_v40, 16  ;;  %v4915_v24 = vrot.slane %v4913_v48, 7  ;;  %v4948_v58 = vrot.slane %v4946_v49, 6  ;;  %v5048_v1 = vcombine.high %v6863_v46, %v6863_v46 }
  0x98   : > { %v4572_v56 = vcombine.low %v4564_v33, %v4571_v47  ;;  %v4765_v27 = vrot.slane %v4751_v17, %v7336_v5  ;;  %v4910_v34 = vor.u32 %v4909_v52, %v4906_v51  ;;  %v4951_v61 = vrot.slane %v4949_v54, 7  ;;  %v6887_v0 = vld.sshfl [vmem:[%s7511_s12 + $0x14] sm:$0x13 pattern:$0x76325410] }
  0x99   : > { %v4957_v59 = vrot.slane %v4955_v55, 7  ;;  %v5092_v2 = vshrl.u32 %v6863_v46, 16  ;;  %v5095_v8 = vshll.u32 %v6863_v46, 16  ;;  %v5105_v26 = vcombine.low %v7740_v38, %v7750_v10 }
  0x9a   : > { %4496 = vrot.lane.b32.xlu0 %v7709_v29, %s7252_s16  ;;  %4573 = vrot.lane.b32.xlu1 %v4572_v56, %s7256_s30  ;;  %v7792_v63 = vcombine.low %v4758_v39, %v4765_v27  ;;  %v4911_v4 = vrot.slane %v4910_v34, 2  ;;  %v4952_v7 = vor.u32 %v4951_v61, %v4948_v58  ;;  %v5004_v11 = vcombine.low %v7769_v45, %v7197_v41  ;;  %v7823_v41 = vpop.permute.xlu0 %524  ;;  %v6911_v51 = vld.sshfl [vmem:[%s7343_s14 + $0xc] sm:$0x12 pattern:$0x76325410] }
  0x9b   : > { %v5094_v12 = vrot.slane %v5092_v2, 6  ;;  %v5101_v16 = vshll.u32 %v5048_v1, 16  ;;  %v5097_v36 = vrot.slane %v5095_v8, 7  ;;  %v5113_v35 = vrot.slane %v5105_v26, %v7336_v5 }
  0x9c   : > { %v4916_v29 = vsel %vm7365_vm6, %v4911_v4, %v4915_v24  ;;  %v4953_v13 = vrot.slane %v4952_v7, 2  ;;  %v5150_v30 = vcombine.low %v7782_v25, %v7199_v60  ;;  %v5317_v45 = vcombine.high %v6884_v23, %v6884_v23  ;;  %v6932_v8 = vld.sshfl [vmem:[%s7343_s14 + $0x14] sm:$0x12 pattern:$0x76325410] }
  0x9d   : > { %v4959_v14 = vcombine.low %v4916_v29, %v7740_v38  ;;  %v5103_v15 = vrot.slane %v5101_v16, 7  ;;  %v5098_v22 = vor.u32 %v5097_v36, %v5094_v12  ;;  %v5297_v38 = vcombine.low %v7787_v62, %v7795_v3 }
  0x9e   : > { %4690 = vrot.lane.b32.xlu0 %v7728_v53, %s7255_s29  ;;  %4767 = vrot.lane.b32.xlu1 %v7792_v63, %s7257_s8  ;;  %v4958_v18 = vsel %vm7365_vm6, %v4953_v13, %v4957_v59  ;;  %v5325_v37 = vcombine.high %v6885_v31, %v6885_v31  ;;  %v5341_v39 = vcombine.high %v6887_v0, %v6887_v0  ;;  %v5343_v40 = vshrl.u32 %v6884_v23, 16 }
  0x9f   : > { %v4960_v19 = vcombine.low %v7750_v10, %v4958_v18  ;;  %v4967_v6 = vrot.slane %v4959_v14, %v7336_v5  ;;  %v5099_v33 = vrot.slane %v5098_v22, 2  ;;  %v6910_v10 = vld.sshfl [vmem:[%s7343_s14 + $0x8] sm:$0x12 pattern:$0x76325410]  ;;  %v5346_v43 = vshll.u32 %v6884_v23, 16 }
  0xa0   : > { %v5352_v46 = vshll.u32 %v5317_v45, 16  ;;  %v5357_v47 = vshrl.u32 %v6885_v31, 16  ;;  %v5345_v49 = vrot.slane %v5343_v40, 6  ;;  %v5360_v25 = vshll.u32 %v6885_v31, 16 }
  0xa1   : > { %v4974_v44 = vrot.slane %v4960_v19, %v7336_v5  ;;  %v5104_v9 = vsel %vm7365_vm6, %v5099_v33, %v5103_v15  ;;  %v5348_v52 = vrot.slane %v5346_v43, 7  ;;  %v5366_v56 = vshll.u32 %v5325_v37, 16  ;;  %v6941_v40 = vld.sshfl [vmem:[%s7511_s12 + $0x4] sm:$0x13 pattern:$0x76325410] }
  0xa2   : > { %5005 = vrot.lane.b32.xlu1 %v5004_v11, %s7251_s15  ;;  %v5106_v48 = vcombine.low %v4958_v18, %v5104_v9  ;;  %v5354_v54 = vrot.slane %v5352_v46, 7  ;;  %v5359_v55 = vrot.slane %v5357_v47, 6  ;;  %v5362_v58 = vrot.slane %v5360_v25, 7 }
  0xa3   : > { %v4975_v17 = vcombine.low %v4967_v6, %v4974_v44  ;;  %v5385_v34 = vshrl.u32 %v6887_v0, 16  ;;  %v5388_v61 = vshll.u32 %v6887_v0, 16  ;;  %v5349_v59 = vor.u32 %v5348_v52, %v5345_v49  ;;  %v6944_v43 = vld.sshfl [vmem:[%s7511_s12 + $0x10] sm:$0x13 pattern:$0x76325410] }
  0xa4   : > { %v5120_v24 = vrot.slane %v5106_v48, %v7336_v5  ;;  %v5368_v60 = vrot.slane %v5366_v56, 7  ;;  %v5394_v62 = vshll.u32 %v5341_v39, 16  ;;  %v5622_v1 = vcombine.high %v6910_v10, %v6910_v10  ;;  %v7836_v26 = vpop.permute.xlu0 %493  ;;  %v6969_v49 = vld.sshfl [vmem:[%s7511_s12 + $0x8] sm:$0x12 pattern:$0x76325410] }
  0xa5   : > { %4976 = vrot.lane.b32.xlu0 %v4975_v17, %s7253_s25  ;;  %v5363_v3 = vor.u32 %v5362_v58, %v5359_v55  ;;  %v5387_v4 = vrot.slane %v5385_v34, 6  ;;  %v5390_v7 = vrot.slane %v5388_v61, 7  ;;  %v5350_v11 = vrot.slane %v5349_v59, 2 }
  0xa6   : > { %5151 = vrot.lane.b32.xlu1 %v5150_v30, %s7252_s16  ;;  %v7833_v2 = vcombine.low %v5113_v35, %v5120_v24  ;;  %v5396_v12 = vrot.slane %v5394_v62, 7  ;;  %v5630_v16 = vcombine.high %v6911_v51, %v6911_v51  ;;  %v6914_v29 = vrot.slane %v6910_v10, 9 }
  0xa7   : > { %v7828_v27 = vpop.permute.xlu1 %642  ;;  %v5364_v13 = vrot.slane %v5363_v3, 2  ;;  %v5391_v36 = vor.u32 %v5390_v7, %v5387_v4  ;;  %v5645_v14 = vrot.slane %v5622_v1, 7  ;;  %v6915_v35 = vrot.slane %v6911_v51, 9 }
  0xa8   : > { %v7843_v15 = vsel %vm7365_vm6, %v5350_v11, %v5354_v54  ;;  %v5649_v18 = vrot.slane %v5630_v16, 7  ;;  %v5832_v22 = vcombine.high %v6932_v8, %v6932_v8  ;;  %v6936_v31 = vrot.slane %v6932_v8, 9  ;;  %v6970_v54 = vld.sshfl [vmem:[%s7511_s12 + $0xc] sm:$0x12 pattern:$0x76325410] }
  0xa9   : > { %5122 = vrot.lane.b32.xlu0 %v7833_v2, %s7254_s26  ;;  %v7849_v19 = vsel %vm7365_vm6, %v5364_v13, %v5368_v60  ;;  %v5392_v6 = vrot.slane %v5391_v36, 2  ;;  %v5646_v30 = vsel %vm7429_vm13, %v6914_v29, %v5645_v14  ;;  %v5885_v48 = vcombine.high %v6941_v40, %v6941_v40  ;;  %v6972_v1 = vld.sshfl [vmem:[%s7511_s12 + $0x14] sm:$0x12 pattern:$0x76325410]  ;;  %s340_s12 = sadd.s32 %s6469_s11, %s6468_s10 }
  0xaa   : > { %5298 = vrot.lane.b32.xlu1 %v5297_v38, %s7255_s29  ;;  %v5398_v33 = vcombine.low %v7843_v15, %v7849_v19  ;;  %v5650_v38 = vsel %vm7429_vm13, %v6915_v35, %v5649_v18  ;;  %v5655_v0 = vcombine.low %v7707_v20, %v5646_v30  ;;  %v5847_v44 = vrot.slane %v5832_v22, 7  ;;  %s6470_s13 = sshll.u32 %s340_s12, 3 }
  0xab   : > { %v7845_v23 = vpop.permute.xlu1 %821  ;;  %v7862_v45 = vsel %vm7365_vm6, %v5392_v6, %v5396_v12  ;;  %v5656_v37 = vcombine.low %v5650_v38, %v7734_v57  ;;  %v5849_v39 = vcombine.low %v5646_v30, %v5650_v38  ;;  %v5909_v51 = vcombine.high %v6944_v43, %v6944_v43 }
  0xac   : > { %v5399_v9 = vcombine.low %v7713_v50, %v7862_v45  ;;  %v7871_v20 = vrot.slane %v5398_v33, %v7336_v5  ;;  %v5848_v47 = vsel %vm7429_vm13, %v6936_v31, %v5847_v44  ;;  %v5911_v52 = vshrl.u32 %v6941_v40, 16 }
  0xad   : > { %5268 = vrot.lane.b32.xlu0 %v7728_v53, %s7256_s30  ;;  %v5663_v53 = vrot.slane %v5655_v0, %v7336_v5  ;;  %v5670_v46 = vrot.slane %v5656_v37, %v7336_v5  ;;  %v5857_v17 = vrot.slane %v5849_v39, %v7336_v5  ;;  %v5850_v50 = vcombine.low %v7734_v57, %v5848_v47  ;;  %v7202_v0 = vld.sshfl [vmem:[%s7334_s9] sm:$0xf pattern:$0x76325410] }
  0xae   : > { %v5413_v25 = vrot.slane %v5399_v9, %v7336_v5  ;;  %v5914_v24 = vshll.u32 %v6941_v40, 16  ;;  %v5920_v58 = vshll.u32 %v5885_v48, 16  ;;  %v5953_v34 = vshrl.u32 %v6944_v43, 16 }
  0xaf   : > { %v5671_v56 = vcombine.low %v5663_v53, %v5670_v46  ;;  %v5864_v59 = vrot.slane %v5850_v50, %v7336_v5  ;;  %v5913_v60 = vrot.slane %v5911_v52, 6  ;;  %v5956_v62 = vshll.u32 %v6944_v43, 16  ;;  %v7203_v9 = vld.sshfl [vmem:[%s7334_s9 + $0x8] sm:$0xf pattern:$0x76325410] }
  0xb0   : > { %v5414_v61 = vcombine.low %v7871_v20, %v5413_v25  ;;  %v5916_v3 = vrot.slane %v5914_v24, 7  ;;  %v5922_v57 = vrot.slane %v5920_v58, 7  ;;  %v5955_v4 = vrot.slane %v5953_v34, 6 }
  0xb1   : > { %5672 = vrot.lane.b32.xlu1 %v5671_v56, %s7253_s25  ;;  %v5962_v7 = vshll.u32 %v5909_v51, 16  ;;  %v5865_v11 = vcombine.low %v5857_v17, %v5864_v59  ;;  %v5958_v12 = vrot.slane %v5956_v62, 7  ;;  %v6196_v16 = vcombine.high %v6969_v49, %v6969_v49  ;;  %v7156_v56 = vld [vmem:[%s8268_s3] sm:$0xff]   ;;  %v7158_v59 = vld [vmem:[%s8268_s3 + $0x10] sm:$0xff]  }
  0xb2   : > { %5415 = vrot.lane.b32.xlu0 %v5414_v61, %s7257_s8  ;;  %v5917_v29 = vor.u32 %v5916_v3, %v5913_v60  ;;  %v6204_v36 = vcombine.high %v6970_v54, %v6970_v54  ;;  %v6220_v14 = vcombine.high %v6972_v1, %v6972_v1  ;;  %v6973_v22 = vrot.slane %v6969_v49, 9  ;;  %v6509_v61 = vld.sshfl [vmem:[%s7334_s9 + $0x8] sm:$0x13 pattern:$0x76325410] }
  0xb3   : > { %v7866_v10 = vpop.permute.xlu0 %790  ;;  %v5964_v13 = vrot.slane %v5962_v7, 7  ;;  %v5959_v18 = vor.u32 %v5958_v12, %v5955_v4  ;;  %v6223_v6 = vrot.slane %v6196_v16, 7  ;;  %v6974_v31 = vrot.slane %v6970_v54, 9 }
  0xb4   : > { %v5918_v30 = vrot.slane %v5917_v29, 2  ;;  %v6227_v33 = vrot.slane %v6204_v36, 7  ;;  %v6976_v38 = vrot.slane %v6972_v1, 9  ;;  %v6235_v40 = vrot.slane %v6220_v14, 7 }
  0xb5   : > { %5866 = vrot.lane.b32.xlu1 %v5865_v11, %s7254_s26  ;;  %v5960_v44 = vrot.slane %v5959_v18, 2  ;;  %v6224_v39 = vsel %vm7429_vm13, %v6973_v22, %v6223_v6  ;;  %v6510_v60 = vld.sshfl [vmem:[%s7334_s9 + $0xc] sm:$0x13 pattern:$0x76325410]  ;;  %v1030_v62 = vcombine.high %v6507_v21, %v6507_v21  ;;  %v1046_v3 = vcombine.high %v6509_v61, %v6509_v61  ;;  %s8200_s26 = scalar_lea.vmem %s8270_s5, %s6470_s13 }
  0xb6   : > { %5789 = vrot.lane.b32.xlu0 %v7833_v2, %s7251_s15  ;;  %v5923_v53 = vsel %vm7365_vm6, %v5918_v30, %v5922_v57  ;;  %v6228_v43 = vsel %vm7429_vm13, %v6974_v31, %v6227_v33  ;;  %v6236_v47 = vsel %vm7429_vm13, %v6976_v38, %v6235_v40  ;;  %v1056_v57 = vshrl.u32 %v6507_v21, 16 }
  0xb7   : > { %v7889_v8 = vpop.permute.xlu0 %939  ;;  %v5965_v46 = vsel %vm7365_vm6, %v5960_v44, %v5964_v13  ;;  %v5966_v2 = vcombine.low %v5923_v53, %v7843_v15  ;;  %v6237_v17 = vcombine.low %v6224_v39, %v6228_v43  ;;  %v6238_v25 = vcombine.low %v7775_v42, %v6236_v47 }
  0xb8   : > { %v7883_v55 = vpop.permute.xlu1 %1210  ;;  %v5967_v48 = vcombine.low %v7849_v19, %v5965_v46  ;;  %v6161_v49 = vcombine.low %v5965_v46, %v7862_v45  ;;  %v369_v42 = vcombine.low %v7202_v0, %v7203_v9  ;;  %v1059_v4 = vshll.u32 %v6507_v21, 16 }
  0xb9   : > { %6060 = vrot.lane.b32.xlu1 %v7792_v63, %s7256_s30  ;;  %v5974_v51 = vrot.slane %v5966_v2, %v7336_v5  ;;  %v6245_v15 = vrot.slane %v6237_v17, %v7336_v5  ;;  %v6252_v54 = vrot.slane %v6238_v25, %v7336_v5  ;;  %v6508_v63 = vld.sshfl [vmem:[%s7334_s9 + $0x4] sm:$0x13 pattern:$0x76325410]  ;;  %v7258_v12 = vmov 0.0  }
  0xba   : > { %v5981_v52 = vrot.slane %v5967_v48, %v7336_v5  ;;  %v6175_v19 = vrot.slane %v6161_v49, %v7336_v5  ;;  %372 = vst.msk [vmem:[#allocation2] sm:$0xff] %vm371_vm14, %v369_v42  ;;  %v1038_v1 = vcombine.high %v6508_v63, %v6508_v63  ;;  %v1070_v7 = vshrl.u32 %v6508_v63, 16  ;;  %7012 = vmatprep.subr.bf16.mxu0 %v7258_v12 }
  0xbb   : > { %v7896_v37 = vpop.permute.xlu0 %1327  ;;  %v6253_v34 = vcombine.low %v6245_v15, %v6252_v54  ;;  %497 = vst.msk [vmem:[#allocation2] sm:$0xff] %vm496_vm15, %v7836_v26  ;;  %v1065_v16 = vshll.u32 %v1030_v62, 16  ;;  %v1073_v29 = vshll.u32 %v6508_v63, 16  ;;  %v1084_v36 = vshrl.u32 %v6509_v61, 16  ;;  %7020 = vmatprep.subr.bf16.mxu1 %v7258_v12  ;;  %7013 = vmatpush3.bf16.msra.mxu0 %v7156_v56  ;;  %v7162_v63 = vld [vmem:[%s8268_s3 + $0x20] sm:$0xff]  }
  0xbc   : > { %v7892_v35 = vpop.permute.xlu1 %1404  ;;  %v5982_v24 = vcombine.low %v5974_v51, %v5981_v52  ;;  %v6176_v58 = vcombine.low %v7871_v20, %v6175_v19  ;;  %v1054_v20 = vcombine.high %v6510_v60, %v6510_v60  ;;  %528 = vst.msk [vmem:[#allocation2] sm:$0xff] %vm527_vm0, %v7823_v41  ;;  %v1079_v13 = vshll.u32 %v1038_v1, 16  ;;  %v7157_v41 = vld [vmem:[%s8268_s3 + $0x8] sm:$0xff]   ;;  %7021 = vmatpush3.bf16.msra.mxu1 %v7158_v59 }
  0xbd   : > { %6254 = vrot.lane.b32.xlu1 %v6253_v34, %s7257_s8  ;;  %646 = vst.msk [vmem:[#allocation2] sm:$0xff] %vm645_vm1, %v7828_v27  ;;  %v1058_v26 = vrot.slane %v1056_v57, 6  ;;  %v1061_v14 = vrot.slane %v1059_v4, 7  ;;  %v1072_v18 = vrot.slane %v1070_v7, 6  ;;  %v1087_v22 = vshll.u32 %v6509_v61, 16  ;;  %7014 = vmatprep.subr.bf16.mxu0 %v7258_v12  ;;  %v7161_v27 = vld [vmem:[%s8268_s3 + $0x18] sm:$0xff]  }
  0xbe   : > { %5983 = vrot.lane.b32.xlu0 %v5982_v24, %s7252_s16  ;;  %676 = vst.msk [vmem:[#allocation2] sm:$0xff] %vm675_vm2, %v7811_v28  ;;  %v1067_v30 = vrot.slane %v1065_v16, 7  ;;  %v1075_v31 = vrot.slane %v1073_v29, 7  ;;  %v1081_v33 = vrot.slane %v1079_v13, 7  ;;  %v1086_v38 = vrot.slane %v1084_v36, 6  ;;  %7022 = vmatprep.subr.bf16.mxu1 %v7258_v12  ;;  %v7163_v61 = vld [vmem:[%s8268_s3 + $0x28] sm:$0xff]  }
  0xbf   : > { %v7926_v45 = vpop.permute.xlu0 %1521  ;;  %794 = vst.msk [vmem:[#allocation2] sm:$0xff] %vm793_vm3, %v7866_v10  ;;  %v1062_v0 = vor.u32 %v1061_v14, %v1058_v26  ;;  %v1089_v44 = vrot.slane %v1087_v22, 7  ;;  %v1093_v28 = vshll.u32 %v1046_v3, 16  ;;  %v1098_v39 = vshrl.u32 %v6510_v60, 16  ;;  %7015 = vmatpush3.bf16.msra.mxu0 %v7157_v41  ;;  %7016 = vmatprep.mubr.msk.bf16.mxu0 %vm7259_vm7, %v7258_v12 }
  0xc0   : > { %825 = vst.msk [vmem:[#allocation2] sm:$0xff] %vm824_vm4, %v7845_v23  ;;  %v1076_v9 = vor.u32 %v1075_v31, %v1072_v18  ;;  %v1101_v53 = vshll.u32 %v6510_v60, 16  ;;  %v1107_v43 = vshll.u32 %v1054_v20, 16  ;;  %7023 = vmatpush3.bf16.msra.mxu1 %v7161_v27  ;;  %7024 = vmatprep.mubr.msk.bf16.mxu1 %vm7259_vm7, %v7258_v12  ;;  %v7167_v31 = vld [vmem:[%s8268_s3 + $0x38] sm:$0xff]  }
  0xc1   : > { %v7917_v50 = vpop.permute.xlu1 %1598  ;;  %943 = vst.msk [vmem:[#allocation2] sm:$0xff] %vm942_vm5, %v7889_v8  ;;  %v1063_v46 = vrot.slane %v1062_v0, 2  ;;  %v1090_v2 = vor.u32 %v1089_v44, %v1086_v38  ;;  %v1100_v47 = vrot.slane %v1098_v39, 6  ;;  %v1095_v17 = vrot.slane %v1093_v28, 7  ;;  %7028 = vmatprep.subr.bf16.mxu0 %v7258_v12  ;;  %7036 = vmatprep.subr.bf16.mxu1 %v7258_v12 }
  0xc2   : > { %6177 = vrot.lane.b32.xlu0 %v6176_v58, %s7255_s29  ;;  %v1077_v10 = vrot.slane %v1076_v9, 2  ;;  %v1103_v48 = vrot.slane %v1101_v53, 7  ;;  %v1109_v15 = vrot.slane %v1107_v43, 7 }
  0xc3   : > { %v7953_v6 = vpop.permute.xlu0 %1715  ;;  %v1068_v23 = vsel %vm7365_vm6, %v1063_v46, %v1067_v30  ;;  %v1091_v49 = vrot.slane %v1090_v2, 2  ;;  %v6644_v62 = vld.sshfl [vmem:[%s7334_s9 + $0x10] sm:$0x13 pattern:$0x76325410]  ;;  %v7168_v2 = vld [vmem:[%s8268_s3 + $0x40] sm:$0xff]  }
  0xc4   : > { %v7981_v25 = vsel %vm7365_vm6, %v1077_v10, %v1081_v33  ;;  %v1104_v51 = vor.u32 %v1103_v48, %v1100_v47  ;;  %v2593_v3 = vshrl.u32 %v6644_v62, 16  ;;  %v2596_v20 = vshll.u32 %v6644_v62, 16  ;;  %v7204_v7 = vld.sshfl [vmem:[%s7334_s9 + $0x4] sm:$0xf pattern:$0x76325410] }
  0xc5   : > { %v7942_v11 = vpop.permute.xlu1 %1792  ;;  %v1111_v21 = vcombine.low %v1068_v23, %v7981_v25  ;;  %v7986_v19 = vsel %vm7365_vm6, %v1091_v49, %v1095_v17  ;;  %v7205_v16 = vld.sshfl [vmem:[%s7334_s9 + $0xc] sm:$0xf pattern:$0x76325410]  ;;  %v2549_v29 = vcombine.high %v6644_v62, %v6644_v62 }
  0xc6   : > { %v1105_v54 = vrot.slane %v1104_v51, 2  ;;  %v2595_v13 = vrot.slane %v2593_v3, 6  ;;  %v2598_v36 = vrot.slane %v2596_v20, 7  ;;  %v1885_v18 = vcombine.low %v7204_v7, %v7205_v16 }
  0xc7   : > { %v2002_v8 = vpop.permute.xlu0 %2001  ;;  %v1119_v58 = vrot.slane %v1111_v21, %v7336_v5  ;;  %v2606_v33 = vcombine.low %v7981_v25, %v7986_v19  ;;  %v6767_v39 = vld.sshfl [vmem:[%s7343_s14] sm:$0x13 pattern:$0x76325410] }
  0xc8   : > { %v7993_v42 = vsel %vm7365_vm6, %v1105_v54, %v1109_v15  ;;  %v944_v56 = vld [vmem:[#allocation2] sm:$0xff]  ;;  %v6769_v53 = vld.sshfl [vmem:[%s7343_s14 + $0x8] sm:$0x13 pattern:$0x76325410]  ;;  %v4038_v10 = vshrl.u32 %v6767_v39, 16 }
  0xc9   : > { %v7965_v40 = vpop.permute.xlu1 %2031  ;;  %v1112_v24 = vcombine.low %v7986_v19, %v7993_v42  ;;  %7017 = vmatmul.mubr.msk.bf16.vlgmr.msra.gmra.mrb[0].mxu0 %vm967_vm8, %v944_v56  ;;  %v2614_v0 = vrot.slane %v2606_v33, %v7336_v5  ;;  %v6768_v9 = vld.sshfl [vmem:[%s7343_s14 + $0x4] sm:$0x13 pattern:$0x76325410]  ;;  %v4041_v17 = vshll.u32 %v6767_v39, 16  ;;  %v4069_v25 = vshll.u32 %v6769_v53, 16 }
  0xca   : > { %7029 = vmatpush3.bf16.msra.mxu0 %v7162_v63  ;;  %7032 = vmatprep.mubr.msk.bf16.mxu0 %vm7259_vm7, %v7258_v12  ;;  %v6770_v46 = vld.sshfl [vmem:[%s7343_s14 + $0xc] sm:$0x13 pattern:$0x76325410]  ;;  %v4052_v48 = vshrl.u32 %v6768_v9, 16  ;;  %v4055_v23 = vshll.u32 %v6768_v9, 16  ;;  %v4020_v63 = vcombine.high %v6768_v9, %v6768_v9 }
  0xcb   : > { %v1126_v59 = vrot.slane %v1112_v24, %v7336_v5  ;;  %7030 = vmatprep.subr.bf16.mxu0 %v7258_v12  ;;  %v4080_v51 = vshrl.u32 %v6770_v46, 16  ;;  %v4083_v15 = vshll.u32 %v6770_v46, 16  ;;  %v7206_v19 = vld.sshfl [vmem:[%s7343_s14] sm:$0xf pattern:$0x76325410]  ;;  %v4036_v56 = vcombine.high %v6770_v46, %v6770_v46 }
  0xcc   : > { %v7207_v54 = vld.sshfl [vmem:[%s7343_s14 + $0x8] sm:$0xf pattern:$0x76325410]  ;;  %v4071_v62 = vrot.slane %v4069_v25, 7  ;;  %v4061_v16 = vshll.u32 %v4020_v63, 16 }
  0xcd   : > { %v2178_v52 = vpop.permute.xlu1 %2177  ;;  %v1127_v1 = vcombine.low %v1119_v58, %v1126_v59  ;;  %v7169_v24 = vld [vmem:[%s8268_s3 + $0x48] sm:$0xff]   ;;  %v4040_v58 = vrot.slane %v4038_v10, 6  ;;  %v4057_v59 = vrot.slane %v4055_v23, 7  ;;  %v4085_v3 = vrot.slane %v4083_v15, 7  ;;  %v7174_v23 = vld [vmem:[%s8268_s3 + $0x60] sm:$0xff]  }
  0xce   : > { %7031 = vmatpush3.bf16.msra.mxu0 %v7163_v61  ;;  %v4054_v61 = vrot.slane %v4052_v48, 6  ;;  %v6904_v48 = vld.sshfl [vmem:[%s7343_s14 + $0x10] sm:$0x13 pattern:$0x76325410] }
  0xcf   : > { %1129 = vst.msk [vmem:[#allocation2] sm:$0xff] %vm371_vm14, %v1127_v1  ;;  %7044 = vmatprep.subr.bf16.mxu0 %v7258_v12  ;;  %v4082_v1 = vrot.slane %v4080_v51, 6  ;;  %v5567_v25 = vshrl.u32 %v6904_v48, 16  ;;  %v5570_v51 = vshll.u32 %v6904_v48, 16  ;;  %v5523_v63 = vcombine.high %v6904_v48, %v6904_v48 }
  0xd0   : > { %v2149_v34 = vpop.permute.xlu0 %2148  ;;  %1213 = vst.msk [vmem:[#allocation2] sm:$0xff] %vm496_vm15, %v7883_v55 }
  0xd1   : > { %v2325_v60 = vpop.permute.xlu1 %2324  ;;  %1330 = vst.msk [vmem:[#allocation2] sm:$0xff] %vm527_vm0, %v7896_v37  ;;  %v2599_v37 = vor.u32 %v2598_v36, %v2595_v13  ;;  %v4058_v13 = vor.u32 %v4057_v59, %v4054_v61 }
  0xd2   : > { %1407 = vst.msk [vmem:[#allocation2] sm:$0xff] %vm645_vm1, %v7892_v35  ;;  %v2602_v35 = vshll.u32 %v2549_v29, 16 }
  0xd3   : > { %1524 = vst.msk [vmem:[#allocation2] sm:$0xff] %vm675_vm2, %v7926_v45  ;;  %v2600_v22 = vrot.slane %v2599_v37, 2  ;;  %v7164_v45 = vld [vmem:[%s8268_s3 + $0x30] sm:$0xff]   ;;  %v4089_v37 = vshll.u32 %v4036_v56, 16  ;;  %v5572_v56 = vrot.slane %v5570_v51, 7 }
  0xd4   : > { %v2295_v57 = vpop.permute.xlu0 %2294  ;;  %1601 = vst.msk [vmem:[#allocation2] sm:$0xff] %vm793_vm3, %v7917_v50  ;;  %v2604_v41 = vrot.slane %v2602_v35, 7  ;;  %v3373_v35 = vcombine.low %v7206_v19, %v7207_v54  ;;  %v7208_v19 = vld.sshfl [vmem:[%s7343_s14 + $0x4] sm:$0xf pattern:$0x76325410] }
  0xd5   : > { %v8013_v4 = vpop.permute.xlu1 %2698  ;;  %1718 = vst.msk [vmem:[#allocation2] sm:$0xff] %vm824_vm4, %v7953_v6  ;;  %v7209_v54 = vld.sshfl [vmem:[%s7343_s14 + $0xc] sm:$0xf pattern:$0x76325410] }
  0xd6   : > { %1795 = vst.msk [vmem:[#allocation2] sm:$0xff] %vm942_vm5, %v7942_v11  ;;  %v2605_v11 = vsel %vm7365_vm6, %v2600_v22, %v2604_v41  ;;  %v4063_v22 = vrot.slane %v4061_v16, 7  ;;  %v7177_v16 = vld [vmem:[%s8268_s3 + $0x78] sm:$0xff]  }
  0xd7   : > { %v2607_v38 = vcombine.low %v7993_v42, %v2605_v11  ;;  %v4028_v42 = vcombine.high %v6769_v53, %v6769_v53  ;;  %v4091_v11 = vrot.slane %v4089_v37, 7 }
  0xd8   : > { %v2442_v55 = vpop.permute.xlu0 %2441 }
  0xd9   : > { %v2621_v44 = vrot.slane %v2607_v38, %v7336_v5  ;;  %v4075_v29 = vshll.u32 %v4028_v42, 16  ;;  %v5569_v42 = vrot.slane %v5567_v25, 6 }
  0xdb   : > { %v2622_v43 = vcombine.low %v2614_v0, %v2621_v44  ;;  %v4077_v41 = vrot.slane %v4075_v29, 7 }
  0xdc   : > { %v8027_v26 = vpop.permute.xlu1 %2892  ;;  %v2816_v14 = vpop.permute.xlu0 %2815 }
  0xdd   : > { %v1796_v50 = vld [vmem:[#allocation2] sm:$0xff] }
  0xde   : > { %1887 = vst.msk [vmem:[#allocation2] sm:$0xff] %vm371_vm14, %v1885_v18  ;;  %7025 = vmatmul.mubr.msk.bf16.vlgmr.msra.gmra.mrb[0].mxu1 %vm967_vm8, %v1796_v50 }
  0xdf   : > { %2004 = vst.msk [vmem:[#allocation2] sm:$0xff] %vm496_vm15, %v2002_v8  ;;  %7037 = vmatpush3.bf16.msra.mxu1 %v7164_v45  ;;  %7040 = vmatprep.mubr.msk.bf16.mxu1 %vm7259_vm7, %v7258_v12  ;;  %v4066_v8 = vshrl.u32 %v6769_v53, 16  ;;  %v4059_v45 = vrot.slane %v4058_v13, 2 }
  0xe0   : > { %v8032_v30 = vpop.permute.xlu1 %3086  ;;  %2034 = vst.msk [vmem:[#allocation2] sm:$0xff] %vm527_vm0, %v7965_v40  ;;  %7038 = vmatprep.subr.bf16.mxu1 %v7258_v12 }
  0xe1   : > { %2151 = vst.msk [vmem:[#allocation2] sm:$0xff] %vm645_vm1, %v2149_v34  ;;  %v4043_v34 = vrot.slane %v4041_v17, 7 }
  0xe2   : > { %2180 = vst.msk [vmem:[#allocation2] sm:$0xff] %vm675_vm2, %v2178_v52  ;;  %v4012_v52 = vcombine.high %v6767_v39, %v6767_v39  ;;  %v7173_v39 = vld [vmem:[%s8268_s3 + $0x58] sm:$0xff]  }
  0xe3   : > { %2297 = vst.msk [vmem:[#allocation2] sm:$0xff] %vm793_vm3, %v2295_v57  ;;  %7039 = vmatpush3.bf16.msra.mxu1 %v7167_v31  ;;  %v7170_v31 = vld [vmem:[%s8268_s3 + $0x50] sm:$0xff]  }
  0xe4   : > { %2327 = vst.msk [vmem:[#allocation2] sm:$0xff] %vm824_vm4, %v2325_v60  ;;  %7052 = vmatprep.subr.bf16.mxu1 %v7258_v12  ;;  %v4068_v60 = vrot.slane %v4066_v8, 6  ;;  %v4047_v7 = vshll.u32 %v4012_v52, 16 }
  0xe5   : > { %v3281_v27 = vpop.permute.xlu1 %3280  ;;  %2444 = vst.msk [vmem:[#allocation2] sm:$0xff] %vm942_vm5, %v2442_v55  ;;  %v4086_v55 = vor.u32 %v4085_v3, %v4082_v1  ;;  %v7176_v3 = vld [vmem:[%s8268_s3 + $0x70] sm:$0xff]  }
  0xe6   : > { %v3010_v6 = vpop.permute.xlu0 %3009  ;;  %v4072_v36 = vor.u32 %v4071_v62, %v4068_v60  ;;  %v4049_v18 = vrot.slane %v4047_v7, 7  ;;  %v4860_v60 = vcombine.low %v7208_v19, %v7209_v54 }
  0xe8   : > { %v4073_v50 = vrot.slane %v4072_v36, 2 }
  0xe9   : > { %v8059_v40 = vpop.permute.xlu1 %3518 }
  0xea   : > { %v3204_v28 = vpop.permute.xlu0 %3203  ;;  %v8105_v0 = vsel %vm7365_vm6, %v4073_v50, %v4077_v41  ;;  %v8195_v50 = vld [vmem:[%s8269_s4] ss:$0 sm:$0xff] }
  0xec   : > { %v2445_v49 = vld [vmem:[#allocation2] sm:$0xff] }
  0xed   : > { %2624 = vst.msk [vmem:[#allocation2] sm:$0xff] %vm371_vm14, %v2622_v43  ;;  %7033 = vmatmul.mubr.msk.bf16.vlgmr.msra.gmra.mrb[4].mxu0 %vm967_vm8, %v2445_v49  ;;  %v8071_v21 = vpop.permute.xlu1 %3664 }
  0xee   : > { %v8067_v47 = vpop.permute.xlu0 %3489  ;;  %2701 = vst.msk [vmem:[#allocation2] sm:$0xff] %vm496_vm15, %v8013_v4  ;;  %7045 = vmatpush3.bf16.msra.mxu0 %v7168_v2  ;;  %7048 = vmatprep.mubr.msk.bf16.mxu0 %vm7259_vm7, %v7258_v12  ;;  %v4044_v4 = vor.u32 %v4043_v34, %v4040_v58  ;;  %v5573_v58 = vor.u32 %v5572_v56, %v5569_v42  ;;  %v5576_v34 = vshll.u32 %v5523_v63, 16 }
  0xef   : > { %2818 = vst.msk [vmem:[#allocation2] sm:$0xff] %vm527_vm0, %v2816_v14  ;;  %7046 = vmatprep.subr.bf16.mxu0 %v7258_v12 }
  0xf0   : > { %2895 = vst.msk [vmem:[#allocation2] sm:$0xff] %vm645_vm1, %v8027_v26  ;;  %v4045_v14 = vrot.slane %v4044_v4, 2  ;;  %v5574_v62 = vrot.slane %v5573_v58, 2  ;;  %v5578_v1 = vrot.slane %v5576_v34, 7 }
  0xf1   : > { %3012 = vst.msk [vmem:[#allocation2] sm:$0xff] %vm675_vm2, %v3010_v6  ;;  %v3812_v57 = vpop.permute.xlu1 %3811 }
  0xf2   : > { %v3636_v20 = vpop.permute.xlu0 %3635  ;;  %3089 = vst.msk [vmem:[#allocation2] sm:$0xff] %vm793_vm3, %v8032_v30  ;;  %7047 = vmatpush3.bf16.msra.mxu0 %v7169_v24  ;;  %v4087_v30 = vrot.slane %v4086_v55, 2  ;;  %v4050_v38 = vsel %vm7365_vm6, %v4045_v14, %v4049_v18  ;;  %v5579_v7 = vsel %vm7365_vm6, %v5574_v62, %v5578_v1 }
  0xf3   : > { %3206 = vst.msk [vmem:[#allocation2] sm:$0xff] %vm824_vm4, %v3204_v28  ;;  %7060 = vmatprep.subr.bf16.mxu0 %v7258_v12 }
  0xf4   : > { %3283 = vst.msk [vmem:[#allocation2] sm:$0xff] %vm942_vm5, %v3281_v27  ;;  %v8101_v27 = vsel %vm7365_vm6, %v4059_v45, %v4063_v22  ;;  %v8109_v44 = vsel %vm7365_vm6, %v4087_v30, %v4091_v11  ;;  %vm1012_vm6 = vcmask 64512  }
  0xf5   : > { %v4093_v9 = vcombine.low %v4050_v38, %v8101_v27  ;;  %v4094_v53 = vcombine.low %v8105_v0, %v8109_v44  ;;  %v5580_v32 = vcombine.low %v8101_v27, %v8105_v0  ;;  %v5581_v29 = vcombine.low %v8109_v44, %v5579_v7 }
  0xf7   : > { %v4108_v2 = vrot.slane %v4094_v53, %v7336_v5  ;;  %v5595_v55 = vrot.slane %v5581_v29, %v7336_v5 }
  0xfa   : > { %v3782_v26 = vpop.permute.xlu0 %3781 }
  0xfb   : > { %v3284_v33 = vld [vmem:[#allocation2] sm:$0xff] }
  0xfc   : > { %3375 = vst.msk [vmem:[#allocation2] sm:$0xff] %vm371_vm14, %v3373_v35  ;;  %7041 = vmatmul.mubr.msk.bf16.vlgmr.msra.gmra.mrb[4].mxu1 %vm967_vm8, %v3284_v33 }
  0xfd   : > { %v4186_v6 = vpop.permute.xlu1 %4185  ;;  %3492 = vst.msk [vmem:[#allocation2] sm:$0xff] %vm496_vm15, %v8067_v47  ;;  %7053 = vmatpush3.bf16.msra.mxu1 %v7170_v31  ;;  %7056 = vmatprep.mubr.msk.bf16.mxu1 %vm7259_vm7, %v7258_v12 }
  0xfe   : > { %v3929_v28 = vpop.permute.xlu0 %3928  ;;  %3521 = vst.msk [vmem:[#allocation2] sm:$0xff] %vm527_vm0, %v8059_v40  ;;  %7054 = vmatprep.subr.bf16.mxu1 %v7258_v12  ;;  %v4101_v40 = vrot.slane %v4093_v9, %v7336_v5 }
  0xff   : > { %3638 = vst.msk [vmem:[#allocation2] sm:$0xff] %vm645_vm1, %v3636_v20 }
 0x100   : > { %3667 = vst.msk [vmem:[#allocation2] sm:$0xff] %vm675_vm2, %v8071_v21  ;;  %v4109_v17 = vcombine.low %v4101_v40, %v4108_v2  ;;  %v7175_v21 = vld [vmem:[%s8268_s3 + $0x68] sm:$0xff]  }
 0x101   : > { %3784 = vst.msk [vmem:[#allocation2] sm:$0xff] %vm793_vm3, %v3782_v26  ;;  %7055 = vmatpush3.bf16.msra.mxu1 %v7173_v39 }
 0x102   : > { %3814 = vst.msk [vmem:[#allocation2] sm:$0xff] %vm824_vm4, %v3812_v57  ;;  %7068 = vmatprep.subr.bf16.mxu1 %v7258_v12 }
 0x103   : > { %3931 = vst.msk [vmem:[#allocation2] sm:$0xff] %vm942_vm5, %v3929_v28 }
 0x104   : > { %v4380_v43 = vpop.permute.xlu1 %4379 }
 0x108   : > { %v4303_v46 = vpop.permute.xlu0 %4302 }
 0x10a   : > { %v3932_v8 = vld [vmem:[#allocation2] sm:$0xff] }
 0x10b   : > { %4111 = vst.msk [vmem:[#allocation2] sm:$0xff] %vm371_vm14, %v4109_v17  ;;  %7049 = vmatmul.mubr.msk.bf16.vlgmr.msra.gmra.mrb[8].mxu0 %vm967_vm8, %v3932_v8 }
 0x10c   : > { %v4497_v47 = vpop.permute.xlu0 %4496  ;;  %v4574_v10 = vpop.permute.xlu1 %4573  ;;  %4188 = vst.msk [vmem:[#allocation2] sm:$0xff] %vm496_vm15, %v4186_v6  ;;  %7061 = vmatpush3.bf16.msra.mxu0 %v7174_v23  ;;  %7064 = vmatprep.mubr.msk.bf16.mxu0 %vm7259_vm7, %v7258_v12 }
 0x10d   : > { %4305 = vst.msk [vmem:[#allocation2] sm:$0xff] %vm527_vm0, %v4303_v46  ;;  %7062 = vmatprep.subr.bf16.mxu0 %v7258_v12 }
 0x10e   : > { %4382 = vst.msk [vmem:[#allocation2] sm:$0xff] %vm645_vm1, %v4380_v43 }
 0x10f   : > { %4499 = vst.msk [vmem:[#allocation2] sm:$0xff] %vm675_vm2, %v4497_v47 }
 0x110   : > { %v4768_v49 = vpop.permute.xlu1 %4767  ;;  %v4691_v15 = vpop.permute.xlu0 %4690  ;;  %4576 = vst.msk [vmem:[#allocation2] sm:$0xff] %vm793_vm3, %v4574_v10  ;;  %7063 = vmatpush3.bf16.msra.mxu0 %v7175_v21 }
 0x111   : > { %4693 = vst.msk [vmem:[#allocation2] sm:$0xff] %vm824_vm4, %v4691_v15 }
 0x112   : > { %4770 = vst.msk [vmem:[#allocation2] sm:$0xff] %vm942_vm5, %v4768_v49 }
 0x114   : > { %v5006_v52 = vpop.permute.xlu1 %5005 }
 0x117   : > { %v4977_v24 = vpop.permute.xlu0 %4976 }
 0x118   : > { %v5152_v61 = vpop.permute.xlu1 %5151 }
 0x119   : > { %v4771_v20 = vld [vmem:[#allocation2] sm:$0xff] }
 0x11a   : > { %4862 = vst.msk [vmem:[#allocation2] sm:$0xff] %vm371_vm14, %v4860_v60  ;;  %7057 = vmatmul.mubr.msk.bf16.vlgmr.msra.gmra.mrb[8].mxu1 %vm967_vm8, %v4771_v20 }
 0x11b   : > { %v5123_v59 = vpop.permute.xlu0 %5122  ;;  %4979 = vst.msk [vmem:[#allocation2] sm:$0xff] %vm496_vm15, %v4977_v24  ;;  %7069 = vmatpush3.bf16.msra.mxu1 %v7176_v3  ;;  %7072 = vmatprep.mubr.msk.bf16.mxu1 %vm7259_vm7, %v7258_v12 }
 0x11c   : > { %v5299_v57 = vpop.permute.xlu1 %5298  ;;  %5008 = vst.msk [vmem:[#allocation2] sm:$0xff] %vm527_vm0, %v5006_v52  ;;  %7070 = vmatprep.subr.bf16.mxu1 %v7258_v12  ;;  %v5588_v12 = vrot.slane %v5580_v32, %v7336_v5 }
 0x11d   : > { %5125 = vst.msk [vmem:[#allocation2] sm:$0xff] %vm645_vm1, %v5123_v59 }
 0x11e   : > { %5154 = vst.msk [vmem:[#allocation2] sm:$0xff] %vm675_vm2, %v5152_v61  ;;  %v5596_v35 = vcombine.low %v5588_v12, %v5595_v55 }
 0x11f   : > { %v5269_v4 = vpop.permute.xlu0 %5268  ;;  %7071 = vmatpush3.bf16.msra.mxu1 %v7177_v16 }
 0x120   : > { %5271 = vst.msk [vmem:[#allocation2] sm:$0xff] %vm793_vm3, %v5269_v4 }
 0x121   : > { %5301 = vst.msk [vmem:[#allocation2] sm:$0xff] %vm824_vm4, %v5299_v57 }
 0x123   : > { %v5673_v13 = vpop.permute.xlu1 %5672 }
 0x124   : > { %v5416_v36 = vpop.permute.xlu0 %5415 }
 0x125   : > { %5418 = vst.msk [vmem:[#allocation2] sm:$0xff] %vm942_vm5, %v5416_v36 }
 0x127   : > { %v5867_v37 = vpop.permute.xlu1 %5866 }
 0x128   : > { %v5790_v26 = vpop.permute.xlu0 %5789 }
 0x12b   : > { %v6061_v18 = vpop.permute.xlu1 %6060 }
 0x12c   : > { %v5419_v14 = vld [vmem:[#allocation2] sm:$0xff] }
 0x12d   : > { %5598 = vst.msk [vmem:[#allocation2] sm:$0xff] %vm371_vm14, %v5596_v35  ;;  %7065 = vmatmul.mubr.msk.bf16.vlgmr.msra.gmra.mrb[12].mxu0 %vm967_vm8, %v5419_v14 }
 0x12e   : > { %5675 = vst.msk [vmem:[#allocation2] sm:$0xff] %vm496_vm15, %v5673_v13 }
 0x12f   : > { %5792 = vst.msk [vmem:[#allocation2] sm:$0xff] %vm527_vm0, %v5790_v26  ;;  %v6255_v5 = vpop.permute.xlu1 %6254 }
 0x130   : > { %5869 = vst.msk [vmem:[#allocation2] sm:$0xff] %vm645_vm1, %v5867_v37  ;;  %v5984_v22 = vpop.permute.xlu0 %5983 }
 0x131   : > { %5986 = vst.msk [vmem:[#allocation2] sm:$0xff] %vm675_vm2, %v5984_v22 }
 0x132   : > { %6063 = vst.msk [vmem:[#allocation2] sm:$0xff] %vm793_vm3, %v6061_v18 }
 0x134   : > { %v6178_v41 = vpop.permute.xlu0 %6177 }
 0x135   : > { %6180 = vst.msk [vmem:[#allocation2] sm:$0xff] %vm824_vm4, %v6178_v41 }
 0x136   : > { %6257 = vst.msk [vmem:[#allocation2] sm:$0xff] %vm942_vm5, %v6255_v5 }
 0x13d   : > { %v6258_v45 = vld [vmem:[#allocation2] sm:$0xff] }
 0x13e   : > { %7073 = vmatmul.mubr.msk.bf16.vlgmr.msra.gmra.mrb[12].mxu1 %vm967_vm8, %v6258_v45 }
 0x19c   : > { %v1005_v30 = vpop.f32.mrb[0].mxu0 }
 0x19d   : > { %v1006_v11 = vadd.f32 %v8195_v50, %v1005_v30  ;;  %v7018_v6 = vpop.f32.mrb[1].mxu0 }
 0x19e   : > { %v1008_v31 = vpop.f32.mrb[2].mxu0 }
 0x19f   : > { %1013 = vst.msk [vmem:[%s8200_s26] sm:$0xff] %vm1012_vm6, %v1006_v11  ;;  %v1009_v33 = vadd.f32 %v8195_v50, %v1008_v31  ;;  %v7019_v38 = vpop.f32.mrb[3].mxu0 }
 0x1a1   : > { %1014 = vst.msk [vmem:[%s8200_s26 + $0x8] sm:$0xff] %vm1012_vm6, %v1009_v33 }
 0x1b1   : > { %v1851_v27 = vpop.f32.mrb[0].mxu1 }
 0x1b2   : > { %v1852_v0 = vadd.f32 %v8195_v50, %v1851_v27  ;;  %v7026_v44 = vpop.f32.mrb[1].mxu1 }
 0x1b3   : > { %v1854_v28 = vpop.f32.mrb[2].mxu1 }
 0x1b4   : > { %6578 = vst.msk [vmem:[%s8200_s26 + $0x10] sm:$0xff] %vm1012_vm6, %v1852_v0  ;;  %v1855_v39 = vadd.f32 %v8195_v50, %v1854_v28  ;;  %v7027_v9 = vpop.f32.mrb[3].mxu1 }
 0x1b6   : > { %6579 = vst.msk [vmem:[%s8200_s26 + $0x18] sm:$0xff] %vm1012_vm6, %v1855_v39 }
 0x1c0   : > { %v2500_v53 = vpop.f32.mrb[4].mxu0 }
 0x1c1   : > { %v2501_v43 = vadd.f32 %v8195_v50, %v2500_v53  ;;  %v7034_v46 = vpop.f32.mrb[5].mxu0 }
 0x1c2   : > { %v2503_v40 = vpop.f32.mrb[6].mxu0 }
 0x1c3   : > { %6635 = vst.msk [vmem:[%s8200_s26 + $0x20] sm:$0xff] %vm1012_vm6, %v2501_v43  ;;  %v2504_v2 = vadd.f32 %v8195_v50, %v2503_v40  ;;  %v7035_v47 = vpop.f32.mrb[7].mxu0 }
 0x1c5   : > { %6636 = vst.msk [vmem:[%s8200_s26 + $0x28] sm:$0xff] %vm1012_vm6, %v2504_v2 }
 0x1cf   : > { %v3339_v10 = vpop.f32.mrb[4].mxu1 }
 0x1d0   : > { %v3340_v17 = vadd.f32 %v8195_v50, %v3339_v10  ;;  %v7042_v48 = vpop.f32.mrb[5].mxu1 }
 0x1d1   : > { %v3342_v23 = vpop.f32.mrb[6].mxu1 }
 0x1d2   : > { %6724 = vst.msk [vmem:[%s8200_s26 + $0x30] sm:$0xff] %vm1012_vm6, %v3340_v17  ;;  %v3343_v49 = vadd.f32 %v8195_v50, %v3342_v23  ;;  %v7043_v8 = vpop.f32.mrb[7].mxu1 }
 0x1d4   : > { %6725 = vst.msk [vmem:[%s8200_s26 + $0x38] sm:$0xff] %vm1012_vm6, %v3343_v49 }
 0x1de   : > { %v3987_v25 = vpop.f32.mrb[8].mxu0 }
 0x1df   : > { %v3988_v51 = vadd.f32 %v8195_v50, %v3987_v25  ;;  %v7050_v15 = vpop.f32.mrb[9].mxu0 }
 0x1e0   : > { %v3990_v21 = vpop.f32.mrb[10].mxu0 }
 0x1e1   : > { %6765 = vst.msk [vmem:[%s8200_s26 + $0x40] sm:$0xff] %vm1012_vm6, %v3988_v51  ;;  %v3991_v52 = vadd.f32 %v8195_v50, %v3990_v21  ;;  %v7051_v19 = vpop.f32.mrb[11].mxu0 }
 0x1e3   : > { %6766 = vst.msk [vmem:[%s8200_s26 + $0x48] sm:$0xff] %vm1012_vm6, %v3991_v52 }
 0x1ed   : > { %v4826_v54 = vpop.f32.mrb[8].mxu1 }
 0x1ee   : > { %v4827_v63 = vadd.f32 %v8195_v50, %v4826_v54  ;;  %v7058_v42 = vpop.f32.mrb[9].mxu1 }
 0x1ef   : > { %v4829_v56 = vpop.f32.mrb[10].mxu1 }
 0x1f0   : > { %6838 = vst.msk [vmem:[%s8200_s26 + $0x50] sm:$0xff] %vm1012_vm6, %v4827_v63  ;;  %v4830_v24 = vadd.f32 %v8195_v50, %v4829_v56  ;;  %v7059_v58 = vpop.f32.mrb[11].mxu1 }
 0x1f2   : > { %6839 = vst.msk [vmem:[%s8200_s26 + $0x58] sm:$0xff] %vm1012_vm6, %v4830_v24 }
 0x200   : > { %v5474_v34 = vpop.f32.mrb[12].mxu0 }
 0x201   : > { %v5475_v61 = vadd.f32 %v8195_v50, %v5474_v34  ;;  %v7066_v59 = vpop.f32.mrb[13].mxu0 }
 0x202   : > { %v5477_v60 = vpop.f32.mrb[14].mxu0 }
 0x203   : > { %6895 = vst.msk [vmem:[%s8200_s26 + $0x60] sm:$0xff] %vm1012_vm6, %v5475_v61  ;;  %v5478_v62 = vadd.f32 %v8195_v50, %v5477_v60  ;;  %v7067_v1 = vpop.f32.mrb[15].mxu0 }
 0x205   : > { %6896 = vst.msk [vmem:[%s8200_s26 + $0x68] sm:$0xff] %vm1012_vm6, %v5478_v62 }
 0x211   : > { %v6313_v3 = vpop.f32.mrb[12].mxu1 }
 0x212   : > { %v6314_v20 = vadd.f32 %v8195_v50, %v6313_v3  ;;  %v7074_v57 = vpop.f32.mrb[13].mxu1 }
 0x213   : > { %v6316_v4 = vpop.f32.mrb[14].mxu1 }
 0x214   : > { %6984 = vst.msk [vmem:[%s8200_s26 + $0x70] sm:$0xff] %vm1012_vm6, %v6314_v20  ;;  %v6317_v7 = vadd.f32 %v8195_v50, %v6316_v4  ;;  %v7075_v16 = vpop.f32.mrb[15].mxu1 }
 0x216   : > { %6985 = vst.msk [vmem:[%s8200_s26 + $0x78] sm:$0xff] %vm1012_vm6, %v6317_v7 }
 0x217 PF: > { %s15_s22 = sadd.s32 1, %s7248_s22   ;;  %s8280_s18 = smov %s7240_s20 }
 0x218   : > { %p12_p10 = scmp.ge.s32.totalorder %s15_s22, 10   ;;  %s8281_s19 = smov %s7244_s21 }
 0x219   : > { %s8282_s20 = smov %s8285_s23  ;;  %s8283_s21 = smov %s8289_s24 }
 0x21a   :  { %14 = sbr.rel (!%p12_p10) target bundleno = 3 (0x3), region = 96 }

</bundles_post_ra>
